<compile_context>
chip_gen: v5e
topology: v5e:2x2
jax: 0.10.0
libtpu: 0.0.40
codegen_flags: <defaults>
</compile_context>

<pallas_src>
import math
import functools

import numpy as np
import jax
import jax.numpy as jnp
from jax.experimental import pallas as pl
from jax.experimental.pallas import tpu as pltpu

_LOG2 = math.log(2.0)


def _ssp(x):
    """shifted_softplus(x) = softplus(x) - log(2), numerically stable."""
    return jnp.maximum(x, 0.0) + jnp.log(1.0 + jnp.exp(-jnp.abs(x))) - _LOG2


# ---------------------------------------------------------------------------
# Pallas kernel
# ---------------------------------------------------------------------------
def make_field_schnet_kernel(n_interactions: int, cutoff: float, rbf_coeff: float):
    f32 = jnp.float32
    bf16 = jnp.bfloat16

    def kernel(q0_ref, E_ref, v_ref, Gj_ref, Si_ref, off_ref,
               WFF_ref, WRF_ref, B_ref, out_ref):
        Fp = q0_ref.shape[1]                 # lane-padded feature width

        q0 = q0_ref[...]                     # [N, Fp]  f32
        E = E_ref[...]                       # [N, 3]   f32
        v = v_ref[...]                       # [P, 3]   f32
        Gj = Gj_ref[...]                     # [P, N]   bf16 one-hot gather
        Si = Si_ref[...]                     # [N, P]   bf16 one-hot scatter-add
        off = off_ref[...]                   # [1, R]   f32

        def mm(a, b):
            # bf16 operands, f32 accumulation on the MXU.
            return jnp.dot(a.astype(bf16), b.astype(bf16),
                           preferred_element_type=f32)

        def dense(x, W, bias_row=None, act=None):
            y = mm(x, W)
            if bias_row is not None:
                y = y + bias_row
            if act is not None:
                y = act(y)
            return y

        bias = lambda k: B_ref[k:k + 1, :]          # [1, Fp]
        gather = lambda x: mm(Gj, x)                # x[idx_j]
        scatter = lambda y: mm(Si, y)               # scatter_add over idx_i

        # --- geometry / GaussianRBF / CosineCutoff, hoisted once -------------
        d2 = jnp.sum(v * v, axis=-1, keepdims=True)              # [P, 1]
        d = jnp.sqrt(d2)
        f_ij = jnp.exp(rbf_coeff * (d - off) ** 2)               # [P, R]
        rcut = 0.5 * (jnp.cos(jnp.pi * d / cutoff) + 1.0)
        rcut = rcut * (d < cutoff).astype(f32)                   # [P, 1]
        inv_d5 = pl.reciprocal(d2 * d2 * d, approx=True)         # EUP slot
        rc_inv_d5 = rcut * inv_d5

        vc = [v[:, c:c + 1] for c in range(3)]                   # [P, 1]
        vrc = [vc[c] * rcut for c in range(3)]                   # rcut-scaled dirs
        v3c = [3.0 * vc[c] for c in range(3)]
        Ec = [E[:, c:c + 1] for c in range(3)]                   # [N, 1]

        q = q0                                                   # [N, Fp]

        # --- initial DipoleUpdate (mu starts from zeros) ----------------------
        qj = gather(mm(q, WFF_ref[0]))                           # [P, Fp]
        mu3 = scatter(jnp.concatenate(
            [qj * vrc[0], qj * vrc[1], qj * vrc[2]], axis=-1))   # [N, 3*Fp]

        for t in range(n_interactions):
            wb = 1 + 8 * t
            bb = 8 * t
            mu_c = [mu3[:, c * Fp:(c + 1) * Fp] for c in range(3)]

            # --- fused first filter layer (SchNet + dipole share f_ij) --------
            h = dense(f_ij, WRF_ref[t],
                      jnp.concatenate([bias(bb + 0), bias(bb + 5)], axis=-1),
                      _ssp)                                       # [P, 2*Fp]
            Wf = dense(h[:, :Fp], WFF_ref[wb + 1], bias(bb + 1)) * rcut
            Wd = dense(h[:, Fp:], WFF_ref[wb + 5], bias(bb + 6)) * rc_inv_d5

            # --- one gather for scalar features + all 3 dipole components -----
            x = mm(q, WFF_ref[wb + 0])                            # in2f (no bias)
            gath = gather(jnp.concatenate([x, mu3], axis=-1))     # [P, 4*Fp]
            x_j = gath[:, :Fp]
            muj_c = [gath[:, (c + 1) * Fp:(c + 2) * Fp] for c in range(3)]

            vdotmu = vc[0] * muj_c[0] + vc[1] * muj_c[1] + vc[2] * muj_c[2]
            tij = [(muj_c[c] * d2 - v3c[c] * vdotmu) * Wd for c in range(3)]

            # --- one scatter for cfconv aggregation + dipole tensor ------------
            scat = scatter(jnp.concatenate([x_j * Wf] + tij, axis=-1))  # [N,4*Fp]
            xagg = scat[:, :Fp]
            prod = mu3 * scat[:, Fp:]                             # mu * tensor_i
            dq_i = prod[:, :Fp] + prod[:, Fp:2 * Fp] + prod[:, 2 * Fp:]

            # --- SchNetInteraction f2out ---------------------------------------
            dq = dense(dense(xagg, WFF_ref[wb + 2], bias(bb + 2), _ssp),
                       WFF_ref[wb + 3], bias(bb + 3))
            # --- FieldSchNetFieldInteraction (electric field) -------------------
            vsum = mu_c[0] * Ec[0] + mu_c[1] * Ec[1] + mu_c[2] * Ec[2]
            dq_field = dense(vsum, WFF_ref[wb + 4], bias(bb + 4), _ssp)
            # --- DipoleInteraction transform -----------------------------------
            dq_dipole = dense(dq_i, WFF_ref[wb + 6], bias(bb + 7), _ssp)

            dq = dq + dq_field + dq_dipole
            q = q + dq

            # --- DipoleUpdate driven by dq (NOT q), matching reference ---------
            qj = gather(mm(dq, WFF_ref[wb + 7]))
            mu3 = mu3 + scatter(jnp.concatenate(
                [qj * vrc[0], qj * vrc[1], qj * vrc[2]], axis=-1))

        out_ref[...] = q

    return kernel


# ---------------------------------------------------------------------------
# Wrapper (glue: lane padding, bf16 one-hots, fused filter weights)
# ---------------------------------------------------------------------------
def _pad_axis(x, axis, new_size):
    if x.shape[axis] == new_size:
        return x
    pad = [(0, 0)] * x.ndim
    pad[axis] = (0, new_size - x.shape[axis])
    return jnp.pad(x, pad)


def field_schnet_pallas(q0, E, v_ij, idx_i, idx_j, WFF, WRF, B, rbf_offsets,
                        *, n_interactions, cutoff, rbf_coeff, lane=128):
    f32, bf16 = jnp.float32, jnp.bfloat16
    N, F = q0.shape
    Fp = ((F + lane - 1) // lane) * lane          # lane-dense feature width

    # zero-pad features -> lane-dense (padded columns provably stay zero)
    q0p = _pad_axis(q0.astype(f32), 1, Fp)
    WFFp = _pad_axis(_pad_axis(WFF.astype(f32), 1, Fp), 2, Fp).astype(bf16)
    Bp = _pad_axis(B.astype(f32), 1, Fp)

    # fuse the two per-interaction rbf-filter first layers: [T, R, 2*Fp]
    WRFp = _pad_axis(WRF.astype(f32), 2, Fp)                       # [2T, R, Fp]
    WRFcat = jnp.concatenate([WRFp[0::2], WRFp[1::2]], axis=-1).astype(bf16)

    # one-hot gather / scatter matrices directly in bf16 (0/1 exact)
    Gj = jax.nn.one_hot(idx_j, N, dtype=bf16)                      # [P, N]
    Si = jax.nn.one_hot(idx_i, N, dtype=bf16).T                    # [N, P]
    offs = jnp.asarray(rbf_offsets, f32).reshape(1, -1)

    # TODO(synk): for production sizes (N >~ 512, P >~ 10k) the dense one-hot
    # Gj/Si no longer fit VMEM (especially v7x's 64 MiB): tile the pair axis
    # with a grid (scatter accumulated across an "arbitrary" axis with pl.when
    # init/finalize) or replace one-hot matmuls with PrefetchScalarGridSpec +
    # SMEM idx_i/idx_j + manual DMA gather.
    kernel = make_field_schnet_kernel(n_interactions, float(cutoff),
                                      float(rbf_coeff))
    out = pl.pallas_call(
        kernel,
        out_shape=jax.ShapeDtypeStruct((N, Fp), f32),
        in_specs=[pl.BlockSpec(memory_space=pltpu.MemorySpace.VMEM)] * 9,
        out_specs=pl.BlockSpec(memory_space=pltpu.MemorySpace.VMEM),
    )(q0p, E.astype(f32), v_ij.astype(f32), Gj, Si, offs, WFFp, WRFcat, Bp)
    return out[:, :F]


# ---------------------------------------------------------------------------
# Pure-JAX reference (mirrors the PyTorch module semantics exactly, f32)
# ---------------------------------------------------------------------------
def field_schnet_reference(q0, E, r_ij, idx_i, idx_j, WFF, WRF, B, rbf_offsets,
                           n_interactions, cutoff, rbf_coeff):
    N, F = q0.shape
    d_ij = jnp.linalg.norm(r_ij, axis=1)                                    # [P]
    f_ij = jnp.exp(rbf_coeff * (d_ij[:, None] - rbf_offsets[None, :]) ** 2)  # [P, R]
    rcut = 0.5 * (jnp.cos(jnp.pi * d_ij / cutoff) + 1.0) * (d_ij < cutoff)

    seg = functools.partial(jax.ops.segment_sum, num_segments=N)

    def dense(x, W, b=None, act=None):
        y = x @ W
        if b is not None:
            y = y + b
        if act is not None:
            y = act(y)
        return y

    def dipole_update(src, mu, W):
        qi = jnp.matmul(src, W)                                      # [N,1,F]
        dmu_ij = qi[idx_j] * rcut[:, None, None] * r_ij[:, :, None]  # [P,3,F]
        return mu + seg(dmu_ij, idx_i)

    q = q0[:, None, :]                                               # [N,1,F]
    mu = jnp.zeros((N, 3, F), jnp.float32)
    mu = dipole_update(q, mu, WFF[0])

    for t in range(n_interactions):
        wb = 1 + 8 * t
        bb = 8 * t
        # SchNetInteraction
        x = dense(q[:, 0, :], WFF[wb + 0])
        Wf = dense(dense(f_ij, WRF[2 * t + 0], B[bb + 0], _ssp),
                   WFF[wb + 1], B[bb + 1]) * rcut[:, None]
        xagg = seg(x[idx_j] * Wf, idx_i)
        dq = dense(dense(xagg, WFF[wb + 2], B[bb + 2], _ssp),
                   WFF[wb + 3], B[bb + 3])[:, None, :]
        # Field interaction
        vf = jnp.sum(mu * E[:, :, None], axis=1, keepdims=True)
        dq_field = _ssp(jnp.matmul(vf, WFF[wb + 4]) + B[bb + 4])
        # Dipole interaction
        Wd = (dense(dense(f_ij, WRF[2 * t + 1], B[bb + 5], _ssp),
                    WFF[wb + 5], B[bb + 6]) * rcut[:, None])[:, None, :]
        mu_j = mu[idx_j]
        tensor_ij = (mu_j * d_ij[:, None, None] ** 2
                     - 3.0 * r_ij[:, :, None]
                     * jnp.sum(r_ij[:, :, None] * mu_j, axis=1, keepdims=True))
        tensor_ij = tensor_ij * Wd / d_ij[:, None, None] ** 5
        tensor_i = seg(tensor_ij, idx_i)
        dq_i = jnp.sum(mu * tensor_i, axis=1, keepdims=True)
        dq_dipole = _ssp(jnp.matmul(dq_i, WFF[wb + 6]) + B[bb + 7])

        dq = dq + dq_field + dq_dipole
        q = q + dq
        mu = dipole_update(dq, mu, WFF[wb + 7])

    return q[:, 0, :]


# ---------------------------------------------------------------------------
if __name__ == "__main__":
    key = jax.random.PRNGKey(0)

    N_ATOMS = 8          # atoms
    F = 32               # n_atom_basis (= n_filters)
    R = 16               # n_rbf
    T = 2                # n_interactions
    MAX_Z = 100
    CUTOFF = 5.0

    # --- geometry: jittered cube so all pairwise distances are O(1-3) Å -----
    key, k1, k2, k3, k4, k5, k6, k7 = jax.random.split(key, 8)
    base = jnp.array([[i, j, k] for i in range(2) for j in range(2) for k in range(2)],
                     dtype=jnp.float32) * 1.8
    pos = base + 0.1 * jax.random.normal(k1, (N_ATOMS, 3), dtype=jnp.float32)

    # full neighbor list (all i != j)
    ii, jj = np.meshgrid(np.arange(N_ATOMS), np.arange(N_ATOMS), indexing="ij")
    mask = ii != jj
    idx_i = jnp.asarray(ii[mask], dtype=jnp.int32)       # [P]
    idx_j = jnp.asarray(jj[mask], dtype=jnp.int32)       # [P]
    r_ij = pos[idx_j] - pos[idx_i]                       # [P, 3]

    # --- atomic embedding (nn.Embedding with padding_idx=0) ------------------
    Z = jax.random.randint(k2, (N_ATOMS,), 1, 10)
    emb_table = 0.5 * jax.random.normal(k3, (MAX_Z, F), dtype=jnp.float32)
    emb_table = emb_table.at[0].set(0.0)
    q0 = emb_table[Z]                                    # [N, F]

    # --- external electric field (single molecule -> idx_m all zeros) --------
    electric_field = jax.random.normal(k4, (1, 3), dtype=jnp.float32)
    idx_m = jnp.zeros((N_ATOMS,), dtype=jnp.int32)
    E = electric_field[idx_m]                            # [N, 3]

    # --- GaussianRBF / CosineCutoff parameters --------------------------------
    rbf_offsets = jnp.linspace(0.0, CUTOFF, R).astype(jnp.float32)
    width = float(rbf_offsets[1] - rbf_offsets[0])
    rbf_coeff = -0.5 / (width ** 2)

    # --- deterministic synthetic weights --------------------------------------
    # WFF layout (per block t, base = 1 + 8*t):
    #   0: initial DipoleUpdate W
    #   +0 in2f, +1 schnet filter W2, +2 f2out W1, +3 f2out W2,
    #   +4 field-interaction W, +5 dipole filter W2, +6 dipole transform W,
    #   +7 DipoleUpdate W
    # WRF (per block): 2t schnet filter W1, 2t+1 dipole filter W1
    # B   (per block): 0 schnet filt b1, 1 schnet filt b2, 2 f2out b1, 3 f2out b2,
    #                  4 field b, 5 dip filt b1, 6 dip filt b2, 7 dip transform b
    n_wff, n_wrf, n_b = 1 + 8 * T, 2 * T, 8 * T
    WFF = 0.1 * jax.random.normal(k5, (n_wff, F, F), dtype=jnp.float32)
    WRF = 0.1 * jax.random.normal(k6, (n_wrf, R, F), dtype=jnp.float32)
    B = 0.05 * jax.random.normal(k7, (n_b, F), dtype=jnp.float32)

    # --- run Pallas kernel -----------------------------------------------------
    out = field_schnet_pallas(q0, E, r_ij, idx_i, idx_j, WFF, WRF, B, rbf_offsets,
                              n_interactions=T, cutoff=CUTOFF, rbf_coeff=rbf_coeff)
    out = jax.block_until_ready(out)

    # --- check against pure-JAX f32 reference ----------------------------------
    with jax.default_matmul_precision("float32"):
        ref = field_schnet_reference(q0, E, r_ij, idx_i, idx_j, WFF, WRF, B,
                                     rbf_offsets, T, CUTOFF, rbf_coeff)
    ref = jax.block_until_ready(ref)
    assert out.shape == (N_ATOMS, F)
    assert jnp.all(jnp.isfinite(out))
    # bf16 MXU operands (f32 accumulation) + approx reciprocal introduce
    # ~1e-3..1e-2 level differences vs. the pure-f32 reference.
    max_err = float(jnp.max(jnp.abs(out - ref)))
    assert jnp.allclose(out, ref, rtol=5e-2, atol=5e-2), f"max abs err {max_err}"

    print("KERNEL_OK")
</pallas_src>

<mosaic_0001>
module attributes {stable_mosaic.version = 11 : i64} {
  func.func @kernel(%arg0: memref<8x128xf32, #tpu.memory_space<vmem>>, %arg1: memref<8x3xf32, #tpu.memory_space<vmem>>, %arg2: memref<56x3xf32, #tpu.memory_space<vmem>>, %arg3: memref<56x8xbf16, #tpu.memory_space<vmem>>, %arg4: memref<8x56xbf16, #tpu.memory_space<vmem>>, %arg5: memref<1x16xf32, #tpu.memory_space<vmem>>, %arg6: memref<17x128x128xbf16, #tpu.memory_space<vmem>>, %arg7: memref<2x16x256xbf16, #tpu.memory_space<vmem>>, %arg8: memref<16x128xf32, #tpu.memory_space<vmem>>, %arg9: memref<8x128xf32, #tpu.memory_space<vmem>>) attributes {dimension_semantics = [], scalar_prefetch = 0 : i64, scratch_operands = 0 : i64, tpu.core_type = #tpu.core_type<tc>} {
    %c0 = arith.constant 0 : index
    %c0_0 = arith.constant 0 : index
    %0 = vector.load %arg0[%c0, %c0_0] : memref<8x128xf32, #tpu.memory_space<vmem>>, vector<8x128xf32>
    %c0_1 = arith.constant 0 : index
    %c0_2 = arith.constant 0 : index
    %1 = vector.load %arg1[%c0_1, %c0_2] : memref<8x3xf32, #tpu.memory_space<vmem>>, vector<8x3xf32>
    %c0_3 = arith.constant 0 : index
    %c0_4 = arith.constant 0 : index
    %2 = vector.load %arg2[%c0_3, %c0_4] : memref<56x3xf32, #tpu.memory_space<vmem>>, vector<56x3xf32>
    %c0_5 = arith.constant 0 : index
    %c0_6 = arith.constant 0 : index
    %3 = vector.load %arg3[%c0_5, %c0_6] : memref<56x8xbf16, #tpu.memory_space<vmem>>, vector<56x8xbf16>
    %c0_7 = arith.constant 0 : index
    %c0_8 = arith.constant 0 : index
    %4 = vector.load %arg4[%c0_7, %c0_8] : memref<8x56xbf16, #tpu.memory_space<vmem>>, vector<8x56xbf16>
    %c0_9 = arith.constant 0 : index
    %c0_10 = arith.constant 0 : index
    %5 = vector.load %arg5[%c0_9, %c0_10] : memref<1x16xf32, #tpu.memory_space<vmem>>, vector<1x16xf32>
    %6 = arith.mulf %2, %2 : vector<56x3xf32>
    %cst = arith.constant dense<0.000000e+00> : vector<56xf32>
    %7 = vector.multi_reduction <add>, %6, %cst [1] : vector<56x3xf32> to vector<56xf32>
    %8 = vector.shape_cast %7 : vector<56xf32> to vector<56x1xf32>
    %9 = math.sqrt %8 : vector<56x1xf32>
    %10 = vector.broadcast %9 : vector<56x1xf32> to vector<56x16xf32>
    %11 = vector.broadcast %5 : vector<1x16xf32> to vector<56x16xf32>
    %12 = arith.subf %10, %11 : vector<56x16xf32>
    %13 = arith.mulf %12, %12 : vector<56x16xf32>
    %cst_11 = arith.constant -4.49999952 : f32
    %14 = vector.broadcast %cst_11 : f32 to vector<56x16xf32>
    %15 = arith.mulf %14, %13 : vector<56x16xf32>
    %16 = math.exp %15 : vector<56x16xf32>
    %cst_12 = arith.constant 3.14159274 : f32
    %17 = vector.broadcast %cst_12 : f32 to vector<56x1xf32>
    %18 = arith.mulf %17, %9 : vector<56x1xf32>
    %cst_13 = arith.constant 5.000000e+00 : f32
    %19 = vector.broadcast %cst_13 : f32 to vector<56x1xf32>
    %20 = arith.divf %18, %19 : vector<56x1xf32>
    %21 = math.cos %20 : vector<56x1xf32>
    %cst_14 = arith.constant 1.000000e+00 : f32
    %22 = vector.broadcast %cst_14 : f32 to vector<56x1xf32>
    %23 = arith.addf %21, %22 : vector<56x1xf32>
    %cst_15 = arith.constant 5.000000e-01 : f32
    %24 = vector.broadcast %cst_15 : f32 to vector<56x1xf32>
    %25 = arith.mulf %24, %23 : vector<56x1xf32>
    %cst_16 = arith.constant 5.000000e+00 : f32
    %26 = vector.broadcast %cst_16 : f32 to vector<56x1xf32>
    %27 = arith.cmpf olt, %9, %26 : vector<56x1xf32>
    %28 = arith.extui %27 : vector<56x1xi1> to vector<56x1xi32>
    %29 = arith.sitofp %28 : vector<56x1xi32> to vector<56x1xf32>
    %30 = arith.mulf %25, %29 : vector<56x1xf32>
    %31 = arith.mulf %8, %8 : vector<56x1xf32>
    %32 = arith.mulf %31, %9 : vector<56x1xf32>
    %33 = tpu.reciprocal %32 {approx = true} : vector<56x1xf32> -> vector<56x1xf32>
    %34 = arith.mulf %30, %33 : vector<56x1xf32>
    %35 = vector.extract_strided_slice %2 {offsets = [0, 0], sizes = [56, 1], strides = [1, 1]} : vector<56x3xf32> to vector<56x1xf32>
    %36 = vector.extract_strided_slice %2 {offsets = [0, 1], sizes = [56, 1], strides = [1, 1]} : vector<56x3xf32> to vector<56x1xf32>
    %37 = vector.extract_strided_slice %2 {offsets = [0, 2], sizes = [56, 1], strides = [1, 1]} : vector<56x3xf32> to vector<56x1xf32>
    %38 = arith.mulf %35, %30 : vector<56x1xf32>
    %39 = arith.mulf %36, %30 : vector<56x1xf32>
    %40 = arith.mulf %37, %30 : vector<56x1xf32>
    %cst_17 = arith.constant 3.000000e+00 : f32
    %41 = vector.broadcast %cst_17 : f32 to vector<56x1xf32>
    %42 = arith.mulf %41, %35 : vector<56x1xf32>
    %cst_18 = arith.constant 3.000000e+00 : f32
    %43 = vector.broadcast %cst_18 : f32 to vector<56x1xf32>
    %44 = arith.mulf %43, %36 : vector<56x1xf32>
    %cst_19 = arith.constant 3.000000e+00 : f32
    %45 = vector.broadcast %cst_19 : f32 to vector<56x1xf32>
    %46 = arith.mulf %45, %37 : vector<56x1xf32>
    %47 = vector.extract_strided_slice %1 {offsets = [0, 0], sizes = [8, 1], strides = [1, 1]} : vector<8x3xf32> to vector<8x1xf32>
    %48 = vector.extract_strided_slice %1 {offsets = [0, 1], sizes = [8, 1], strides = [1, 1]} : vector<8x3xf32> to vector<8x1xf32>
    %49 = vector.extract_strided_slice %1 {offsets = [0, 2], sizes = [8, 1], strides = [1, 1]} : vector<8x3xf32> to vector<8x1xf32>
    %c0_20 = arith.constant 0 : index
    %c0_21 = arith.constant 0 : index
    %c0_22 = arith.constant 0 : index
    %50 = vector.load %arg6[%c0_20, %c0_21, %c0_22] : memref<17x128x128xbf16, #tpu.memory_space<vmem>>, vector<1x128x128xbf16>
    %51 = vector.shape_cast %50 : vector<1x128x128xbf16> to vector<128x128xbf16>
    %52 = arith.truncf %0 : vector<8x128xf32> to vector<8x128xbf16>
    %cst_23 = arith.constant dense<0.000000e+00> : vector<8x128xf32>
    %53 = tpu.matmul %52, %51, %cst_23 {dimension_numbers = #tpu.dot_dimension_numbers<[1], [0], [0], [1], [0, 0, 1, 1], [], []>} : vector<8x128xbf16>, vector<128x128xbf16>, vector<8x128xf32> -> vector<8x128xf32>
    %54 = arith.truncf %53 : vector<8x128xf32> to vector<8x128xbf16>
    %cst_24 = arith.constant dense<0.000000e+00> : vector<56x128xf32>
    %55 = tpu.matmul %3, %54, %cst_24 {dimension_numbers = #tpu.dot_dimension_numbers<[1], [0], [0], [1], [0, 0, 1, 1], [], []>} : vector<56x8xbf16>, vector<8x128xbf16>, vector<56x128xf32> -> vector<56x128xf32>
    %56 = vector.broadcast %38 : vector<56x1xf32> to vector<56x128xf32>
    %57 = arith.mulf %55, %56 : vector<56x128xf32>
    %58 = vector.broadcast %39 : vector<56x1xf32> to vector<56x128xf32>
    %59 = arith.mulf %55, %58 : vector<56x128xf32>
    %60 = vector.broadcast %40 : vector<56x1xf32> to vector<56x128xf32>
    %61 = arith.mulf %55, %60 : vector<56x128xf32>
    %62 = tpu.concatenate %57, %59, %61 in 1 : vector<56x128xf32>, vector<56x128xf32>, vector<56x128xf32> -> vector<56x384xf32>
    %63 = arith.truncf %62 : vector<56x384xf32> to vector<56x384xbf16>
    %cst_25 = arith.constant dense<0.000000e+00> : vector<8x384xf32>
    %64 = tpu.matmul %4, %63, %cst_25 {dimension_numbers = #tpu.dot_dimension_numbers<[1], [0], [0], [1], [0, 0, 1, 1], [], []>} : vector<8x56xbf16>, vector<56x384xbf16>, vector<8x384xf32> -> vector<8x384xf32>
    %65 = vector.extract_strided_slice %64 {offsets = [0, 0], sizes = [8, 128], strides = [1, 1]} : vector<8x384xf32> to vector<8x128xf32>
    %66 = vector.extract_strided_slice %64 {offsets = [0, 128], sizes = [8, 128], strides = [1, 1]} : vector<8x384xf32> to vector<8x128xf32>
    %67 = vector.extract_strided_slice %64 {offsets = [0, 256], sizes = [8, 128], strides = [1, 1]} : vector<8x384xf32> to vector<8x128xf32>
    %c0_26 = arith.constant 0 : index
    %c0_27 = arith.constant 0 : index
    %c0_28 = arith.constant 0 : index
    %68 = vector.load %arg7[%c0_26, %c0_27, %c0_28] : memref<2x16x256xbf16, #tpu.memory_space<vmem>>, vector<1x16x256xbf16>
    %69 = vector.shape_cast %68 : vector<1x16x256xbf16> to vector<16x256xbf16>
    %c0_29 = arith.constant 0 : index
    %c0_30 = arith.constant 0 : index
    %70 = vector.load %arg8[%c0_29, %c0_30] : memref<16x128xf32, #tpu.memory_space<vmem>>, vector<1x128xf32>
    %c5 = arith.constant 5 : index
    %c0_31 = arith.constant 0 : index
    %71 = vector.load %arg8[%c5, %c0_31] : memref<16x128xf32, #tpu.memory_space<vmem>>, vector<1x128xf32>
    %72 = tpu.concatenate %70, %71 in 1 : vector<1x128xf32>, vector<1x128xf32> -> vector<1x256xf32>
    %73 = arith.truncf %16 : vector<56x16xf32> to vector<56x16xbf16>
    %cst_32 = arith.constant dense<0.000000e+00> : vector<56x256xf32>
    %74 = tpu.matmul %73, %69, %cst_32 {dimension_numbers = #tpu.dot_dimension_numbers<[1], [0], [0], [1], [0, 0, 1, 1], [], []>} : vector<56x16xbf16>, vector<16x256xbf16>, vector<56x256xf32> -> vector<56x256xf32>
    %75 = vector.broadcast %72 : vector<1x256xf32> to vector<56x256xf32>
    %76 = arith.addf %74, %75 : vector<56x256xf32>
    %cst_33 = arith.constant 0.000000e+00 : f32
    %77 = vector.broadcast %cst_33 : f32 to vector<56x256xf32>
    %78 = arith.maximumf %76, %77 : vector<56x256xf32>
    %79 = math.absf %76 : vector<56x256xf32>
    %cst_34 = arith.constant 0.000000e+00 : f32
    %80 = vector.broadcast %cst_34 : f32 to vector<56x256xf32>
    %81 = arith.subf %80, %79 : vector<56x256xf32>
    %82 = math.exp %81 : vector<56x256xf32>
    %cst_35 = arith.constant 1.000000e+00 : f32
    %83 = vector.broadcast %cst_35 : f32 to vector<56x256xf32>
    %84 = arith.addf %83, %82 : vector<56x256xf32>
    %85 = math.log %84 : vector<56x256xf32>
    %86 = arith.addf %78, %85 : vector<56x256xf32>
    %cst_36 = arith.constant 0.693147182 : f32
    %87 = vector.broadcast %cst_36 : f32 to vector<56x256xf32>
    %88 = arith.subf %86, %87 : vector<56x256xf32>
    %89 = vector.extract_strided_slice %88 {offsets = [0, 0], sizes = [56, 128], strides = [1, 1]} : vector<56x256xf32> to vector<56x128xf32>
    %c2 = arith.constant 2 : index
    %c0_37 = arith.constant 0 : index
    %c0_38 = arith.constant 0 : index
    %90 = vector.load %arg6[%c2, %c0_37, %c0_38] : memref<17x128x128xbf16, #tpu.memory_space<vmem>>, vector<1x128x128xbf16>
    %91 = vector.shape_cast %90 : vector<1x128x128xbf16> to vector<128x128xbf16>
    %c1 = arith.constant 1 : index
    %c0_39 = arith.constant 0 : index
    %92 = vector.load %arg8[%c1, %c0_39] : memref<16x128xf32, #tpu.memory_space<vmem>>, vector<1x128xf32>
    %93 = arith.truncf %89 : vector<56x128xf32> to vector<56x128xbf16>
    %cst_40 = arith.constant dense<0.000000e+00> : vector<56x128xf32>
    %94 = tpu.matmul %93, %91, %cst_40 {dimension_numbers = #tpu.dot_dimension_numbers<[1], [0], [0], [1], [0, 0, 1, 1], [], []>} : vector<56x128xbf16>, vector<128x128xbf16>, vector<56x128xf32> -> vector<56x128xf32>
    %95 = vector.broadcast %92 : vector<1x128xf32> to vector<56x128xf32>
    %96 = arith.addf %94, %95 : vector<56x128xf32>
    %97 = vector.broadcast %30 : vector<56x1xf32> to vector<56x128xf32>
    %98 = arith.mulf %96, %97 : vector<56x128xf32>
    %99 = vector.extract_strided_slice %88 {offsets = [0, 128], sizes = [56, 128], strides = [1, 1]} : vector<56x256xf32> to vector<56x128xf32>
    %c6 = arith.constant 6 : index
    %c0_41 = arith.constant 0 : index
    %c0_42 = arith.constant 0 : index
    %100 = vector.load %arg6[%c6, %c0_41, %c0_42] : memref<17x128x128xbf16, #tpu.memory_space<vmem>>, vector<1x128x128xbf16>
    %101 = vector.shape_cast %100 : vector<1x128x128xbf16> to vector<128x128xbf16>
    %c6_43 = arith.constant 6 : index
    %c0_44 = arith.constant 0 : index
    %102 = vector.load %arg8[%c6_43, %c0_44] : memref<16x128xf32, #tpu.memory_space<vmem>>, vector<1x128xf32>
    %103 = arith.truncf %99 : vector<56x128xf32> to vector<56x128xbf16>
    %cst_45 = arith.constant dense<0.000000e+00> : vector<56x128xf32>
    %104 = tpu.matmul %103, %101, %cst_45 {dimension_numbers = #tpu.dot_dimension_numbers<[1], [0], [0], [1], [0, 0, 1, 1], [], []>} : vector<56x128xbf16>, vector<128x128xbf16>, vector<56x128xf32> -> vector<56x128xf32>
    %105 = vector.broadcast %102 : vector<1x128xf32> to vector<56x128xf32>
    %106 = arith.addf %104, %105 : vector<56x128xf32>
    %107 = vector.broadcast %34 : vector<56x1xf32> to vector<56x128xf32>
    %108 = arith.mulf %106, %107 : vector<56x128xf32>
    %c1_46 = arith.constant 1 : index
    %c0_47 = arith.constant 0 : index
    %c0_48 = arith.constant 0 : index
    %109 = vector.load %arg6[%c1_46, %c0_47, %c0_48] : memref<17x128x128xbf16, #tpu.memory_space<vmem>>, vector<1x128x128xbf16>
    %110 = vector.shape_cast %109 : vector<1x128x128xbf16> to vector<128x128xbf16>
    %111 = arith.truncf %0 : vector<8x128xf32> to vector<8x128xbf16>
    %cst_49 = arith.constant dense<0.000000e+00> : vector<8x128xf32>
    %112 = tpu.matmul %111, %110, %cst_49 {dimension_numbers = #tpu.dot_dimension_numbers<[1], [0], [0], [1], [0, 0, 1, 1], [], []>} : vector<8x128xbf16>, vector<128x128xbf16>, vector<8x128xf32> -> vector<8x128xf32>
    %113 = tpu.concatenate %112, %64 in 1 : vector<8x128xf32>, vector<8x384xf32> -> vector<8x512xf32>
    %114 = arith.truncf %113 : vector<8x512xf32> to vector<8x512xbf16>
    %cst_50 = arith.constant dense<0.000000e+00> : vector<56x512xf32>
    %115 = tpu.matmul %3, %114, %cst_50 {dimension_numbers = #tpu.dot_dimension_numbers<[1], [0], [0], [1], [0, 0, 1, 1], [], []>} : vector<56x8xbf16>, vector<8x512xbf16>, vector<56x512xf32> -> vector<56x512xf32>
    %116 = vector.extract_strided_slice %115 {offsets = [0, 0], sizes = [56, 128], strides = [1, 1]} : vector<56x512xf32> to vector<56x128xf32>
    %117 = vector.extract_strided_slice %115 {offsets = [0, 128], sizes = [56, 128], strides = [1, 1]} : vector<56x512xf32> to vector<56x128xf32>
    %118 = vector.extract_strided_slice %115 {offsets = [0, 256], sizes = [56, 128], strides = [1, 1]} : vector<56x512xf32> to vector<56x128xf32>
    %119 = vector.extract_strided_slice %115 {offsets = [0, 384], sizes = [56, 128], strides = [1, 1]} : vector<56x512xf32> to vector<56x128xf32>
    %120 = vector.broadcast %35 : vector<56x1xf32> to vector<56x128xf32>
    %121 = arith.mulf %120, %117 : vector<56x128xf32>
    %122 = vector.broadcast %36 : vector<56x1xf32> to vector<56x128xf32>
    %123 = arith.mulf %122, %118 : vector<56x128xf32>
    %124 = arith.addf %121, %123 : vector<56x128xf32>
    %125 = vector.broadcast %37 : vector<56x1xf32> to vector<56x128xf32>
    %126 = arith.mulf %125, %119 : vector<56x128xf32>
    %127 = arith.addf %124, %126 : vector<56x128xf32>
    %128 = vector.broadcast %8 : vector<56x1xf32> to vector<56x128xf32>
    %129 = arith.mulf %117, %128 : vector<56x128xf32>
    %130 = vector.broadcast %42 : vector<56x1xf32> to vector<56x128xf32>
    %131 = arith.mulf %130, %127 : vector<56x128xf32>
    %132 = arith.subf %129, %131 : vector<56x128xf32>
    %133 = arith.mulf %132, %108 : vector<56x128xf32>
    %134 = vector.broadcast %8 : vector<56x1xf32> to vector<56x128xf32>
    %135 = arith.mulf %118, %134 : vector<56x128xf32>
    %136 = vector.broadcast %44 : vector<56x1xf32> to vector<56x128xf32>
    %137 = arith.mulf %136, %127 : vector<56x128xf32>
    %138 = arith.subf %135, %137 : vector<56x128xf32>
    %139 = arith.mulf %138, %108 : vector<56x128xf32>
    %140 = vector.broadcast %8 : vector<56x1xf32> to vector<56x128xf32>
    %141 = arith.mulf %119, %140 : vector<56x128xf32>
    %142 = vector.broadcast %46 : vector<56x1xf32> to vector<56x128xf32>
    %143 = arith.mulf %142, %127 : vector<56x128xf32>
    %144 = arith.subf %141, %143 : vector<56x128xf32>
    %145 = arith.mulf %144, %108 : vector<56x128xf32>
    %146 = arith.mulf %116, %98 : vector<56x128xf32>
    %147 = tpu.concatenate %146, %133, %139, %145 in 1 : vector<56x128xf32>, vector<56x128xf32>, vector<56x128xf32>, vector<56x128xf32> -> vector<56x512xf32>
    %148 = arith.truncf %147 : vector<56x512xf32> to vector<56x512xbf16>
    %cst_51 = arith.constant dense<0.000000e+00> : vector<8x512xf32>
    %149 = tpu.matmul %4, %148, %cst_51 {dimension_numbers = #tpu.dot_dimension_numbers<[1], [0], [0], [1], [0, 0, 1, 1], [], []>} : vector<8x56xbf16>, vector<56x512xbf16>, vector<8x512xf32> -> vector<8x512xf32>
    %150 = vector.extract_strided_slice %149 {offsets = [0, 0], sizes = [8, 128], strides = [1, 1]} : vector<8x512xf32> to vector<8x128xf32>
    %151 = vector.extract_strided_slice %149 {offsets = [0, 128], sizes = [8, 384], strides = [1, 1]} : vector<8x512xf32> to vector<8x384xf32>
    %152 = arith.mulf %64, %151 : vector<8x384xf32>
    %153 = vector.extract_strided_slice %152 {offsets = [0, 0], sizes = [8, 128], strides = [1, 1]} : vector<8x384xf32> to vector<8x128xf32>
    %154 = vector.extract_strided_slice %152 {offsets = [0, 128], sizes = [8, 128], strides = [1, 1]} : vector<8x384xf32> to vector<8x128xf32>
    %155 = arith.addf %153, %154 : vector<8x128xf32>
    %156 = vector.extract_strided_slice %152 {offsets = [0, 256], sizes = [8, 128], strides = [1, 1]} : vector<8x384xf32> to vector<8x128xf32>
    %157 = arith.addf %155, %156 : vector<8x128xf32>
    %c3 = arith.constant 3 : index
    %c0_52 = arith.constant 0 : index
    %c0_53 = arith.constant 0 : index
    %158 = vector.load %arg6[%c3, %c0_52, %c0_53] : memref<17x128x128xbf16, #tpu.memory_space<vmem>>, vector<1x128x128xbf16>
    %159 = vector.shape_cast %158 : vector<1x128x128xbf16> to vector<128x128xbf16>
    %c2_54 = arith.constant 2 : index
    %c0_55 = arith.constant 0 : index
    %160 = vector.load %arg8[%c2_54, %c0_55] : memref<16x128xf32, #tpu.memory_space<vmem>>, vector<1x128xf32>
    %161 = arith.truncf %150 : vector<8x128xf32> to vector<8x128xbf16>
    %cst_56 = arith.constant dense<0.000000e+00> : vector<8x128xf32>
    %162 = tpu.matmul %161, %159, %cst_56 {dimension_numbers = #tpu.dot_dimension_numbers<[1], [0], [0], [1], [0, 0, 1, 1], [], []>} : vector<8x128xbf16>, vector<128x128xbf16>, vector<8x128xf32> -> vector<8x128xf32>
    %163 = vector.broadcast %160 : vector<1x128xf32> to vector<8x128xf32>
    %164 = arith.addf %162, %163 : vector<8x128xf32>
    %cst_57 = arith.constant 0.000000e+00 : f32
    %165 = vector.broadcast %cst_57 : f32 to vector<8x128xf32>
    %166 = arith.maximumf %164, %165 : vector<8x128xf32>
    %167 = math.absf %164 : vector<8x128xf32>
    %cst_58 = arith.constant 0.000000e+00 : f32
    %168 = vector.broadcast %cst_58 : f32 to vector<8x128xf32>
    %169 = arith.subf %168, %167 : vector<8x128xf32>
    %170 = math.exp %169 : vector<8x128xf32>
    %cst_59 = arith.constant 1.000000e+00 : f32
    %171 = vector.broadcast %cst_59 : f32 to vector<8x128xf32>
    %172 = arith.addf %171, %170 : vector<8x128xf32>
    %173 = math.log %172 : vector<8x128xf32>
    %174 = arith.addf %166, %173 : vector<8x128xf32>
    %cst_60 = arith.constant 0.693147182 : f32
    %175 = vector.broadcast %cst_60 : f32 to vector<8x128xf32>
    %176 = arith.subf %174, %175 : vector<8x128xf32>
    %c4 = arith.constant 4 : index
    %c0_61 = arith.constant 0 : index
    %c0_62 = arith.constant 0 : index
    %177 = vector.load %arg6[%c4, %c0_61, %c0_62] : memref<17x128x128xbf16, #tpu.memory_space<vmem>>, vector<1x128x128xbf16>
    %178 = vector.shape_cast %177 : vector<1x128x128xbf16> to vector<128x128xbf16>
    %c3_63 = arith.constant 3 : index
    %c0_64 = arith.constant 0 : index
    %179 = vector.load %arg8[%c3_63, %c0_64] : memref<16x128xf32, #tpu.memory_space<vmem>>, vector<1x128xf32>
    %180 = arith.truncf %176 : vector<8x128xf32> to vector<8x128xbf16>
    %cst_65 = arith.constant dense<0.000000e+00> : vector<8x128xf32>
    %181 = tpu.matmul %180, %178, %cst_65 {dimension_numbers = #tpu.dot_dimension_numbers<[1], [0], [0], [1], [0, 0, 1, 1], [], []>} : vector<8x128xbf16>, vector<128x128xbf16>, vector<8x128xf32> -> vector<8x128xf32>
    %182 = vector.broadcast %179 : vector<1x128xf32> to vector<8x128xf32>
    %183 = arith.addf %181, %182 : vector<8x128xf32>
    %184 = vector.broadcast %47 : vector<8x1xf32> to vector<8x128xf32>
    %185 = arith.mulf %65, %184 : vector<8x128xf32>
    %186 = vector.broadcast %48 : vector<8x1xf32> to vector<8x128xf32>
    %187 = arith.mulf %66, %186 : vector<8x128xf32>
    %188 = arith.addf %185, %187 : vector<8x128xf32>
    %189 = vector.broadcast %49 : vector<8x1xf32> to vector<8x128xf32>
    %190 = arith.mulf %67, %189 : vector<8x128xf32>
    %191 = arith.addf %188, %190 : vector<8x128xf32>
    %c5_66 = arith.constant 5 : index
    %c0_67 = arith.constant 0 : index
    %c0_68 = arith.constant 0 : index
    %192 = vector.load %arg6[%c5_66, %c0_67, %c0_68] : memref<17x128x128xbf16, #tpu.memory_space<vmem>>, vector<1x128x128xbf16>
    %193 = vector.shape_cast %192 : vector<1x128x128xbf16> to vector<128x128xbf16>
    %c4_69 = arith.constant 4 : index
    %c0_70 = arith.constant 0 : index
    %194 = vector.load %arg8[%c4_69, %c0_70] : memref<16x128xf32, #tpu.memory_space<vmem>>, vector<1x128xf32>
    %195 = arith.truncf %191 : vector<8x128xf32> to vector<8x128xbf16>
    %cst_71 = arith.constant dense<0.000000e+00> : vector<8x128xf32>
    %196 = tpu.matmul %195, %193, %cst_71 {dimension_numbers = #tpu.dot_dimension_numbers<[1], [0], [0], [1], [0, 0, 1, 1], [], []>} : vector<8x128xbf16>, vector<128x128xbf16>, vector<8x128xf32> -> vector<8x128xf32>
    %197 = vector.broadcast %194 : vector<1x128xf32> to vector<8x128xf32>
    %198 = arith.addf %196, %197 : vector<8x128xf32>
    %cst_72 = arith.constant 0.000000e+00 : f32
    %199 = vector.broadcast %cst_72 : f32 to vector<8x128xf32>
    %200 = arith.maximumf %198, %199 : vector<8x128xf32>
    %201 = math.absf %198 : vector<8x128xf32>
    %cst_73 = arith.constant 0.000000e+00 : f32
    %202 = vector.broadcast %cst_73 : f32 to vector<8x128xf32>
    %203 = arith.subf %202, %201 : vector<8x128xf32>
    %204 = math.exp %203 : vector<8x128xf32>
    %cst_74 = arith.constant 1.000000e+00 : f32
    %205 = vector.broadcast %cst_74 : f32 to vector<8x128xf32>
    %206 = arith.addf %205, %204 : vector<8x128xf32>
    %207 = math.log %206 : vector<8x128xf32>
    %208 = arith.addf %200, %207 : vector<8x128xf32>
    %cst_75 = arith.constant 0.693147182 : f32
    %209 = vector.broadcast %cst_75 : f32 to vector<8x128xf32>
    %210 = arith.subf %208, %209 : vector<8x128xf32>
    %c7 = arith.constant 7 : index
    %c0_76 = arith.constant 0 : index
    %c0_77 = arith.constant 0 : index
    %211 = vector.load %arg6[%c7, %c0_76, %c0_77] : memref<17x128x128xbf16, #tpu.memory_space<vmem>>, vector<1x128x128xbf16>
    %212 = vector.shape_cast %211 : vector<1x128x128xbf16> to vector<128x128xbf16>
    %c7_78 = arith.constant 7 : index
    %c0_79 = arith.constant 0 : index
    %213 = vector.load %arg8[%c7_78, %c0_79] : memref<16x128xf32, #tpu.memory_space<vmem>>, vector<1x128xf32>
    %214 = arith.truncf %157 : vector<8x128xf32> to vector<8x128xbf16>
    %cst_80 = arith.constant dense<0.000000e+00> : vector<8x128xf32>
    %215 = tpu.matmul %214, %212, %cst_80 {dimension_numbers = #tpu.dot_dimension_numbers<[1], [0], [0], [1], [0, 0, 1, 1], [], []>} : vector<8x128xbf16>, vector<128x128xbf16>, vector<8x128xf32> -> vector<8x128xf32>
    %216 = vector.broadcast %213 : vector<1x128xf32> to vector<8x128xf32>
    %217 = arith.addf %215, %216 : vector<8x128xf32>
    %cst_81 = arith.constant 0.000000e+00 : f32
    %218 = vector.broadcast %cst_81 : f32 to vector<8x128xf32>
    %219 = arith.maximumf %217, %218 : vector<8x128xf32>
    %220 = math.absf %217 : vector<8x128xf32>
    %cst_82 = arith.constant 0.000000e+00 : f32
    %221 = vector.broadcast %cst_82 : f32 to vector<8x128xf32>
    %222 = arith.subf %221, %220 : vector<8x128xf32>
    %223 = math.exp %222 : vector<8x128xf32>
    %cst_83 = arith.constant 1.000000e+00 : f32
    %224 = vector.broadcast %cst_83 : f32 to vector<8x128xf32>
    %225 = arith.addf %224, %223 : vector<8x128xf32>
    %226 = math.log %225 : vector<8x128xf32>
    %227 = arith.addf %219, %226 : vector<8x128xf32>
    %cst_84 = arith.constant 0.693147182 : f32
    %228 = vector.broadcast %cst_84 : f32 to vector<8x128xf32>
    %229 = arith.subf %227, %228 : vector<8x128xf32>
    %230 = arith.addf %183, %210 : vector<8x128xf32>
    %231 = arith.addf %230, %229 : vector<8x128xf32>
    %232 = arith.addf %0, %231 : vector<8x128xf32>
    %c8 = arith.constant 8 : index
    %c0_85 = arith.constant 0 : index
    %c0_86 = arith.constant 0 : index
    %233 = vector.load %arg6[%c8, %c0_85, %c0_86] : memref<17x128x128xbf16, #tpu.memory_space<vmem>>, vector<1x128x128xbf16>
    %234 = vector.shape_cast %233 : vector<1x128x128xbf16> to vector<128x128xbf16>
    %235 = arith.truncf %231 : vector<8x128xf32> to vector<8x128xbf16>
    %cst_87 = arith.constant dense<0.000000e+00> : vector<8x128xf32>
    %236 = tpu.matmul %235, %234, %cst_87 {dimension_numbers = #tpu.dot_dimension_numbers<[1], [0], [0], [1], [0, 0, 1, 1], [], []>} : vector<8x128xbf16>, vector<128x128xbf16>, vector<8x128xf32> -> vector<8x128xf32>
    %237 = arith.truncf %236 : vector<8x128xf32> to vector<8x128xbf16>
    %cst_88 = arith.constant dense<0.000000e+00> : vector<56x128xf32>
    %238 = tpu.matmul %3, %237, %cst_88 {dimension_numbers = #tpu.dot_dimension_numbers<[1], [0], [0], [1], [0, 0, 1, 1], [], []>} : vector<56x8xbf16>, vector<8x128xbf16>, vector<56x128xf32> -> vector<56x128xf32>
    %239 = vector.broadcast %38 : vector<56x1xf32> to vector<56x128xf32>
    %240 = arith.mulf %238, %239 : vector<56x128xf32>
    %241 = vector.broadcast %39 : vector<56x1xf32> to vector<56x128xf32>
    %242 = arith.mulf %238, %241 : vector<56x128xf32>
    %243 = vector.broadcast %40 : vector<56x1xf32> to vector<56x128xf32>
    %244 = arith.mulf %238, %243 : vector<56x128xf32>
    %245 = tpu.concatenate %240, %242, %244 in 1 : vector<56x128xf32>, vector<56x128xf32>, vector<56x128xf32> -> vector<56x384xf32>
    %246 = arith.truncf %245 : vector<56x384xf32> to vector<56x384xbf16>
    %cst_89 = arith.constant dense<0.000000e+00> : vector<8x384xf32>
    %247 = tpu.matmul %4, %246, %cst_89 {dimension_numbers = #tpu.dot_dimension_numbers<[1], [0], [0], [1], [0, 0, 1, 1], [], []>} : vector<8x56xbf16>, vector<56x384xbf16>, vector<8x384xf32> -> vector<8x384xf32>
    %248 = arith.addf %64, %247 : vector<8x384xf32>
    %249 = vector.extract_strided_slice %248 {offsets = [0, 0], sizes = [8, 128], strides = [1, 1]} : vector<8x384xf32> to vector<8x128xf32>
    %250 = vector.extract_strided_slice %248 {offsets = [0, 128], sizes = [8, 128], strides = [1, 1]} : vector<8x384xf32> to vector<8x128xf32>
    %251 = vector.extract_strided_slice %248 {offsets = [0, 256], sizes = [8, 128], strides = [1, 1]} : vector<8x384xf32> to vector<8x128xf32>
    %c1_90 = arith.constant 1 : index
    %c0_91 = arith.constant 0 : index
    %c0_92 = arith.constant 0 : index
    %252 = vector.load %arg7[%c1_90, %c0_91, %c0_92] : memref<2x16x256xbf16, #tpu.memory_space<vmem>>, vector<1x16x256xbf16>
    %253 = vector.shape_cast %252 : vector<1x16x256xbf16> to vector<16x256xbf16>
    %c8_93 = arith.constant 8 : index
    %c0_94 = arith.constant 0 : index
    %254 = vector.load %arg8[%c8_93, %c0_94] : memref<16x128xf32, #tpu.memory_space<vmem>>, vector<1x128xf32>
    %c13 = arith.constant 13 : index
    %c0_95 = arith.constant 0 : index
    %255 = vector.load %arg8[%c13, %c0_95] : memref<16x128xf32, #tpu.memory_space<vmem>>, vector<1x128xf32>
    %256 = tpu.concatenate %254, %255 in 1 : vector<1x128xf32>, vector<1x128xf32> -> vector<1x256xf32>
    %257 = arith.truncf %16 : vector<56x16xf32> to vector<56x16xbf16>
    %cst_96 = arith.constant dense<0.000000e+00> : vector<56x256xf32>
    %258 = tpu.matmul %257, %253, %cst_96 {dimension_numbers = #tpu.dot_dimension_numbers<[1], [0], [0], [1], [0, 0, 1, 1], [], []>} : vector<56x16xbf16>, vector<16x256xbf16>, vector<56x256xf32> -> vector<56x256xf32>
    %259 = vector.broadcast %256 : vector<1x256xf32> to vector<56x256xf32>
    %260 = arith.addf %258, %259 : vector<56x256xf32>
    %cst_97 = arith.constant 0.000000e+00 : f32
    %261 = vector.broadcast %cst_97 : f32 to vector<56x256xf32>
    %262 = arith.maximumf %260, %261 : vector<56x256xf32>
    %263 = math.absf %260 : vector<56x256xf32>
    %cst_98 = arith.constant 0.000000e+00 : f32
    %264 = vector.broadcast %cst_98 : f32 to vector<56x256xf32>
    %265 = arith.subf %264, %263 : vector<56x256xf32>
    %266 = math.exp %265 : vector<56x256xf32>
    %cst_99 = arith.constant 1.000000e+00 : f32
    %267 = vector.broadcast %cst_99 : f32 to vector<56x256xf32>
    %268 = arith.addf %267, %266 : vector<56x256xf32>
    %269 = math.log %268 : vector<56x256xf32>
    %270 = arith.addf %262, %269 : vector<56x256xf32>
    %cst_100 = arith.constant 0.693147182 : f32
    %271 = vector.broadcast %cst_100 : f32 to vector<56x256xf32>
    %272 = arith.subf %270, %271 : vector<56x256xf32>
    %273 = vector.extract_strided_slice %272 {offsets = [0, 0], sizes = [56, 128], strides = [1, 1]} : vector<56x256xf32> to vector<56x128xf32>
    %c10 = arith.constant 10 : index
    %c0_101 = arith.constant 0 : index
    %c0_102 = arith.constant 0 : index
    %274 = vector.load %arg6[%c10, %c0_101, %c0_102] : memref<17x128x128xbf16, #tpu.memory_space<vmem>>, vector<1x128x128xbf16>
    %275 = vector.shape_cast %274 : vector<1x128x128xbf16> to vector<128x128xbf16>
    %c9 = arith.constant 9 : index
    %c0_103 = arith.constant 0 : index
    %276 = vector.load %arg8[%c9, %c0_103] : memref<16x128xf32, #tpu.memory_space<vmem>>, vector<1x128xf32>
    %277 = arith.truncf %273 : vector<56x128xf32> to vector<56x128xbf16>
    %cst_104 = arith.constant dense<0.000000e+00> : vector<56x128xf32>
    %278 = tpu.matmul %277, %275, %cst_104 {dimension_numbers = #tpu.dot_dimension_numbers<[1], [0], [0], [1], [0, 0, 1, 1], [], []>} : vector<56x128xbf16>, vector<128x128xbf16>, vector<56x128xf32> -> vector<56x128xf32>
    %279 = vector.broadcast %276 : vector<1x128xf32> to vector<56x128xf32>
    %280 = arith.addf %278, %279 : vector<56x128xf32>
    %281 = vector.broadcast %30 : vector<56x1xf32> to vector<56x128xf32>
    %282 = arith.mulf %280, %281 : vector<56x128xf32>
    %283 = vector.extract_strided_slice %272 {offsets = [0, 128], sizes = [56, 128], strides = [1, 1]} : vector<56x256xf32> to vector<56x128xf32>
    %c14 = arith.constant 14 : index
    %c0_105 = arith.constant 0 : index
    %c0_106 = arith.constant 0 : index
    %284 = vector.load %arg6[%c14, %c0_105, %c0_106] : memref<17x128x128xbf16, #tpu.memory_space<vmem>>, vector<1x128x128xbf16>
    %285 = vector.shape_cast %284 : vector<1x128x128xbf16> to vector<128x128xbf16>
    %c14_107 = arith.constant 14 : index
    %c0_108 = arith.constant 0 : index
    %286 = vector.load %arg8[%c14_107, %c0_108] : memref<16x128xf32, #tpu.memory_space<vmem>>, vector<1x128xf32>
    %287 = arith.truncf %283 : vector<56x128xf32> to vector<56x128xbf16>
    %cst_109 = arith.constant dense<0.000000e+00> : vector<56x128xf32>
    %288 = tpu.matmul %287, %285, %cst_109 {dimension_numbers = #tpu.dot_dimension_numbers<[1], [0], [0], [1], [0, 0, 1, 1], [], []>} : vector<56x128xbf16>, vector<128x128xbf16>, vector<56x128xf32> -> vector<56x128xf32>
    %289 = vector.broadcast %286 : vector<1x128xf32> to vector<56x128xf32>
    %290 = arith.addf %288, %289 : vector<56x128xf32>
    %291 = vector.broadcast %34 : vector<56x1xf32> to vector<56x128xf32>
    %292 = arith.mulf %290, %291 : vector<56x128xf32>
    %c9_110 = arith.constant 9 : index
    %c0_111 = arith.constant 0 : index
    %c0_112 = arith.constant 0 : index
    %293 = vector.load %arg6[%c9_110, %c0_111, %c0_112] : memref<17x128x128xbf16, #tpu.memory_space<vmem>>, vector<1x128x128xbf16>
    %294 = vector.shape_cast %293 : vector<1x128x128xbf16> to vector<128x128xbf16>
    %295 = arith.truncf %232 : vector<8x128xf32> to vector<8x128xbf16>
    %cst_113 = arith.constant dense<0.000000e+00> : vector<8x128xf32>
    %296 = tpu.matmul %295, %294, %cst_113 {dimension_numbers = #tpu.dot_dimension_numbers<[1], [0], [0], [1], [0, 0, 1, 1], [], []>} : vector<8x128xbf16>, vector<128x128xbf16>, vector<8x128xf32> -> vector<8x128xf32>
    %297 = tpu.concatenate %296, %248 in 1 : vector<8x128xf32>, vector<8x384xf32> -> vector<8x512xf32>
    %298 = arith.truncf %297 : vector<8x512xf32> to vector<8x512xbf16>
    %cst_114 = arith.constant dense<0.000000e+00> : vector<56x512xf32>
    %299 = tpu.matmul %3, %298, %cst_114 {dimension_numbers = #tpu.dot_dimension_numbers<[1], [0], [0], [1], [0, 0, 1, 1], [], []>} : vector<56x8xbf16>, vector<8x512xbf16>, vector<56x512xf32> -> vector<56x512xf32>
    %300 = vector.extract_strided_slice %299 {offsets = [0, 0], sizes = [56, 128], strides = [1, 1]} : vector<56x512xf32> to vector<56x128xf32>
    %301 = vector.extract_strided_slice %299 {offsets = [0, 128], sizes = [56, 128], strides = [1, 1]} : vector<56x512xf32> to vector<56x128xf32>
    %302 = vector.extract_strided_slice %299 {offsets = [0, 256], sizes = [56, 128], strides = [1, 1]} : vector<56x512xf32> to vector<56x128xf32>
    %303 = vector.extract_strided_slice %299 {offsets = [0, 384], sizes = [56, 128], strides = [1, 1]} : vector<56x512xf32> to vector<56x128xf32>
    %304 = vector.broadcast %35 : vector<56x1xf32> to vector<56x128xf32>
    %305 = arith.mulf %304, %301 : vector<56x128xf32>
    %306 = vector.broadcast %36 : vector<56x1xf32> to vector<56x128xf32>
    %307 = arith.mulf %306, %302 : vector<56x128xf32>
    %308 = arith.addf %305, %307 : vector<56x128xf32>
    %309 = vector.broadcast %37 : vector<56x1xf32> to vector<56x128xf32>
    %310 = arith.mulf %309, %303 : vector<56x128xf32>
    %311 = arith.addf %308, %310 : vector<56x128xf32>
    %312 = vector.broadcast %8 : vector<56x1xf32> to vector<56x128xf32>
    %313 = arith.mulf %301, %312 : vector<56x128xf32>
    %314 = vector.broadcast %42 : vector<56x1xf32> to vector<56x128xf32>
    %315 = arith.mulf %314, %311 : vector<56x128xf32>
    %316 = arith.subf %313, %315 : vector<56x128xf32>
    %317 = arith.mulf %316, %292 : vector<56x128xf32>
    %318 = vector.broadcast %8 : vector<56x1xf32> to vector<56x128xf32>
    %319 = arith.mulf %302, %318 : vector<56x128xf32>
    %320 = vector.broadcast %44 : vector<56x1xf32> to vector<56x128xf32>
    %321 = arith.mulf %320, %311 : vector<56x128xf32>
    %322 = arith.subf %319, %321 : vector<56x128xf32>
    %323 = arith.mulf %322, %292 : vector<56x128xf32>
    %324 = vector.broadcast %8 : vector<56x1xf32> to vector<56x128xf32>
    %325 = arith.mulf %303, %324 : vector<56x128xf32>
    %326 = vector.broadcast %46 : vector<56x1xf32> to vector<56x128xf32>
    %327 = arith.mulf %326, %311 : vector<56x128xf32>
    %328 = arith.subf %325, %327 : vector<56x128xf32>
    %329 = arith.mulf %328, %292 : vector<56x128xf32>
    %330 = arith.mulf %300, %282 : vector<56x128xf32>
    %331 = tpu.concatenate %330, %317, %323, %329 in 1 : vector<56x128xf32>, vector<56x128xf32>, vector<56x128xf32>, vector<56x128xf32> -> vector<56x512xf32>
    %332 = arith.truncf %331 : vector<56x512xf32> to vector<56x512xbf16>
    %cst_115 = arith.constant dense<0.000000e+00> : vector<8x512xf32>
    %333 = tpu.matmul %4, %332, %cst_115 {dimension_numbers = #tpu.dot_dimension_numbers<[1], [0], [0], [1], [0, 0, 1, 1], [], []>} : vector<8x56xbf16>, vector<56x512xbf16>, vector<8x512xf32> -> vector<8x512xf32>
    %334 = vector.extract_strided_slice %333 {offsets = [0, 0], sizes = [8, 128], strides = [1, 1]} : vector<8x512xf32> to vector<8x128xf32>
    %335 = vector.extract_strided_slice %333 {offsets = [0, 128], sizes = [8, 384], strides = [1, 1]} : vector<8x512xf32> to vector<8x384xf32>
    %336 = arith.mulf %248, %335 : vector<8x384xf32>
    %337 = vector.extract_strided_slice %336 {offsets = [0, 0], sizes = [8, 128], strides = [1, 1]} : vector<8x384xf32> to vector<8x128xf32>
    %338 = vector.extract_strided_slice %336 {offsets = [0, 128], sizes = [8, 128], strides = [1, 1]} : vector<8x384xf32> to vector<8x128xf32>
    %339 = arith.addf %337, %338 : vector<8x128xf32>
    %340 = vector.extract_strided_slice %336 {offsets = [0, 256], sizes = [8, 128], strides = [1, 1]} : vector<8x384xf32> to vector<8x128xf32>
    %341 = arith.addf %339, %340 : vector<8x128xf32>
    %c11 = arith.constant 11 : index
    %c0_116 = arith.constant 0 : index
    %c0_117 = arith.constant 0 : index
    %342 = vector.load %arg6[%c11, %c0_116, %c0_117] : memref<17x128x128xbf16, #tpu.memory_space<vmem>>, vector<1x128x128xbf16>
    %343 = vector.shape_cast %342 : vector<1x128x128xbf16> to vector<128x128xbf16>
    %c10_118 = arith.constant 10 : index
    %c0_119 = arith.constant 0 : index
    %344 = vector.load %arg8[%c10_118, %c0_119] : memref<16x128xf32, #tpu.memory_space<vmem>>, vector<1x128xf32>
    %345 = arith.truncf %334 : vector<8x128xf32> to vector<8x128xbf16>
    %cst_120 = arith.constant dense<0.000000e+00> : vector<8x128xf32>
    %346 = tpu.matmul %345, %343, %cst_120 {dimension_numbers = #tpu.dot_dimension_numbers<[1], [0], [0], [1], [0, 0, 1, 1], [], []>} : vector<8x128xbf16>, vector<128x128xbf16>, vector<8x128xf32> -> vector<8x128xf32>
    %347 = vector.broadcast %344 : vector<1x128xf32> to vector<8x128xf32>
    %348 = arith.addf %346, %347 : vector<8x128xf32>
    %cst_121 = arith.constant 0.000000e+00 : f32
    %349 = vector.broadcast %cst_121 : f32 to vector<8x128xf32>
    %350 = arith.maximumf %348, %349 : vector<8x128xf32>
    %351 = math.absf %348 : vector<8x128xf32>
    %cst_122 = arith.constant 0.000000e+00 : f32
    %352 = vector.broadcast %cst_122 : f32 to vector<8x128xf32>
    %353 = arith.subf %352, %351 : vector<8x128xf32>
    %354 = math.exp %353 : vector<8x128xf32>
    %cst_123 = arith.constant 1.000000e+00 : f32
    %355 = vector.broadcast %cst_123 : f32 to vector<8x128xf32>
    %356 = arith.addf %355, %354 : vector<8x128xf32>
    %357 = math.log %356 : vector<8x128xf32>
    %358 = arith.addf %350, %357 : vector<8x128xf32>
    %cst_124 = arith.constant 0.693147182 : f32
    %359 = vector.broadcast %cst_124 : f32 to vector<8x128xf32>
    %360 = arith.subf %358, %359 : vector<8x128xf32>
    %c12 = arith.constant 12 : index
    %c0_125 = arith.constant 0 : index
    %c0_126 = arith.constant 0 : index
    %361 = vector.load %arg6[%c12, %c0_125, %c0_126] : memref<17x128x128xbf16, #tpu.memory_space<vmem>>, vector<1x128x128xbf16>
    %362 = vector.shape_cast %361 : vector<1x128x128xbf16> to vector<128x128xbf16>
    %c11_127 = arith.constant 11 : index
    %c0_128 = arith.constant 0 : index
    %363 = vector.load %arg8[%c11_127, %c0_128] : memref<16x128xf32, #tpu.memory_space<vmem>>, vector<1x128xf32>
    %364 = arith.truncf %360 : vector<8x128xf32> to vector<8x128xbf16>
    %cst_129 = arith.constant dense<0.000000e+00> : vector<8x128xf32>
    %365 = tpu.matmul %364, %362, %cst_129 {dimension_numbers = #tpu.dot_dimension_numbers<[1], [0], [0], [1], [0, 0, 1, 1], [], []>} : vector<8x128xbf16>, vector<128x128xbf16>, vector<8x128xf32> -> vector<8x128xf32>
    %366 = vector.broadcast %363 : vector<1x128xf32> to vector<8x128xf32>
    %367 = arith.addf %365, %366 : vector<8x128xf32>
    %368 = vector.broadcast %47 : vector<8x1xf32> to vector<8x128xf32>
    %369 = arith.mulf %249, %368 : vector<8x128xf32>
    %370 = vector.broadcast %48 : vector<8x1xf32> to vector<8x128xf32>
    %371 = arith.mulf %250, %370 : vector<8x128xf32>
    %372 = arith.addf %369, %371 : vector<8x128xf32>
    %373 = vector.broadcast %49 : vector<8x1xf32> to vector<8x128xf32>
    %374 = arith.mulf %251, %373 : vector<8x128xf32>
    %375 = arith.addf %372, %374 : vector<8x128xf32>
    %c13_130 = arith.constant 13 : index
    %c0_131 = arith.constant 0 : index
    %c0_132 = arith.constant 0 : index
    %376 = vector.load %arg6[%c13_130, %c0_131, %c0_132] : memref<17x128x128xbf16, #tpu.memory_space<vmem>>, vector<1x128x128xbf16>
    %377 = vector.shape_cast %376 : vector<1x128x128xbf16> to vector<128x128xbf16>
    %c12_133 = arith.constant 12 : index
    %c0_134 = arith.constant 0 : index
    %378 = vector.load %arg8[%c12_133, %c0_134] : memref<16x128xf32, #tpu.memory_space<vmem>>, vector<1x128xf32>
    %379 = arith.truncf %375 : vector<8x128xf32> to vector<8x128xbf16>
    %cst_135 = arith.constant dense<0.000000e+00> : vector<8x128xf32>
    %380 = tpu.matmul %379, %377, %cst_135 {dimension_numbers = #tpu.dot_dimension_numbers<[1], [0], [0], [1], [0, 0, 1, 1], [], []>} : vector<8x128xbf16>, vector<128x128xbf16>, vector<8x128xf32> -> vector<8x128xf32>
    %381 = vector.broadcast %378 : vector<1x128xf32> to vector<8x128xf32>
    %382 = arith.addf %380, %381 : vector<8x128xf32>
    %cst_136 = arith.constant 0.000000e+00 : f32
    %383 = vector.broadcast %cst_136 : f32 to vector<8x128xf32>
    %384 = arith.maximumf %382, %383 : vector<8x128xf32>
    %385 = math.absf %382 : vector<8x128xf32>
    %cst_137 = arith.constant 0.000000e+00 : f32
    %386 = vector.broadcast %cst_137 : f32 to vector<8x128xf32>
    %387 = arith.subf %386, %385 : vector<8x128xf32>
    %388 = math.exp %387 : vector<8x128xf32>
    %cst_138 = arith.constant 1.000000e+00 : f32
    %389 = vector.broadcast %cst_138 : f32 to vector<8x128xf32>
    %390 = arith.addf %389, %388 : vector<8x128xf32>
    %391 = math.log %390 : vector<8x128xf32>
    %392 = arith.addf %384, %391 : vector<8x128xf32>
    %cst_139 = arith.constant 0.693147182 : f32
    %393 = vector.broadcast %cst_139 : f32 to vector<8x128xf32>
    %394 = arith.subf %392, %393 : vector<8x128xf32>
    %c15 = arith.constant 15 : index
    %c0_140 = arith.constant 0 : index
    %c0_141 = arith.constant 0 : index
    %395 = vector.load %arg6[%c15, %c0_140, %c0_141] : memref<17x128x128xbf16, #tpu.memory_space<vmem>>, vector<1x128x128xbf16>
    %396 = vector.shape_cast %395 : vector<1x128x128xbf16> to vector<128x128xbf16>
    %c15_142 = arith.constant 15 : index
    %c0_143 = arith.constant 0 : index
    %397 = vector.load %arg8[%c15_142, %c0_143] : memref<16x128xf32, #tpu.memory_space<vmem>>, vector<1x128xf32>
    %398 = arith.truncf %341 : vector<8x128xf32> to vector<8x128xbf16>
    %cst_144 = arith.constant dense<0.000000e+00> : vector<8x128xf32>
    %399 = tpu.matmul %398, %396, %cst_144 {dimension_numbers = #tpu.dot_dimension_numbers<[1], [0], [0], [1], [0, 0, 1, 1], [], []>} : vector<8x128xbf16>, vector<128x128xbf16>, vector<8x128xf32> -> vector<8x128xf32>
    %400 = vector.broadcast %397 : vector<1x128xf32> to vector<8x128xf32>
    %401 = arith.addf %399, %400 : vector<8x128xf32>
    %cst_145 = arith.constant 0.000000e+00 : f32
    %402 = vector.broadcast %cst_145 : f32 to vector<8x128xf32>
    %403 = arith.maximumf %401, %402 : vector<8x128xf32>
    %404 = math.absf %401 : vector<8x128xf32>
    %cst_146 = arith.constant 0.000000e+00 : f32
    %405 = vector.broadcast %cst_146 : f32 to vector<8x128xf32>
    %406 = arith.subf %405, %404 : vector<8x128xf32>
    %407 = math.exp %406 : vector<8x128xf32>
    %cst_147 = arith.constant 1.000000e+00 : f32
    %408 = vector.broadcast %cst_147 : f32 to vector<8x128xf32>
    %409 = arith.addf %408, %407 : vector<8x128xf32>
    %410 = math.log %409 : vector<8x128xf32>
    %411 = arith.addf %403, %410 : vector<8x128xf32>
    %cst_148 = arith.constant 0.693147182 : f32
    %412 = vector.broadcast %cst_148 : f32 to vector<8x128xf32>
    %413 = arith.subf %411, %412 : vector<8x128xf32>
    %414 = arith.addf %367, %394 : vector<8x128xf32>
    %415 = arith.addf %414, %413 : vector<8x128xf32>
    %416 = arith.addf %232, %415 : vector<8x128xf32>
    %c0_149 = arith.constant 0 : index
    %c0_150 = arith.constant 0 : index
    %417 = vector.load %arg9[%c0_149, %c0_150] : memref<8x128xf32, #tpu.memory_space<vmem>>, vector<8x128xf32>
    tpu.vector_store %arg9[%c0_149, %c0_150], %416 {strides = array<i32>} : memref<8x128xf32, #tpu.memory_space<vmem>>, vector<8x128xf32>,
    return
  }
}

</mosaic_0001>

<bundles_post_ra>
// kernel: tpu_custom_call.1
= control target key start
LH: loop header
LB: loop body
LE: loop exit
PB: predicated region body
PF: predicated region fallthrough
CT: control target
= control target key end

     0   :  { %14 = vsyncpa [#allocation3], 0  ;;  %s8227_s0 = inlined_call_operand.vmem [shape: f32[8,128], index: 0, kind: input, shape index: {}]   ;;  %s8228_s1 = inlined_call_operand.vmem [shape: f32[8,3], index: 1, kind: input, shape index: {}]   ;;  %s8229_s2 = inlined_call_operand.vmem [shape: f32[56,3], index: 2, kind: input, shape index: {}]   ;;  %s8230_s3 = inlined_call_operand.vmem [shape: bf16[56,8], index: 3, kind: input, shape index: {}]   ;;  %s8231_s4 = inlined_call_operand.vmem [shape: bf16[8,56], index: 4, kind: input, shape index: {}]   ;;  %s8232_s5 = inlined_call_operand.vmem [shape: f32[1,16], index: 5, kind: input, shape index: {}]   ;;  %s8233_s6 = inlined_call_operand.hbm [shape: bf16[17,128,128], index: 6, kind: input, shape index: {}]   ;;  %s8234_s7 = inlined_call_operand.vmem [shape: bf16[2,16,256], index: 7, kind: input, shape index: {}]   ;;  %s8235_s8 = inlined_call_operand.vmem [shape: f32[16,128], index: 8, kind: input, shape index: {}]   ;;  %s8236_s9 = inlined_call_operand.hbm [shape: f32[8,128], index: 9, kind: output, shape index: {}]  }
   0x1   :  { %15 = vsyncpa [#allocation4], 0  ;;  %s32_s11 = sshll.u32 %s8233_s6, 4  ;;  %s5685_s12 = smov [#allocation2]   ;;  %s33_s11 = int_to_ptr.hbm [resolvable:$true] %s32_s11 }
   0x2   :  { %s34_s13 = sshll.u32 %s5685_s12, 4  ;;  %s5686_s14 = smov 64   ;;  %s35_s13 = int_to_ptr.vmem [resolvable:$true] %s34_s13 }
   0x3   :  { %s5687_s15 = smov 4  }
   0x4   :  { %40 = dma.hbm_to_vmem [thread:$0]  %s33_s11, 17408, %s35_s13, [#allocation3], %s5686_s14, %s5686_s14, %s5687_s15  }
   0x5   :  { %5681 = dma.done.wait [#allocation3], 17408  }
   0x6   :  { %5682 = vsyncadd [#allocation3], 4294949888  ;;  %v58_v0 = vld [vmem:[%s8229_s2 + $0x30] sm:$0xff]  ;;  %vm75_vm0 = vcmask 23552   ;;  %v57_v1 = vld [vmem:[%s8229_s2 + $0x28] sm:$0xff]  ;;  %v5688_v34 = vmov 5.0  }
   0x7   :  { %v55_v2 = vld [vmem:[%s8229_s2 + $0x18] sm:$0xff]  ;;  %v74_v3 = vmul.f32 %v58_v0, %v58_v0  ;;  %v73_v4 = vmul.f32 %v57_v1, %v57_v1  ;;  %v56_v6 = vld [vmem:[%s8229_s2 + $0x20] sm:$0xff]  ;;  %v54_v7 = vld [vmem:[%s8229_s2 + $0x10] sm:$0xff]  ;;  %5434 = vrcp.f32 %v5688_v34  ;;  %vm1512_vm15 = vcmask 1043456   ;;  %s5699_s29 = smov [#allocation5]   ;;  %s4543_s11 = sshll.u32 %s8236_s9, 4  ;;  %s4544_s11 = int_to_ptr.hbm [resolvable:$true] %s4543_s11 }
   0x8   :  { %v71_v5 = vmul.f32 %v55_v2, %v55_v2  ;;  %v52_v8 = vld [vmem:[%s8229_s2] sm:$0xff]  ;;  %v72_v9 = vmul.f32 %v56_v6, %v56_v6  ;;  %v70_v10 = vmul.f32 %v54_v7, %v54_v7  ;;  %v5237_v12 = vld [vmem:[#allocation2 + $0x38] sm:$0xff]  ;;  %v5236_v17 = vld [vmem:[#allocation2 + $0x30] sm:$0xff] }
   0x9   :  { %v68_v11 = vmul.f32 %v52_v8, %v52_v8  ;;  %v94_v13 = vsel %vm75_vm0, %v74_v3, 0.0  ;;  %v91_v14 = vsel %vm75_vm0, %v73_v4, 0.0  ;;  %1467 = vmatpush.bf16.msra.mxu0 %v5237_v12  ;;  %v5235_v20 = vld [vmem:[#allocation2 + $0x28] sm:$0xff]  ;;  %v5234_v23 = vld [vmem:[#allocation2 + $0x20] sm:$0xff]  ;;  %v5233_v25 = vld [vmem:[#allocation2 + $0x18] sm:$0xff] }
   0xa   :  { %v85_v15 = vsel %vm75_vm0, %v71_v5, 0.0  ;;  %95 = vadd.xlane.f32.xlu0 %v94_v13  ;;  %92 = vadd.xlane.f32.xlu1 %v91_v14  ;;  %v88_v16 = vsel %vm75_vm0, %v72_v9, 0.0  ;;  %v82_v18 = vsel %vm75_vm0, %v70_v10, 0.0  ;;  %v53_v21 = vld [vmem:[%s8229_s2 + $0x8] sm:$0xff]  ;;  %v5232_v26 = vld [vmem:[#allocation2 + $0x10] sm:$0xff]  ;;  %v5230_v28 = vld [vmem:[#allocation2] sm:$0xff] }
   0xb   :  { %86 = vadd.xlane.f32.xlu2 %v85_v15  ;;  %v76_v19 = vsel %vm75_vm0, %v68_v11, 0.0  ;;  %v69_v22 = vmul.f32 %v53_v21, %v53_v21  ;;  %v5231_v27 = vld [vmem:[#allocation2 + $0x8] sm:$0xff]  ;;  %v50_v29 = vld [vmem:[%s8227_s0] sm:$0xff] }
   0xc   :  { %v5784_v30 = vpack.c.bf16 %v50_v29, %v50_v29  ;;  %v5238_v31 = vld [vmem:[%s8234_s7 + $0x4] sm:$0xf]  ;;  %v4636_v32 = vld [vmem:[%s8234_s7 + $0x8] sm:$0xf0] }
   0xd   :  { %1468 = vmatpush.bf16.msra.mxu0 %v5236_v17  ;;  %v79_v24 = vsel %vm75_vm0, %v69_v22, 0.0  ;;  %v4639_v33 = vor.u32 %v5238_v31, %v4636_v32  ;;  %v5801_v38 = vpop.eup %5434  ;;  %v5859_v32 = vld [vmem:[%s8232_s5] ss:$0 sm:$0xff] }
   0xe   :  { %8385 = vst [vmem:[#allocation8_spill] sm:$0xff] %v5784_v30  ;;  %v227_v43 = vmul.f32 5.0, %v5801_v38  ;;  %vm231_vm1 = vweird.f32 %v5801_v38 }
  0x10   :  { %v228_v47 = vsub.f32 1.0, %v227_v43 }
  0x11   :  { %1469 = vmatpush.bf16.msra.mxu0 %v5235_v20 }
  0x12   :  { %89 = vadd.xlane.f32.xlu0 %v88_v16  ;;  %83 = vadd.xlane.f32.xlu1 %v82_v18  ;;  %v229_v54 = vmul.f32 %v5801_v38, %v228_v47 }
  0x13   :  { %77 = vadd.xlane.f32.xlu2 %v76_v19 }
  0x14   :  { %v230_v0 = vadd.f32 %v5801_v38, %v229_v54 }
  0x15   :  { %1470 = vmatpush.bf16.msra.mxu0 %v5234_v23 }
  0x19   :  { %1471 = vmatpush.bf16.msra.mxu0 %v5233_v25 }
  0x1a   :  { %80 = vadd.xlane.f32.xlu0 %v79_v24 }
  0x1d   :  { %1472 = vmatpush.bf16.msra.mxu0 %v5232_v26 }
  0x21   :  { %1473 = vmatpush.bf16.msra.mxu0 %v5231_v27 }
  0x25   :  { %1474 = vmatpush.bf16.msra.mxu0 %v5230_v28 }
  0x28   :  { %1475 = vmatmul.bf16.vlgmr.msra.gmra.mxu0 %v5784_v30 }
  0x29   :  { %1788 = vmatpush.bf16.msrb.mxu0 %v4639_v33  ;;  %v5864_v33 = vsel %vm231_vm1, %v5801_v38, %v230_v0  ;;  %vm1499_vm1 = vcmask 64512  }
  0x7d   :  { %v5793_v35 = vpop.xlane.xlu0 %95  ;;  %v5795_v36 = vpop.xlane.xlu1 %92 }
  0x7e   :  { %8386 = vst [vmem:[#allocation9_spill] sm:$0xff] %v5793_v35  ;;  %v5797_v37 = vpop.xlane.xlu2 %86  ;;  %5436 = vrsqrt.f32 %v5795_v36  ;;  %vm164_vm8 = vcmp.eq.f32.partialorder %v5795_v36, inf  ;;  %vm166_vm13 = vcmp.eq.f32.partialorder %v5795_v36, 0.0  ;;  %vm176_vm14 = vcmp.eq.f32.partialorder %v5793_v35, inf }
  0x7f   :  { %8387 = vst [vmem:[#allocation10_spill] sm:$0xff] %v5795_v36  ;;  %5438 = vrsqrt.f32 %v5797_v37  ;;  %vm140_vm2 = vcmp.eq.f32.partialorder %v5797_v37, inf  ;;  %vm142_vm3 = vcmp.eq.f32.partialorder %v5797_v37, 0.0  ;;  %v143_v11 = vand.u32 2147483648, %v5797_v37 }
  0x80   :  { %8388 = vst [vmem:[#allocation11_spill] sm:$0xff] %v5797_v37  ;;  %vm178_vm0 = vcmp.eq.f32.partialorder %v5793_v35, 0.0 }
  0x84   :  { %v5803_v39 = vpop.eup %5436 }
  0x85   :  { %v5439_v40 = vpop.eup %5438  ;;  %v5805_v41 = vpop.xlane.xlu0 %89  ;;  %v158_v46 = vmul.f32 %v5803_v39, %v5795_v36 }
  0x86   :  { %8389 = vst [vmem:[#allocation12_spill] sm:$0xff] %v5805_v41  ;;  %v5807_v42 = vpop.xlane.xlu1 %83  ;;  %v5810_v44 = vpop.xlane.xlu2 %77  ;;  %v134_v45 = vmul.f32 %v5439_v40, %v5797_v37  ;;  %vm152_vm9 = vcmp.eq.f32.partialorder %v5805_v41, inf  ;;  %vm154_vm10 = vcmp.eq.f32.partialorder %v5805_v41, 0.0 }
  0x87   :  { %8390 = vst [vmem:[#allocation13_spill] sm:$0xff] %v5807_v42  ;;  %5440 = vrsqrt.f32 %v5807_v42  ;;  %v159_v51 = vmul.f32 %v5803_v39, %v158_v46  ;;  %vm128_vm4 = vcmp.eq.f32.partialorder %v5807_v42, inf  ;;  %vm130_vm5 = vcmp.eq.f32.partialorder %v5807_v42, 0.0 }
  0x88   :  { %8391 = vst [vmem:[#allocation14_spill] sm:$0xff] %v5810_v44  ;;  %5442 = vrsqrt.f32 %v5810_v44  ;;  %v135_v48 = vmul.f32 %v5439_v40, %v134_v45  ;;  %vm104_vm6 = vcmp.eq.f32.partialorder %v5810_v44, inf  ;;  %v107_v20 = vand.u32 2147483648, %v5810_v44 }
  0x89   :  { %5444 = vrsqrt.f32 %v5805_v41  ;;  %v160_v63 = vmul.f32 0.5, %v159_v51  ;;  %vm106_vm7 = vcmp.eq.f32.partialorder %v5810_v44, 0.0  ;;  %v131_v24 = vand.u32 2147483648, %v5807_v42 }
  0x8a   :  { %5446 = vrsqrt.f32 %v5793_v35  ;;  %v136_v50 = vmul.f32 0.5, %v135_v48 }
  0x8b   :  { %v161_v12 = vsub.f32 1.5, %v160_v63 }
  0x8c   :  { %v137_v60 = vsub.f32 1.5, %v136_v50 }
  0x8d   :  { %v5441_v49 = vpop.eup %5440  ;;  %v5820_v53 = vpop.xlane.xlu0 %80  ;;  %v162_v29 = vmul.f32 %v5803_v39, %v161_v12 }
  0x8e   :  { %v5443_v52 = vpop.eup %5442  ;;  %8392 = vst [vmem:[#allocation15_spill] sm:$0xff] %v5820_v53  ;;  %v122_v55 = vmul.f32 %v5441_v49, %v5807_v42  ;;  %5448 = vrsqrt.f32 %v5820_v53  ;;  %v138_v2 = vmul.f32 %v5439_v40, %v137_v60  ;;  %vm116_vm11 = vcmp.eq.f32.partialorder %v5820_v53, inf }
  0x8f   :  { %v5445_v56 = vpop.eup %5444  ;;  %v98_v57 = vmul.f32 %v5443_v52, %v5810_v44  ;;  %v163_v38 = vmul.f32 %v162_v29, %v5795_v36  ;;  %vm118_vm12 = vcmp.eq.f32.partialorder %v5820_v53, 0.0  ;;  %v5227_v29 = vld [vmem:[%s8230_s3] sm:$0xff] }
  0x90   :  { %v5826_v58 = vpop.eup %5446  ;;  %v123_v59 = vmul.f32 %v5441_v49, %v122_v55  ;;  %v146_v61 = vmul.f32 %v5445_v56, %v5805_v41  ;;  %v139_v7 = vmul.f32 %v138_v2, %v5797_v37 }
  0x91   :  { %v99_v62 = vmul.f32 %v5443_v52, %v98_v57  ;;  %v170_v5 = vmul.f32 %v5826_v58, %v5793_v35  ;;  %v119_v57 = vand.u32 2147483648, %v5820_v53  ;;  %v165_v63 = vsel %vm164_vm8, %v5795_v36, %v163_v38 }
  0x92   :  { %v124_v1 = vmul.f32 0.5, %v123_v59  ;;  %v147_v3 = vmul.f32 %v5445_v56, %v146_v61  ;;  %v141_v15 = vsel %vm140_vm2, %v5797_v37, %v139_v7  ;;  %vm1740_vm2 = vcmask 130048  }
  0x93   :  { %v100_v4 = vmul.f32 0.5, %v99_v62  ;;  %v5841_v18 = vsel %vm142_vm3, %v143_v11, %v141_v15  ;;  %v171_v19 = vmul.f32 %v5826_v58, %v170_v5 }
  0x94   :  { %v125_v6 = vsub.f32 1.5, %v124_v1  ;;  %v148_v8 = vmul.f32 0.5, %v147_v3  ;;  %v5449_v9 = vpop.eup %5448  ;;  %v222_v28 = vmul.f32 3.1415927, %v5841_v18  ;;  %v187_v5 = vsub.f32 %v5841_v18, %v5859_v32 }
  0x95   :  { %v101_v10 = vsub.f32 1.5, %v100_v4  ;;  %v110_v13 = vmul.f32 %v5449_v9, %v5820_v53  ;;  %v172_v34 = vmul.f32 0.5, %v171_v19 }
  0x96   :  { %v126_v14 = vmul.f32 %v5441_v49, %v125_v6  ;;  %v149_v16 = vsub.f32 1.5, %v148_v8  ;;  %v5877_v48 = vmul.f32 %v5864_v33, %v222_v28  ;;  %v167_v49 = vand.u32 2147483648, %v5795_v36 }
  0x97   :  { %v102_v17 = vmul.f32 %v5443_v52, %v101_v10  ;;  %v111_v21 = vmul.f32 %v5449_v9, %v110_v13  ;;  %v173_v51 = vsub.f32 1.5, %v172_v34  ;;  %v179_v34 = vand.u32 2147483648, %v5793_v35 }
  0x98   :  { %v127_v22 = vmul.f32 %v126_v14, %v5807_v42  ;;  %v150_v25 = vmul.f32 %v5445_v56, %v149_v16  ;;  %v155_v56 = vand.u32 2147483648, %v5805_v41  ;;  %v705_v62 = vand.u32 2139095040, %v5877_v48 }
  0x99   :  { %v103_v23 = vmul.f32 %v102_v17, %v5810_v44  ;;  %v112_v26 = vmul.f32 0.5, %v111_v21  ;;  %v174_v3 = vmul.f32 %v5826_v58, %v173_v51  ;;  %v194_v17 = vmul.f32 %v187_v5, %v187_v5 }
  0x9a   :  { %v129_v27 = vsel %vm128_vm4, %v5807_v42, %v127_v22  ;;  %v151_v45 = vmul.f32 %v150_v25, %v5805_v41  ;;  %v706_v11 = vshrl.u32 %v705_v62, 23 }
  0x9b   :  { %v105_v31 = vsel %vm104_vm6, %v5810_v44, %v103_v23  ;;  %v113_v43 = vsub.f32 1.5, %v112_v26  ;;  %v5873_v46 = vsel %vm130_vm5, %v131_v24, %v129_v27  ;;  %v175_v14 = vmul.f32 %v174_v3, %v5793_v35 }
  0x9c   :  { %v5866_v40 = vsel %vm106_vm7, %v107_v20, %v105_v31  ;;  %8394 = vst [vmem:[#allocation17_spill] sm:$0xff] %v5873_v46  ;;  %v186_v54 = vsub.f32 %v5873_v46, %v5859_v32  ;;  %v153_v55 = vsel %vm152_vm9, %v5805_v41, %v151_v45  ;;  %v221_v1 = vmul.f32 3.1415927, %v5873_v46 }
  0x9d   :  { %8393 = vst [vmem:[#allocation16_spill] sm:$0xff] %v5866_v40  ;;  %v184_v39 = vsub.f32 %v5866_v40, %v5859_v32  ;;  %v114_v47 = vmul.f32 %v5449_v9, %v113_v43  ;;  %v219_v59 = vmul.f32 3.1415927, %v5866_v40  ;;  %v5902_v2 = vsel %vm154_vm10, %v155_v56, %v153_v55 }
  0x9e   :  { %v193_v6 = vmul.f32 %v186_v54, %v186_v54  ;;  %v5914_v9 = vsel %vm166_vm13, %v167_v49, %v165_v63  ;;  %v188_v12 = vsub.f32 %v5902_v2, %v5859_v32  ;;  %v5920_v13 = vmul.f32 %v5864_v33, %v221_v1 }
  0x9f   :  { %v191_v50 = vmul.f32 %v184_v39, %v184_v39  ;;  %v115_v52 = vmul.f32 %v114_v47, %v5820_v53  ;;  %v5912_v8 = vmul.f32 %v5864_v33, %v219_v59  ;;  %v189_v20 = vsub.f32 %v5914_v9, %v5859_v32 }
  0xa0   :  { %v200_v19 = vmul.f32 -4.4999995, %v193_v6  ;;  %v224_v24 = vmul.f32 3.1415927, %v5914_v9  ;;  %v4562_v26 = vadd.s32 4294967169, %v706_v11  ;;  %v195_v27 = vmul.f32 %v188_v12, %v188_v12 }
  0xa1   :  { %v117_v60 = vsel %vm116_vm11, %v5820_v53, %v115_v52  ;;  %v198_v61 = vmul.f32 -4.4999995, %v191_v50  ;;  %8396 = vst [vmem:[#allocation19_spill] sm:$0xff] %v5912_v8  ;;  %v243_v22 = vand.u32 2139095040, %v5912_v8  ;;  %v551_v31 = vand.u32 2139095040, %v5920_v13 }
  0xa2   :  { %v5897_v0 = vsel %vm118_vm12, %v119_v57, %v117_v60  ;;  %v201_v43 = vmul.f32 -4.4999995, %v194_v17  ;;  %v209_v45 = vmul.f32 1.442695, %v200_v19  ;;  %v196_v39 = vmul.f32 %v189_v20, %v189_v20 }
  0xa3   :  { %8395 = vst [vmem:[#allocation18_spill] sm:$0xff] %v5897_v0  ;;  %v185_v4 = vsub.f32 %v5897_v0, %v5859_v32  ;;  %v220_v7 = vmul.f32 3.1415927, %v5897_v0  ;;  %v205_v58 = vmul.f32 1.442695, %v198_v61  ;;  %v244_v47 = vshrl.u32 %v243_v22, 23 }
  0xa4   :  { %v5939_v49 = vmul.f32 %v5864_v33, %v224_v24  ;;  %v177_v50 = vsel %vm176_vm14, %v5793_v35, %v175_v14  ;;  %v712_v51 = vadd.s32 1, %v4562_v26  ;;  %v202_v52 = vmul.f32 -4.4999995, %v195_v27 }
  0xa5   :  { %v192_v10 = vmul.f32 %v185_v4, %v185_v4  ;;  %v1476_v16 = vpop.f32.mrf.mxu0  ;;  %v5927_v21 = vmul.f32 %v5864_v33, %v220_v7  ;;  %5450 = vpow2.f32 %v205_v58  ;;  %v5946_v54 = vsel %vm178_vm0, %v179_v34, %v177_v50 }
  0xa6   :  { %v1480_v23 = vpack.c.bf16 %v1476_v16, %v1476_v16  ;;  %8397 = vst [vmem:[#allocation20_spill] sm:$0xff] %v5946_v54  ;;  %v552_v55 = vshrl.u32 %v551_v31, 23  ;;  %v1013_v56 = vand.u32 2139095040, %v5939_v49  ;;  %v190_v57 = vsub.f32 %v5946_v54, %v5859_v32 }
  0xa7   :  { %v199_v15 = vmul.f32 -4.4999995, %v192_v10  ;;  %v397_v38 = vand.u32 2139095040, %v5927_v21  ;;  %v225_v59 = vmul.f32 3.1415927, %v5946_v54  ;;  %v4553_v1 = vadd.s32 4294967169, %v244_v47 }
  0xa8   :  { %v1514_v28 = vsel %vm1512_vm15, %v1480_v23, 0  ;;  %v211_v62 = vmul.f32 1.442695, %v201_v43  ;;  %v203_v63 = vmul.f32 -4.4999995, %v196_v39  ;;  %v1014_v4 = vshrl.u32 %v1013_v56, 23 }
  0xa9   :  { %v207_v25 = vmul.f32 1.442695, %v199_v15  ;;  %1523 = vmatpush.bf16.msra.mxu1 %v1514_v28  ;;  %v398_v3 = vshrl.u32 %v397_v38, 23  ;;  %vm713_vm3 = vcmp.gt.s32.totalorder %v712_v51, 0  ;;  %v213_v6 = vmul.f32 1.442695, %v202_v52 }
  0xaa   :  { %v223_v7 = vmul.f32 3.1415927, %v5902_v2  ;;  %v5955_v10 = vmul.f32 %v5864_v33, %v225_v59  ;;  %v4559_v58 = vadd.s32 4294967169, %v552_v55  ;;  %v4568_v11 = vadd.s32 4294967169, %v1014_v4  ;;  %v5228_v47 = vld [vmem:[%s8230_s3 + $0x8] sm:$0xff] }
  0xab   :  { %5452 = vpow2.f32 %v207_v25  ;;  %v5451_v60 = vpop.eup %5450  ;;  %v197_v12 = vmul.f32 %v190_v57, %v190_v57  ;;  %v215_v14 = vmul.f32 1.442695, %v203_v63  ;;  %v4556_v16 = vadd.s32 4294967169, %v398_v3 }
  0xac   :  { %4625 = vmatmul.msk.bf16.vlgmr.msra.gmra.mxu1 %vm1499_vm1, %v5227_v29  ;;  %5454 = vpow2.f32 %v209_v45  ;;  %v1167_v15 = vand.u32 2139095040, %v5955_v10  ;;  %v714_v17 = vsel %vm713_vm3, %v712_v51, 0  ;;  %v1020_v19 = vadd.s32 1, %v4568_v11 }
  0xad   :  { %v1478_v61 = vpop.f32.mrf.mxu0  ;;  %5456 = vpow2.f32 %v211_v62  ;;  %v5963_v20 = vmul.f32 %v5864_v33, %v223_v7  ;;  %v8238_v23 = vand.u32 2147483647, %v5955_v10  ;;  %v5966_v25 = vadd.s32 1, %v4553_v1 }
  0xae   :  { %5458 = vpow2.f32 %v213_v6  ;;  %v1168_v22 = vshrl.u32 %v1167_v15, 23  ;;  %v5968_v26 = vadd.s32 1, %v4559_v58  ;;  %vm1021_vm4 = vcmp.gt.s32.totalorder %v1020_v19, 0 }
  0xaf   :  { %v204_v27 = vmul.f32 -4.4999995, %v197_v12  ;;  %5460 = vpow2.f32 %v215_v14  ;;  %v1022_v28 = vsel %vm1021_vm4, %v1020_v19, 0  ;;  %v1171_v31 = vand.u32 8388607, %v8238_v23 }
  0xb0   :  { %v4571_v29 = vadd.s32 4294967169, %v1168_v22  ;;  %v5972_v34 = vadd.s32 1, %v4556_v16  ;;  %v5974_v33 = vshrl.u32 %v714_v17, 5  ;;  %v5976_v43 = vand.u32 31, %v714_v17 }
  0xb1   :  { %v5453_v5 = vpop.eup %5452  ;;  %v5978_v45 = vand.u32 31, %v1022_v28  ;;  %v859_v38 = vand.u32 2139095040, %v5963_v20  ;;  %v1172_v51 = vor.u32 8388608, %v1171_v31  ;;  %v8237_v52 = vand.u32 2147483647, %v5939_v49 }
  0xb2   :  { %v5957_v32 = vpack.c.bf16 %v5453_v5, %v5451_v60  ;;  %v5455_v24 = vpop.eup %5454  ;;  %v1174_v50 = vadd.s32 1, %v4571_v29  ;;  %v217_v56 = vmul.f32 1.442695, %v204_v27  ;;  %v5999_v4 = vshrl.u32 %v1022_v28, 5 }
  0xb3   :  { %v5457_v39 = vpop.eup %5456  ;;  %v5987_v59 = vshll.u32 %v1172_v51, 8  ;;  %v5990_v60 = vsub.s32 32, %v5978_v45  ;;  %v5994_v62 = vand.u32 8388607, %v8237_v52  ;;  %v5996_v1 = vshrl.u32 %v859_v38, 23 }
  0xb4   :  { %8398 = vst [vmem:[#allocation21_spill] sm:$0xff] %v5957_v32  ;;  %4644 = vmatmul.msk.bf16.vlgmr.msrb.gmra.mxu0 %vm1740_vm2, %v5957_v32  ;;  %v5985_v55 = vpack.c.bf16 %v5457_v39, %v5455_v24  ;;  %v5459_v57 = vpop.eup %5458  ;;  %vm1175_vm5 = vcmp.gt.s32.totalorder %v1174_v50, 0  ;;  %5462 = vpow2.f32 %v217_v56  ;;  %v8239_v6 = vmov 683565275  }
  0xb5   :  { %v1176_v61 = vsel %vm1175_vm5, %v1174_v50, 0  ;;  %v5461_v63 = vpop.eup %5460  ;;  %v1027_v7 = vshll.u32 %v8239_v6, %v5978_v45  ;;  %v6008_v12 = vand.u32 65535, %v5987_v59  ;;  %v8247_v14 = vmov 2475754826  }
  0xb6   :  { %8399 = vst [vmem:[#allocation22_spill] sm:$0xff] %v5985_v55  ;;  %v1178_v3 = vand.u32 31, %v1176_v61  ;;  %v6001_v5 = vpack.c.bf16 %v5461_v63, %v5459_v57  ;;  %v6005_v58 = vshrl.u32 %v1176_v61, 5  ;;  %v1028_v15 = vshrl.u32 %v8247_v14, %v5990_v60 }
  0xb7   :  { %v6015_v19 = vshrl.u32 %v5987_v59, 16  ;;  %v8243_v27 = vmov 2131351028   ;;  %v8241_v31 = vmov 2102212464   ;;  %vm251_vm11 = vcmp.gt.s32.totalorder %v5966_v25, 0 }
  0xb8   :  { %8400 = vst [vmem:[#allocation23_spill] sm:$0xff] %v6001_v5  ;;  %v1179_v11 = vsub.s32 32, %v1178_v3  ;;  %v1181_v16 = vshll.u32 %v8239_v6, %v1178_v3  ;;  %v1184_v17 = vshll.u32 %v8247_v14, %v1178_v3  ;;  %v1187_v29 = vshll.u32 %v8243_v27, %v1178_v3 }
  0xb9   :  { %v8251_v38 = vmov 920167782   ;;  %v8249_v56 = vmov 1326507024   ;;  %v6026_v23 = vor.u32 %v1028_v15, %v1027_v7  ;;  %vm1196_vm6 = vcmp.lt.s32.totalorder %v6005_v58, 1 }
  0xba   :  { %v1182_v24 = vshrl.u32 %v8247_v14, %v1179_v11  ;;  %v1185_v28 = vshrl.u32 %v8243_v27, %v1179_v11  ;;  %v1188_v39 = vshrl.u32 %v8241_v31, %v1179_v11  ;;  %v1191_v50 = vshrl.u32 %v8251_v38, %v1179_v11  ;;  %v6028_v22 = vpop.eup %5462 }
  0xbb   :  { %v1193_v51 = vshll.u32 %v8251_v38, %v1178_v3  ;;  %v1194_v57 = vshrl.u32 %v8249_v56, %v1179_v11  ;;  %v8245_v27 = vmov 1   ;;  %vm1198_vm7 = vcmp.lt.s32.totalorder %v6005_v58, 3 }
  0xbc   :  { %4626 = vmatmul.msk.bf16.gmra.mxu1 %vm1499_vm1, %v5228_v47  ;;  %v1190_v47 = vshll.u32 %v8241_v31, %v1178_v3  ;;  %v1183_v61 = vor.u32 %v1182_v24, %v1181_v16  ;;  %v1186_v63 = vor.u32 %v1185_v28, %v1184_v17  ;;  %v1189_v52 = vor.u32 %v1188_v39, %v1187_v29  ;;  %v6049_v29 = vld [vmem:[%s8230_s3 + $0x18] sm:$0xf] }
  0xbd   :  { %v1195_v31 = vor.u32 %v1194_v57, %v1193_v51  ;;  %5379 = vset.pattern.permute.xlu0 %v8245_v27  ;;  %5377 = vset.pattern.permute.xlu1 %v8245_v27  ;;  %vm1199_vm8 = vcmp.lt.s32.totalorder %v6005_v58, 4  ;;  %v1030_v7 = vshll.u32 %v8247_v14, %v5978_v45  ;;  %v8401_v24 = vmov 2131351028  }
  0xbe   :  { %v1192_v6 = vor.u32 %v1191_v50, %v1190_v47  ;;  %v1204_v3 = vsel %vm1196_vm6, %v1183_v61, %v1186_v63  ;;  %v1208_v16 = vsel %vm1196_vm6, %v1186_v63, %v1189_v52  ;;  %v1031_v28 = vshrl.u32 %v8401_v24, %v5990_v60  ;;  %5378 = vset.pattern.permute.xlu2 %v8245_v27 }
  0xbf   :  { %v1209_v17 = vsel %vm1199_vm8, %v1195_v31, 1326507024  ;;  %vm1197_vm9 = vcmp.lt.s32.totalorder %v6005_v58, 2  ;;  %v1201_v39 = vsel %vm1199_vm8, %v1189_v52, 2102212464  ;;  %v1033_v14 = vshll.u32 %v8401_v24, %v5978_v45 }
  0xc0   :  { %v1205_v15 = vsel %vm1199_vm8, %v1192_v6, 920167782  ;;  %v1210_v50 = vsel %vm1198_vm7, %v1192_v6, %v1209_v17  ;;  %v8402_v31 = vmov 683565275   ;;  %v8403_v17 = vmov 2102212464  }
  0xc1   :  { %v1206_v47 = vsel %vm1198_vm7, %v1189_v52, %v1205_v15  ;;  %v1180_v51 = vshrl.u32 %v8402_v31, %v1179_v11  ;;  %v1211_v27 = vsel %vm1197_vm9, %v1208_v16, %v1210_v50  ;;  %v5229_v52 = vld [vmem:[%s8230_s3 + $0x10] sm:$0xff]  ;;  %v6071_v15 = vor.u32 %v1031_v28, %v1030_v7 }
  0xc2   :  { %v1207_v57 = vsel %vm1197_vm9, %v1204_v3, %v1206_v47  ;;  %v1215_v56 = vand.u32 65535, %v1211_v27  ;;  %v1216_v38 = vshrl.u32 %v1211_v27, 16  ;;  %v1202_v3 = vsel %vm1198_vm7, %v1186_v63, %v1201_v39 }
  0xc3   :  { %v1237_v53 = vand.u32 65535, %v1207_v57  ;;  %v1238_v35 = vshrl.u32 %v1207_v57, 16  ;;  %v1200_v11 = vsel %vm1196_vm6, %v1180_v51, %v1183_v61  ;;  %v1034_v47 = vshrl.u32 %v8403_v17, %v5990_v60 }
  0xc4   :  { %4645 = vmatmul.msk.bf16.gmra.mxu0 %vm1740_vm2, %v5985_v55  ;;  %v1218_v16 = vmul.u32 %v1216_v38, %v6008_v12  ;;  %v1219_v27 = vmul.u32 %v1215_v56, %v6015_v19  ;;  %v1036_v50 = vshll.u32 %v8403_v17, %v5978_v45  ;;  %v8404_v61 = vmov 920167782  }
  0xc5   :  { %v1240_v57 = vmul.u32 %v1238_v35, %v6008_v12  ;;  %v1241_v6 = vmul.u32 %v1237_v53, %v6015_v19  ;;  %v1037_v51 = vshrl.u32 %v8404_v61, %v5990_v60  ;;  %v1039_v63 = vshll.u32 %v8404_v61, %v5978_v45 }
  0xc6   :  { %v1217_v7 = vmul.u32 %v1215_v56, %v6008_v12  ;;  %v1220_v28 = vmul.u32 %v1216_v38, %v6015_v19  ;;  %v1221_v39 = vshll.u32 %v1218_v16, 16  ;;  %v1239_v36 = vmul.u32 %v1237_v53, %v6008_v12 }
  0xc7   :  { %v1222_v37 = vshrl.u32 %v1218_v16, 16  ;;  %v1223_v41 = vshll.u32 %v1219_v27, 16  ;;  %v1242_v42 = vmul.u32 %v1238_v35, %v6015_v19  ;;  %v1243_v44 = vshll.u32 %v1240_v57, 16 }
  0xc8   :  { %v1224_v30 = vshrl.u32 %v1219_v27, 16  ;;  %vm1225_vm10 = vc.u32 %v1217_v7, %v1221_v39  ;;  %v1227_v55 = vadd.s32 %v1221_v39, %v1217_v7  ;;  %v1245_v32 = vshll.u32 %v1241_v6, 16 }
  0xc9   :  { %v5696_v45 = vmov 0   ;;  %vm1247_vm12 = vc.u32 %v1239_v36, %v1243_v44  ;;  %v1249_v38 = vadd.s32 %v1243_v44, %v1239_v36  ;;  %v8405_v53 = vmov 1326507024  }
  0xca   :  { %v1226_v56 = vsel %vm1225_vm10, 1, %v5696_v45  ;;  %v1040_v12 = vshrl.u32 %v8405_v53, %v5990_v60  ;;  %vm559_vm13 = vcmp.gt.s32.totalorder %v5968_v26, 0  ;;  %vm1229_vm14 = vc.u32 %v1227_v55, %v1223_v41 }
  0xcb   :  { %v1248_v35 = vsel %vm1247_vm12, 1, %v5696_v45  ;;  %v1038_v19 = vor.u32 %v1037_v51, %v1036_v50  ;;  %v1230_v16 = vsel %vm1229_vm14, 1, %v5696_v45  ;;  %vm1251_vm0 = vc.u32 %v1249_v38, %v1245_v32 }
  0xcc   :  { %4627 = vmatmul.msk.bf16.gmra.mxu1 %vm1499_vm1, %v5229_v52  ;;  %v1228_v52 = vadd.s32 %v1226_v56, %v1220_v28  ;;  %v1250_v27 = vadd.s32 %v1248_v35, %v1242_v42  ;;  %v1035_v7 = vor.u32 %v1034_v47, %v1033_v14  ;;  %v1244_v40 = vshrl.u32 %v1240_v57, 16 }
  0xcd   :  { %v1252_v46 = vsel %vm1251_vm0, 1, %v5696_v45  ;;  %v1041_v36 = vor.u32 %v1040_v12, %v1039_v63  ;;  %v1246_v44 = vshrl.u32 %v1241_v6, 16  ;;  %vm1042_vm3 = vcmp.lt.s32.totalorder %v5999_v4, 1 }
  0xce   :  { %v1232_v39 = vadd.s32 %v1230_v16, %v1228_v52  ;;  %v1254_v0 = vadd.s32 %v1252_v46, %v1250_v27  ;;  %vm1045_vm4 = vcmp.lt.s32.totalorder %v5999_v4, 4  ;;  %vm1044_vm5 = vcmp.lt.s32.totalorder %v5999_v4, 3 }
  0xcf   :  { %v1050_v42 = vsel %vm1042_vm3, %v6026_v23, %v6071_v15  ;;  %v1051_v55 = vsel %vm1045_vm4, %v1038_v19, 920167782  ;;  %vm1043_vm6 = vcmp.lt.s32.totalorder %v5999_v4, 2  ;;  %v6117_v47 = vadd.s32 %v1249_v38, %v1245_v32 }
  0xd0   :  { %v1233_v41 = vadd.s32 %v1232_v39, %v1222_v37  ;;  %v1255_v14 = vadd.s32 %v1254_v0, %v1244_v40  ;;  %v1052_v46 = vsel %vm1044_vm5, %v1035_v7, %v1051_v55  ;;  %v1054_v37 = vsel %vm1042_vm3, %v6071_v15, %v1035_v7 }
  0xd1   :  { %v1053_v50 = vsel %vm1043_vm6, %v1050_v42, %v1052_v46  ;;  %v1055_v57 = vsel %vm1045_vm4, %v1041_v36, 1326507024  ;;  %v1203_v40 = vsel %vm1197_vm9, %v1200_v11, %v1202_v3  ;;  %v8406_v63 = vor.u32 8388608, %v5994_v62 }
  0xd2   :  { %v6115_v6 = vadd.s32 %v1233_v41, %v1224_v30  ;;  %v1256_v0 = vadd.s32 %v1255_v14, %v1246_v44  ;;  %v1056_v51 = vsel %vm1044_vm5, %v1038_v19, %v1055_v57  ;;  %v8407_v30 = vunpack.c.l.b16 %v6049_v29 }
  0xd3   :  { %v6129_v28 = vshll.u32 %v8406_v63, 8  ;;  %v1057_v58 = vsel %vm1043_vm6, %v1054_v37, %v1056_v51  ;;  %v1084_v11 = vshrl.u32 %v1053_v50, 16  ;;  %v1083_v12 = vand.u32 65535, %v1053_v50 }
  0xd4   :  { %4646 = vmatmul.msk.bf16.gmra.mxu0 %vm1740_vm2, %v6001_v5  ;;  %v6134_v32 = vpack.c.b16 %v8407_v30, %v8407_v30  ;;  %vm1259_vm7 = vc.u32 %v6115_v6, %v6117_v47  ;;  %v1260_v3 = vadd.s32 1, %v1256_v0  ;;  %v1061_v38 = vand.u32 65535, %v1057_v58 }
  0xd5   :  { %v1060_v56 = vshrl.u32 %v6129_v28, 16  ;;  %v6144_v62 = vsel %vm251_vm11, %v5966_v25, 0  ;;  %v1257_v29 = vmul.u32 %v5987_v59, %v1203_v40  ;;  %v1059_v52 = vand.u32 65535, %v6129_v28 }
  0xd6   :  { %8408 = vst [vmem:[#allocation24_spill] sm:$0xff] %v6134_v32  ;;  %v1062_v35 = vshrl.u32 %v1057_v58, 16  ;;  %vm405_vm8 = vcmp.gt.s32.totalorder %v5972_v34, 0  ;;  %v6152_v19 = vsel %vm559_vm13, %v5968_v26, 0  ;;  %v1261_v16 = vsel %vm1259_vm7, %v1260_v3, %v1256_v0 }
  0xd7   :  { %v1065_v27 = vmul.u32 %v1061_v38, %v1060_v56  ;;  %v4565_v39 = vadd.s32 4294967169, %v5996_v1  ;;  %v1262_v36 = vadd.s32 %v1261_v16, %v1257_v29  ;;  %v1086_v25 = vmul.u32 %v1084_v11, %v1059_v52 }
  0xd8   :  { %v1064_v44 = vmul.u32 %v1062_v35, %v1059_v52  ;;  %v6157_v59 = vpack.c.bf16 %v6028_v22, %v6028_v22  ;;  %v1026_v41 = vshrl.u32 %v8402_v31, %v5990_v60  ;;  %v1063_v42 = vmul.u32 %v1061_v38, %v1059_v52 }
  0xd9   :  { %v1087_v26 = vmul.u32 %v1083_v12, %v1060_v56  ;;  %v1263_v55 = vadd.s32 536870912, %v1262_v36  ;;  %v1085_v46 = vmul.u32 %v1083_v12, %v1059_v52  ;;  %v1089_v37 = vshll.u32 %v1086_v25, 16 }
  0xda   :  { %8409 = vst [vmem:[#allocation25_spill] sm:$0xff] %v6157_v59  ;;  %v1067_v14 = vshll.u32 %v1064_v44, 16  ;;  %v1047_v1 = vsel %vm1045_vm4, %v1035_v7, 2102212464  ;;  %v1066_v50 = vmul.u32 %v1062_v35, %v1060_v56  ;;  %v1069_v57 = vshll.u32 %v1065_v27, 16 }
  0xdb   :  { %v1088_v40 = vmul.u32 %v1084_v11, %v1060_v56  ;;  %v1264_v22 = vshrl.u32 %v1263_v55, 30  ;;  %vm1093_vm10 = vc.u32 %v1085_v46, %v1089_v37  ;;  %v1091_v63 = vshll.u32 %v1087_v26, 16 }
  0xdc   :  { %4628 = vmatmul.msk.bf16.gmra.mxu1 %vm1499_vm1, %v6134_v32  ;;  %vm1071_vm9 = vc.u32 %v1063_v42, %v1067_v14  ;;  %v1073_v0 = vadd.s32 %v1067_v14, %v1063_v42  ;;  %v1094_v60 = vsel %vm1093_vm10, 1, %v5696_v45  ;;  %v1095_v30 = vadd.s32 %v1089_v37, %v1085_v46 }
  0xdd   :  { %v1072_v51 = vsel %vm1071_vm9, 1, %v5696_v45  ;;  %v1265_v58 = vshll.u32 %v1264_v22, 30  ;;  %v1046_v3 = vsel %vm1042_vm3, %v1026_v41, %v6026_v23  ;;  %v1048_v7 = vsel %vm1044_vm5, %v6071_v15, %v1047_v1 }
  0xde   :  { %v1074_v38 = vadd.s32 %v1072_v51, %v1066_v50  ;;  %vm1075_vm11 = vc.u32 %v1073_v0, %v1069_v57  ;;  %v1096_v56 = vadd.s32 %v1094_v60, %v1088_v40  ;;  %vm1097_vm12 = vc.u32 %v1095_v30, %v1091_v63 }
  0xdf   :  { %v1076_v11 = vsel %vm1075_vm11, 1, %v5696_v45  ;;  %v1266_v12 = vsub.s32 %v1262_v36, %v1265_v58  ;;  %v1068_v29 = vshrl.u32 %v1064_v44, 16  ;;  %v1098_v35 = vsel %vm1097_vm12, 1, %v5696_v45 }
  0xe0   :  { %v1078_v52 = vadd.s32 %v1076_v11, %v1074_v38  ;;  %v6180_v23 = vsel %vm405_vm8, %v5972_v34, 0  ;;  %v866_v16 = vadd.s32 1, %v4565_v39  ;;  %v1090_v41 = vshrl.u32 %v1086_v25, 16 }
  0xe1   :  { %v1100_v42 = vadd.s32 %v1098_v35, %v1096_v56  ;;  %vm1267_vm13 = vcmp.lt.s32.totalorder %v1266_v12, 0  ;;  %v1268_v55 = vsub.s32 0, %v1266_v12  ;;  %v1049_v15 = vsel %vm1043_vm6, %v1046_v3, %v1048_v7 }
  0xe2   :  { %v1079_v14 = vadd.s32 %v1078_v52, %v1068_v29  ;;  %v1070_v46 = vshrl.u32 %v1065_v27, 16  ;;  %v1092_v36 = vshrl.u32 %v1087_v26, 16  ;;  %v6185_v37 = vsub.s32 32, %v5976_v43 }
  0xe3   :  { %v1101_v44 = vadd.s32 %v1100_v42, %v1090_v41  ;;  %vm1166_vm14 = vcmp.lt.s32.totalorder %v5955_v10, 0  ;;  %v1269_v1 = vsel %vm1267_vm13, %v1268_v55, %v1266_v12  ;;  %v1288_v34 = vsub.s32 4, %v1264_v22 }
  0xe4   :  { %4647 = vmatmul.msk.bf16.gmra.mxu0 %vm1740_vm2, %v6157_v59  ;;  %v8278_v39 = vand.u32 2147483647, %v5877_v48  ;;  %v1270_v25 = vclz %v1269_v1  ;;  %v6189_v50 = vadd.s32 %v1079_v14, %v1070_v46  ;;  %v6191_v57 = vadd.s32 %v1095_v30, %v1091_v63 }
  0xe5   :  { %v1102_v4 = vadd.s32 %v1101_v44, %v1092_v36  ;;  %vm867_vm0 = vcmp.gt.s32.totalorder %v866_v16, 0  ;;  %v1258_v27 = vadd.s32 %v6117_v47, %v6115_v6  ;;  %v1103_v26 = vmul.u32 %v6129_v28, %v1049_v15 }
  0xe6   :  { %v8410_v40 = vand.u32 2147483647, %v5955_v10  ;;  %v4572_v51 = vadd.s32 4294967294, %v1270_v25  ;;  %vm1105_vm4 = vc.u32 %v6189_v50, %v6191_v57  ;;  %v723_v63 = vshrl.u32 %v8401_v24, %v6185_v37 }
  0xe7   :  { %v1106_v60 = vadd.s32 1, %v1102_v4  ;;  %v1289_v30 = vsel %vm1166_vm14, %v1288_v34, %v1264_v22  ;;  %v709_v6 = vand.u32 8388607, %v8278_v39  ;;  %v719_v47 = vshll.u32 %v8402_v31, %v5976_v43 }
  0xe8   :  { %vm6198_vm3 = vcmp.le.f32.partialorder %v8410_v40, 0.7853982  ;;  %v8413_v28 = vmov 2475754826   ;;  %vm4573_vm5 = vcmp.lt.s32.totalorder %v4572_v51, 0  ;;  %vm1338_vm6 = vcmp.lt.f32.partialorder %v5946_v54, 5.0 }
  0xe9   :  { %v722_v58 = vshll.u32 %v8413_v28, %v5976_v43  ;;  %v1107_v3 = vsel %vm1105_vm4, %v1106_v60, %v1102_v4  ;;  %v726_v38 = vshrl.u32 %v8403_v17, %v6185_v37  ;;  %v729_v7 = vshrl.u32 %v8404_v61, %v6185_v37 }
  0xea   :  { %v1273_v22 = vsel %vm4573_vm5, 0, %v4572_v51  ;;  %v1108_v11 = vadd.s32 %v1107_v3, %v1103_v26  ;;  %v720_v56 = vshrl.u32 %v8413_v28, %v6185_v37  ;;  %v728_v29 = vshll.u32 %v8403_v17, %v5976_v43 }
  0xeb   :  { %v1274_v52 = vsub.s32 32, %v1273_v22  ;;  %v1278_v35 = vsub.s32 4294967266, %v1273_v22  ;;  %v6223_v41 = vor.u32 %v723_v63, %v722_v58  ;;  %v725_v42 = vshll.u32 %v8401_v24, %v5976_v43 }
  0xec   :  { %v1109_v55 = vadd.s32 536870912, %v1108_v11  ;;  %v730_v15 = vor.u32 %v729_v7, %v728_v29  ;;  %v731_v14 = vshll.u32 %v8404_v61, %v5976_v43  ;;  %v732_v46 = vshrl.u32 %v8405_v53, %v6185_v37 }
  0xed   :  { %v1275_v36 = vshll.u32 %v1266_v12, %v1273_v22  ;;  %v1276_v44 = vshrl.u32 %v1258_v27, %v1274_v52  ;;  %v1279_v1 = vadd.s32 127, %v1278_v35  ;;  %v727_v34 = vor.u32 %v726_v38, %v725_v42 }
  0xee   :  { %v6232_v25 = vsel %vm867_vm0, %v866_v16, 0  ;;  %v6234_v4 = vshrl.u32 %v1109_v55, 30  ;;  %v721_v26 = vor.u32 %v720_v56, %v719_v47  ;;  %v733_v40 = vor.u32 %v732_v46, %v731_v14 }
  0xef   :  { %v1277_v51 = vor.u32 %v1276_v44, %v1275_v36  ;;  %v1280_v60 = vshll.u32 %v1279_v1, 23  ;;  %v710_v63 = vor.u32 8388608, %v709_v6  ;;  %vm737_vm7 = vcmp.lt.s32.totalorder %v5974_v33, 4 }
  0xf0   :  { %v1291_v43 = vsel %vm6198_vm3, 0, %v1289_v30  ;;  %v1111_v12 = vshll.u32 %v6234_v4, 30  ;;  %vm734_vm8 = vcmp.lt.s32.totalorder %v5974_v33, 1  ;;  %v743_v16 = vsel %vm737_vm7, %v730_v15, 920167782 }
  0xf1   :  { %v1281_v27 = vor.u32 4788187, %v1280_v60  ;;  %vm735_vm9 = vcmp.lt.s32.totalorder %v5974_v33, 2  ;;  %vm736_vm10 = vcmp.lt.s32.totalorder %v5974_v33, 3  ;;  %v746_v6 = vsel %vm734_vm8, %v6223_v41, %v727_v34 }
  0xf2   :  { %v6248_v47 = vsub.s32 %v1108_v11, %v1111_v12  ;;  %v742_v30 = vsel %vm734_vm8, %v721_v26, %v6223_v41  ;;  %v744_v58 = vsel %vm736_vm10, %v727_v34, %v743_v16  ;;  %v747_v3 = vsel %vm737_vm7, %v733_v40, 1326507024 }
  0xf3   :  { %v1282_v38 = vand.u32 2147483647, %v1281_v27  ;;  %v1284_v7 = vcvt.s32.f32 %v1277_v51  ;;  %v748_v22 = vsel %vm736_vm10, %v730_v15, %v747_v3  ;;  %v6259_v56 = vshll.u32 %v710_v63, 8 }
  0xf4   :  { %v8279_v29 = vmov 0.0   ;;  %vm1113_vm11 = vcmp.lt.s32.totalorder %v6248_v47, 0  ;;  %v1114_v52 = vsub.s32 0, %v6248_v47  ;;  %v749_v35 = vsel %vm735_vm9, %v746_v6, %v748_v22 }
  0xf5   :  { %v6264_v11 = vsel %vm1338_vm6, 1.0, %v8279_v29  ;;  %v6271_v42 = vand.u32 31, %v6232_v25  ;;  %v1285_v55 = vmul.f32 %v1284_v7, %v1282_v38  ;;  %v745_v15 = vsel %vm735_vm9, %v742_v30, %v744_v58 }
  0xf6   :  { %v753_v14 = vand.u32 65535, %v749_v35  ;;  %v6275_v46 = vand.u32 3, %v1291_v43  ;;  %v1115_v36 = vsel %vm1113_vm11, %v1114_v52, %v6248_v47  ;;  %v718_v44 = vshrl.u32 %v8402_v31, %v6185_v37 }
  0xf7   :  { %v752_v1 = vshrl.u32 %v6259_v56, 16  ;;  %v1286_v40 = vxor.u32 2147483648, %v1285_v55  ;;  %v1116_v51 = vclz %v1115_v36  ;;  %v751_v60 = vand.u32 65535, %v6259_v56 }
  0xf8   :  { %v754_v63 = vshrl.u32 %v749_v35, 16  ;;  %v1104_v12 = vadd.s32 %v6191_v57, %v6189_v50  ;;  %v775_v27 = vand.u32 65535, %v745_v15  ;;  %v776_v43 = vshrl.u32 %v745_v15, 16 }
  0xf9   :  { %v6284_v16 = vmul.u32 %v753_v14, %v752_v1  ;;  %v1287_v6 = vsel %vm1166_vm14, %v1286_v40, %v1285_v55  ;;  %v4569_v30 = vadd.s32 4294967294, %v1116_v51  ;;  %v6290_v37 = vsel %vm734_vm8, %v718_v44, %v721_v26 }
  0xfa   :  { %v756_v58 = vmul.u32 %v754_v63, %v751_v60  ;;  %v6295_v3 = vsel %vm6198_vm3, %v5955_v10, %v1287_v6  ;;  %v1134_v50 = vsub.s32 4, %v6234_v4  ;;  %v739_v57 = vsel %vm737_vm7, %v727_v34, 2102212464 }
  0xfb   :  { %v755_v38 = vmul.u32 %v753_v14, %v751_v60  ;;  %v1292_v7 = vmul.f32 %v6295_v3, %v6295_v3  ;;  %vm4570_vm12 = vcmp.lt.s32.totalorder %v4569_v30, 0  ;;  %v758_v22 = vmul.u32 %v754_v63, %v752_v1 }
  0xfc   :  { %v759_v52 = vshll.u32 %v756_v58, 16  ;;  %v1119_v26 = vsel %vm4570_vm12, 0, %v4569_v30  ;;  %v761_v35 = vshll.u32 %v6284_v16, 16  ;;  %v777_v55 = vmul.u32 %v775_v27, %v751_v60 }
  0xfd   :  { %v778_v15 = vmul.u32 %v776_v43, %v751_v60  ;;  %v1293_v0 = vmul.f32 -0.001358992, %v1292_v7  ;;  %v1300_v36 = vmul.f32 -0.00019511016, %v1292_v7  ;;  %v1120_v44 = vsub.s32 32, %v1119_v26 }
  0xfe   :  { %v6303_v40 = vmul.u32 %v775_v27, %v752_v1  ;;  %vm1012_vm13 = vcmp.lt.s32.totalorder %v5939_v49, 0  ;;  %v1124_v34 = vsub.s32 4294967266, %v1119_v26  ;;  %vm763_vm14 = vc.u32 %v755_v38, %v759_v52 }
  0xff   :  { %v765_v14 = vadd.s32 %v759_v52, %v755_v38  ;;  %v781_v51 = vshll.u32 %v778_v15, 16  ;;  %v1294_v6 = vadd.f32 0.041655596, %v1293_v0  ;;  %v1301_v39 = vadd.f32 0.008332121, %v1300_v36 }
 0x100   :  { %v1122_v63 = vshrl.u32 %v1104_v12, %v1120_v44  ;;  %v764_v30 = vsel %vm763_vm14, 1, %v5696_v45  ;;  %v1121_v29 = vshll.u32 %v6248_v47, %v1119_v26  ;;  %v1125_v54 = vadd.s32 127, %v1124_v34 }
 0x101   :  { %v766_v60 = vadd.s32 %v764_v30, %v758_v22  ;;  %vm767_vm0 = vc.u32 %v765_v14, %v761_v35  ;;  %v1295_v32 = vmul.f32 %v1294_v6, %v1292_v7  ;;  %v1302_v59 = vmul.f32 %v1301_v39, %v1292_v7 }
 0x102   :  { %v760_v27 = vshrl.u32 %v756_v58, 16  ;;  %v768_v5 = vsel %vm767_vm0, 1, %v5696_v45  ;;  %v8414_v8 = vand.u32 2147483647, %v5939_v49  ;;  %v1123_v52 = vor.u32 %v1122_v63, %v1121_v29 }
 0x103   :  { %v1126_v12 = vshll.u32 %v1125_v54, 23  ;;  %v770_v0 = vadd.s32 %v768_v5, %v766_v60  ;;  %v780_v36 = vmul.u32 %v776_v43, %v752_v1  ;;  %v1296_v44 = vadd.f32 -0.4999988, %v1295_v32 }
 0x104   :  { %vm6311_vm3 = vcmp.le.f32.partialorder %v8414_v8, 0.7853982  ;;  %v1303_v47 = vadd.f32 -0.16666654, %v1302_v59  ;;  %v783_v22 = vshll.u32 %v6303_v40, 16  ;;  %vm785_vm4 = vc.u32 %v777_v55, %v781_v51 }
 0x105   :  { %v1127_v26 = vor.u32 4788187, %v1126_v12  ;;  %vm1337_vm5 = vcmp.lt.f32.partialorder %v5914_v9, 5.0  ;;  %v771_v39 = vadd.s32 %v770_v0, %v760_v27  ;;  %v786_v58 = vsel %vm785_vm4, 1, %v5696_v45 }
 0x106   :  { %v787_v35 = vadd.s32 %v781_v51, %v777_v55  ;;  %v1297_v8 = vmul.f32 %v1296_v44, %v1292_v7  ;;  %v1304_v34 = vmul.f32 %v1303_v47, %v1292_v7  ;;  %v740_v54 = vsel %vm736_vm10, %v6223_v41, %v739_v57 }
 0x107   :  { %v788_v5 = vadd.s32 %v786_v58, %v780_v36  ;;  %vm1307_vm6 = vweird.f32 %v5955_v10  ;;  %v1128_v32 = vand.u32 2147483647, %v1127_v26  ;;  %v1130_v59 = vcvt.s32.f32 %v1123_v52 }
 0x108   :  { %v762_v29 = vshrl.u32 %v6284_v16, 16  ;;  %vm789_vm7 = vc.u32 %v787_v35, %v783_v22  ;;  %v1298_v1 = vadd.f32 1.0, %v1297_v8  ;;  %v1305_v43 = vadd.f32 1.0, %v1304_v34 }
 0x109   :  { %v1135_v55 = vsel %vm1012_vm13, %v1134_v50, %v6234_v4  ;;  %v790_v7 = vsel %vm789_vm7, 1, %v5696_v45  ;;  %v1131_v14 = vmul.f32 %v1130_v59, %v1128_v32  ;;  %v782_v41 = vshrl.u32 %v778_v15, 16 }
 0x10a   :  { %v6327_v51 = vadd.s32 %v771_v39, %v762_v29  ;;  %v792_v57 = vadd.s32 %v790_v7, %v788_v5  ;;  %v1306_v6 = vmul.f32 %v1305_v43, %v6295_v3  ;;  %vm1309_vm8 = vcmp.lt.s32.totalorder %v6275_v46, 2 }
 0x10b   :  { %vm1310_vm10 = vcmp.eq.s32.totalorder %v6275_v46, 0  ;;  %v1314_v16 = vxor.u32 2147483648, %v1298_v1  ;;  %v1132_v63 = vxor.u32 2147483648, %v1131_v14  ;;  %v784_v30 = vshrl.u32 %v6303_v40, 16 }
 0x10c   :  { %v6333_v60 = vadd.s32 %v787_v35, %v783_v22  ;;  %v793_v4 = vadd.s32 %v792_v57, %v782_v41  ;;  %v1311_v50 = vxor.u32 2147483648, %v1306_v6  ;;  %vm1313_vm11 = vcmp.eq.s32.totalorder %v6275_v46, 2 }
 0x10d   :  { %v1137_v15 = vsel %vm6311_vm3, 0, %v1135_v55  ;;  %v741_v3 = vsel %vm735_vm9, %v6290_v37, %v740_v54  ;;  %v1133_v27 = vsel %vm1012_vm13, %v1132_v63, %v1131_v14  ;;  %v856_v40 = vand.u32 2147483647, %v5963_v20 }
 0x10e   :  { %v794_v52 = vadd.s32 %v793_v4, %v784_v30  ;;  %vm797_vm12 = vc.u32 %v6327_v51, %v6333_v60  ;;  %v1312_v12 = vsel %vm1310_vm10, %v1298_v1, %v1311_v50  ;;  %v1315_v0 = vsel %vm1313_vm11, %v1314_v16, %v1306_v6 }
 0x10f   :  { %v6349_v36 = vsel %vm6311_vm3, %v5939_v49, %v1133_v27  ;;  %v6352_v44 = vsub.s32 32, %v6271_v42  ;;  %v6355_v33 = vshrl.u32 %v6232_v25, 5  ;;  %v1316_v37 = vsel %vm1309_vm8, %v1312_v12, %v1315_v0 }
 0x110   :  { %v1138_v47 = vmul.f32 %v6349_v36, %v6349_v36  ;;  %v798_v22 = vadd.s32 1, %v794_v52  ;;  %v1317_v26 = vsel %vm1307_vm6, nan, %v1316_v37  ;;  %v6363_v39 = vand.u32 3, %v1137_v15  ;;  %v5614_v15 = vld [vmem:[%s8229_s2 + $0x30] sm:$0xff] }
 0x111   :  { %v8417_v38 = vmov 0.0   ;;  %v795_v25 = vmul.u32 %v6259_v56, %v741_v3  ;;  %v1324_v35 = vadd.f32 1.0, %v1317_v26  ;;  %v6376_v10 = vand.u32 8388607, %v856_v40 }
 0x112   :  { %v6368_v58 = vsel %vm1337_vm5, 1.0, %v8417_v38  ;;  %v1139_v8 = vmul.f32 -0.001358992, %v1138_v47  ;;  %v1146_v46 = vmul.f32 -0.00019511016, %v1138_v47  ;;  %v799_v34 = vsel %vm797_vm12, %v798_v22, %v794_v52 }
 0x113   :  { %v800_v54 = vadd.s32 %v799_v34, %v795_v25  ;;  %v873_v5 = vshll.u32 %v8402_v31, %v6271_v42  ;;  %v874_v32 = vshrl.u32 %v8413_v28, %v6352_v44  ;;  %v1331_v59 = vmul.f32 0.5, %v1324_v35 }
 0x114   :  { %v1140_v56 = vadd.f32 0.041655596, %v1139_v8  ;;  %v1147_v29 = vadd.f32 0.008332121, %v1146_v46  ;;  %v883_v1 = vshrl.u32 %v8404_v61, %v6352_v44  ;;  %v877_v55 = vshrl.u32 %v8401_v24, %v6352_v44 }
 0x115   :  { %v801_v43 = vadd.s32 536870912, %v800_v54  ;;  %v880_v7 = vshrl.u32 %v8403_v17, %v6352_v44  ;;  %v882_v14 = vshll.u32 %v8403_v17, %v6271_v42  ;;  %v6391_v41 = vmul.f32 %v6264_v11, %v1331_v59 }
 0x116   :  { %v1141_v57 = vmul.f32 %v1140_v56, %v1138_v47  ;;  %v1148_v6 = vmul.f32 %v1147_v29, %v1138_v47  ;;  %v876_v16 = vshll.u32 %v8413_v28, %v6271_v42  ;;  %v879_v30 = vshll.u32 %v8401_v24, %v6271_v42 }
 0x117   :  { %8418 = vst [vmem:[#allocation26_spill] sm:$0xff] %v6391_v41  ;;  %v6395_v63 = vshrl.u32 %v801_v43, 30  ;;  %v884_v4 = vor.u32 %v883_v1, %v882_v14  ;;  %v886_v50 = vshrl.u32 %v8405_v53, %v6352_v44  ;;  %v6405_v11 = vmul.f32 %v5614_v15, %v6391_v41 }
 0x118   :  { %v1142_v3 = vadd.f32 -0.4999988, %v1141_v57  ;;  %v1149_v27 = vadd.f32 -0.16666654, %v1148_v6  ;;  %v875_v52 = vor.u32 %v874_v32, %v873_v5  ;;  %v878_v0 = vor.u32 %v877_v55, %v876_v16 }
 0x119   :  { %v803_v12 = vshll.u32 %v6395_v63, 30  ;;  %v881_v37 = vor.u32 %v880_v7, %v879_v30  ;;  %v885_v22 = vshll.u32 %v8404_v61, %v6271_v42  ;;  %1611 = vperm.xlu1 %5377, %v6405_v11   ;;  %vm1155_vm9 = vcmp.lt.s32.totalorder %v6363_v39, 2 }
 0x11a   :  { %v1143_v26 = vmul.f32 %v1142_v3, %v1138_v47  ;;  %v1150_v25 = vmul.f32 %v1149_v27, %v1138_v47  ;;  %vm1156_vm13 = vcmp.eq.s32.totalorder %v6363_v39, 0  ;;  %vm891_vm14 = vcmp.lt.s32.totalorder %v6355_v33, 4 }
 0x11b   :  { %vm1153_vm0 = vweird.f32 %v5939_v49  ;;  %v804_v35 = vsub.s32 %v800_v54, %v803_v12  ;;  %v864_v8 = vor.u32 8388608, %v6376_v10  ;;  %v887_v46 = vor.u32 %v886_v50, %v885_v22 }
 0x11c   :  { %v897_v34 = vsel %vm891_vm14, %v884_v4, 920167782  ;;  %v1144_v42 = vadd.f32 1.0, %v1143_v26  ;;  %v1151_v5 = vadd.f32 1.0, %v1150_v25  ;;  %vm888_vm3 = vcmp.lt.s32.totalorder %v6355_v33, 1 }
 0x11d   :  { %vm890_vm4 = vcmp.lt.s32.totalorder %v6355_v33, 3  ;;  %vm805_vm5 = vcmp.lt.s32.totalorder %v804_v35, 0  ;;  %v806_v47 = vsub.s32 0, %v804_v35  ;;  %v896_v32 = vsel %vm888_vm3, %v875_v52, %v878_v0 }
 0x11e   :  { %v898_v54 = vsel %vm890_vm4, %v881_v37, %v897_v34  ;;  %v1152_v10 = vmul.f32 %v1151_v5, %v6349_v36  ;;  %vm1159_vm6 = vcmp.eq.s32.totalorder %v6363_v39, 2  ;;  %v1160_v59 = vxor.u32 2147483648, %v1144_v42 }
 0x11f   :  { %v796_v56 = vadd.s32 %v6333_v60, %v6327_v51  ;;  %v807_v29 = vsel %vm805_vm5, %v806_v47, %v804_v35  ;;  %v872_v1 = vshrl.u32 %v8402_v31, %v6352_v44  ;;  %vm889_vm7 = vcmp.lt.s32.totalorder %v6355_v33, 2 }
 0x120   :  { %v900_v43 = vsel %vm888_vm3, %v878_v0, %v881_v37  ;;  %v1157_v55 = vxor.u32 2147483648, %v1152_v10  ;;  %v808_v7 = vclz %v807_v29  ;;  %v899_v36 = vsel %vm889_vm7, %v896_v32, %v898_v54 }
 0x121   :  { %v901_v14 = vsel %vm891_vm14, %v887_v46, 1326507024  ;;  %v826_v57 = vsub.s32 4, %v6395_v63  ;;  %v893_v51 = vsel %vm891_vm14, %v881_v37, 2102212464  ;;  %v6442_v44 = vshll.u32 %v864_v8, 8 }
 0x122   :  { %v902_v60 = vsel %vm890_vm4, %v884_v4, %v901_v14  ;;  %v1158_v6 = vsel %vm1156_vm13, %v1144_v42, %v1157_v55  ;;  %v1161_v16 = vsel %vm1159_vm6, %v1160_v59, %v1152_v10  ;;  %v4563_v30 = vadd.s32 4294967294, %v808_v7 }
 0x123   :  { %v903_v50 = vsel %vm889_vm7, %v900_v43, %v902_v60  ;;  %v1162_v15 = vsel %vm1155_vm9, %v1158_v6, %v1161_v16  ;;  %v906_v3 = vshrl.u32 %v6442_v44, 16  ;;  %v929_v12 = vand.u32 65535, %v899_v36 }
 0x124   :  { %v907_v27 = vand.u32 65535, %v903_v50  ;;  %v1163_v4 = vsel %vm1153_vm0, nan, %v1162_v15  ;;  %vm4564_vm8 = vcmp.lt.s32.totalorder %v4563_v30, 0  ;;  %v905_v37 = vand.u32 65535, %v6442_v44 }
 0x125   :  { %v908_v22 = vshrl.u32 %v903_v50, 16  ;;  %v1323_v26 = vadd.f32 1.0, %v1163_v4  ;;  %v811_v25 = vsel %vm4564_vm8, 0, %v4563_v30  ;;  %v930_v46 = vshrl.u32 %v899_v36, 16 }
 0x126   :  { %v911_v8 = vmul.u32 %v907_v27, %v906_v3  ;;  %vm704_vm10 = vcmp.lt.s32.totalorder %v5877_v48, 0  ;;  %v812_v34 = vsub.s32 32, %v811_v25  ;;  %v816_v39 = vsub.s32 4294967266, %v811_v25 }
 0x127   :  { %v892_v42 = vsel %vm888_vm3, %v872_v1, %v875_v52  ;;  %v910_v5 = vmul.u32 %v908_v22, %v905_v37  ;;  %v1330_v47 = vmul.f32 0.5, %v1323_v26  ;;  %v813_v32 = vshll.u32 %v804_v35, %v811_v25  ;;  %v5615_v35 = vld [vmem:[%s8229_s2 + $0x28] sm:$0xff] }
 0x128   :  { %v894_v49 = vsel %vm890_vm4, %v878_v0, %v893_v51  ;;  %v909_v54 = vmul.u32 %v907_v27, %v905_v37  ;;  %v814_v10 = vshrl.u32 %v796_v56, %v812_v34  ;;  %v817_v59 = vadd.s32 127, %v816_v39 }
 0x129   :  { %v912_v29 = vmul.u32 %v908_v22, %v906_v3  ;;  %v913_v43 = vshll.u32 %v910_v5, 16  ;;  %v6462_v55 = vmul.f32 %v6368_v58, %v1330_v47  ;;  %v915_v7 = vshll.u32 %v911_v8, 16 }
 0x12a   :  { %v932_v36 = vmul.u32 %v930_v46, %v905_v37  ;;  %v933_v14 = vmul.u32 %v929_v12, %v906_v3  ;;  %v815_v60 = vor.u32 %v814_v10, %v813_v32  ;;  %v818_v6 = vshll.u32 %v817_v59, 23 }
 0x12b   :  { %vm917_vm11 = vc.u32 %v909_v54, %v913_v43  ;;  %v919_v52 = vadd.s32 %v913_v43, %v909_v54  ;;  %v6468_v0 = vmul.f32 %v5615_v35, %v6462_v55  ;;  %v914_v56 = vshrl.u32 %v910_v5, 16 }
 0x12c   :  { %v918_v1 = vsel %vm917_vm11, 1, %v5696_v45  ;;  %v935_v51 = vshll.u32 %v932_v36, 16  ;;  %v819_v58 = vor.u32 4788187, %v818_v6  ;;  %v931_v30 = vmul.u32 %v929_v12, %v905_v37 }
 0x12d   :  { %v920_v16 = vadd.s32 %v918_v1, %v912_v29  ;;  %vm921_vm12 = vc.u32 %v919_v52, %v915_v7  ;;  %1607 = vperm.xlu0 %5379, %v6468_v0   ;;  %v822_v50 = vcvt.s32.f32 %v815_v60  ;;  %v934_v27 = vmul.u32 %v930_v46, %v906_v3 }
 0x12e   :  { %v922_v15 = vsel %vm921_vm12, 1, %v5696_v45  ;;  %v937_v4 = vshll.u32 %v933_v14, 16  ;;  %v820_v22 = vand.u32 2147483647, %v819_v58  ;;  %vm939_vm9 = vc.u32 %v931_v30, %v935_v51 }
 0x12f   :  { %v924_v26 = vadd.s32 %v922_v15, %v920_v16  ;;  %v941_v25 = vadd.s32 %v935_v51, %v931_v30  ;;  %v408_v34 = vand.u32 31, %v6180_v23  ;;  %v827_v39 = vsel %vm704_vm10, %v826_v57, %v6395_v63 }
 0x130   :  { %v895_v12 = vsel %vm889_vm7, %v892_v42, %v894_v49  ;;  %v940_v37 = vsel %vm939_vm9, 1, %v5696_v45  ;;  %v823_v5 = vmul.f32 %v822_v50, %v820_v22  ;;  %v6481_v3 = vshrl.u32 %v6180_v23, 5 }
 0x131   :  { %v925_v47 = vadd.s32 %v924_v26, %v914_v56  ;;  %v942_v32 = vadd.s32 %v940_v37, %v934_v27  ;;  %vm943_vm13 = vc.u32 %v941_v25, %v937_v4  ;;  %v916_v46 = vshrl.u32 %v911_v8, 16 }
 0x132   :  { %v944_v54 = vsel %vm943_vm13, 1, %v5696_v45  ;;  %v394_v10 = vand.u32 2147483647, %v5927_v21  ;;  %v8419_v59 = vand.u32 2147483647, %v5877_v48  ;;  %v824_v33 = vxor.u32 2147483648, %v823_v5 }
 0x133   :  { %v936_v57 = vshrl.u32 %v932_v36, 16  ;;  %v946_v42 = vadd.s32 %v944_v54, %v942_v32  ;;  %v6493_v29 = vadd.s32 %v925_v47, %v916_v46  ;;  %v949_v23 = vmul.u32 %v6442_v44, %v895_v12 }
 0x134   :  { %vm6487_vm14 = vcmp.le.f32.partialorder %v8419_v59, 0.7853982  ;;  %v6496_v8 = vsub.s32 32, %v408_v34  ;;  %v825_v43 = vsel %vm704_vm10, %v824_v33, %v823_v5  ;;  %v938_v7 = vshrl.u32 %v933_v14, 16 }
 0x135   :  { %v829_v49 = vsel %vm6487_vm14, 0, %v827_v39  ;;  %v6500_v60 = vadd.s32 %v941_v25, %v937_v4  ;;  %v947_v6 = vadd.s32 %v946_v42, %v936_v57  ;;  %v6505_v36 = vsel %vm6487_vm14, %v5877_v48, %v825_v43  ;;  %5382 = vset.pattern.permute.xlu0 %v5696_v45 }
 0x136   :  { %v401_v52 = vand.u32 8388607, %v394_v10  ;;  %v411_v44 = vshll.u32 %v8402_v31, %v408_v34  ;;  %v412_v35 = vshrl.u32 %v8413_v28, %v6496_v8  ;;  %v830_v14 = vmul.f32 %v6505_v36, %v6505_v36  ;;  %1571 = vperm.xlu0 %5382, %v6468_v0  }
 0x137   :  { %v948_v56 = vadd.s32 %v947_v6, %v938_v7  ;;  %v414_v1 = vshll.u32 %v8413_v28, %v408_v34  ;;  %v415_v51 = vshrl.u32 %v8401_v24, %v6496_v8  ;;  %vm1335_vm0 = vcmp.lt.f32.partialorder %v5841_v18, 5.0 }
 0x138   :  { %vm951_vm3 = vc.u32 %v6493_v29, %v6500_v60  ;;  %v418_v58 = vshrl.u32 %v8403_v17, %v6496_v8  ;;  %v420_v16 = vshll.u32 %v8403_v17, %v408_v34  ;;  %v421_v30 = vshrl.u32 %v8404_v61, %v6496_v8 }
 0x139   :  { %v831_v50 = vmul.f32 -0.001358992, %v830_v14  ;;  %v838_v15 = vmul.f32 -0.00019511016, %v830_v14  ;;  %v952_v27 = vadd.s32 1, %v948_v56  ;;  %v417_v4 = vshll.u32 %v8401_v24, %v408_v34 }
 0x13a   :  { %v6528_v22 = vor.u32 %v412_v35, %v411_v44  ;;  %v422_v26 = vor.u32 %v421_v30, %v420_v16  ;;  %v423_v25 = vshll.u32 %v8404_v61, %v408_v34  ;;  %v424_v39 = vshrl.u32 %v8405_v53, %v6496_v8 }
 0x13b   :  { %v832_v12 = vadd.f32 0.041655596, %v831_v50  ;;  %v839_v37 = vadd.f32 0.008332121, %v838_v15  ;;  %v953_v5 = vsel %vm951_vm3, %v952_v27, %v948_v56  ;;  %v6533_v47 = vor.u32 %v415_v51, %v414_v1 }
 0x13c   :  { %v846_v32 = vand.u32 3, %v829_v49  ;;  %v954_v46 = vadd.s32 %v953_v5, %v949_v23  ;;  %v6535_v54 = vor.u32 %v418_v58, %v417_v4  ;;  %v425_v59 = vor.u32 %v424_v39, %v423_v25 }
 0x13d   :  { %v833_v63 = vmul.f32 %v832_v12, %v830_v14  ;;  %v840_v33 = vmul.f32 %v839_v37, %v830_v14  ;;  %v402_v57 = vor.u32 8388608, %v401_v52  ;;  %vm429_vm4 = vcmp.lt.s32.totalorder %v6481_v3, 4 }
 0x13e   :  { %v955_v42 = vadd.s32 536870912, %v954_v46  ;;  %vm426_vm5 = vcmp.lt.s32.totalorder %v6481_v3, 1  ;;  %vm427_vm6 = vcmp.lt.s32.totalorder %v6481_v3, 2  ;;  %v435_v34 = vsel %vm429_vm4, %v422_v26, 920167782 }
 0x13f   :  { %v834_v43 = vadd.f32 -0.4999988, %v833_v63  ;;  %v841_v7 = vadd.f32 -0.16666654, %v840_v33  ;;  %vm428_vm7 = vcmp.lt.s32.totalorder %v6481_v3, 3  ;;  %v434_v49 = vsel %vm426_vm5, %v6528_v22, %v6533_v47 }
 0x140   :  { %v6547_v23 = vshrl.u32 %v955_v42, 30  ;;  %v436_v6 = vsel %vm428_vm7, %v6535_v54, %v435_v34  ;;  %v438_v52 = vsel %vm426_vm5, %v6533_v47, %v6535_v54  ;;  %v439_v44 = vsel %vm429_vm4, %v425_v59, 1326507024 }
 0x141   :  { %v835_v35 = vmul.f32 %v834_v43, %v830_v14  ;;  %v842_v56 = vmul.f32 %v841_v7, %v830_v14  ;;  %v440_v1 = vsel %vm428_vm7, %v422_v26, %v439_v44  ;;  %v6560_v51 = vshll.u32 %v402_v57, 8 }
 0x142   :  { %v6563_v58 = vand.u32 31, %v6152_v19  ;;  %vm845_vm8 = vweird.f32 %v5877_v48  ;;  %v957_v16 = vshll.u32 %v6547_v23, 30  ;;  %v441_v30 = vsel %vm427_vm6, %v438_v52, %v440_v1 }
 0x143   :  { %v836_v50 = vadd.f32 1.0, %v835_v35  ;;  %v843_v15 = vadd.f32 1.0, %v842_v56  ;;  %vm847_vm10 = vcmp.lt.s32.totalorder %v846_v32, 2  ;;  %v4577_v14 = vsel %vm1335_vm0, 1.0, %v8417_v38 }
 0x144   :  { %v958_v27 = vsub.s32 %v954_v46, %v957_v16  ;;  %v437_v4 = vsel %vm427_vm6, %v434_v49, %v436_v6  ;;  %v445_v26 = vand.u32 65535, %v441_v30  ;;  %v446_v25 = vshrl.u32 %v441_v30, 16 }
 0x145   :  { %v844_v39 = vmul.f32 %v843_v15, %v6505_v36  ;;  %v852_v12 = vxor.u32 2147483648, %v836_v50  ;;  %v443_v37 = vand.u32 65535, %v6560_v51  ;;  %v444_v5 = vshrl.u32 %v6560_v51, 16 }
 0x146   :  { %vm848_vm11 = vcmp.eq.s32.totalorder %v846_v32, 0  ;;  %vm851_vm12 = vcmp.eq.s32.totalorder %v846_v32, 2  ;;  %vm959_vm9 = vcmp.lt.s32.totalorder %v958_v27, 0  ;;  %v960_v59 = vsub.s32 0, %v958_v27 }
 0x147   :  { %v849_v63 = vxor.u32 2147483648, %v844_v39  ;;  %v950_v46 = vadd.s32 %v6500_v60, %v6493_v29  ;;  %v448_v33 = vmul.u32 %v446_v25, %v443_v37  ;;  %v6579_v57 = vmul.u32 %v445_v26, %v444_v5 }
 0x148   :  { %v961_v42 = vsel %vm959_vm9, %v960_v59, %v958_v27  ;;  %v410_v36 = vshrl.u32 %v8402_v31, %v6496_v8  ;;  %v447_v34 = vmul.u32 %v445_v26, %v443_v37  ;;  %v468_v43 = vshrl.u32 %v437_v4, 16 }
 0x149   :  { %v850_v7 = vsel %vm848_vm11, %v836_v50, %v849_v63  ;;  %v853_v49 = vsel %vm851_vm12, %v852_v12, %v844_v39  ;;  %v962_v6 = vclz %v961_v42  ;;  %v451_v52 = vshll.u32 %v448_v33, 16 }
 0x14a   :  { %v854_v44 = vsel %vm847_vm10, %v850_v7, %v853_v49  ;;  %v450_v35 = vmul.u32 %v446_v25, %v444_v5  ;;  %v453_v56 = vshll.u32 %v6579_v57, 16  ;;  %v467_v1 = vand.u32 65535, %v437_v4 }
 0x14b   :  { %v855_v29 = vsel %vm845_vm8, nan, %v854_v44  ;;  %v4566_v60 = vadd.s32 4294967294, %v962_v6  ;;  %vm455_vm13 = vc.u32 %v447_v34, %v451_v52  ;;  %v457_v16 = vadd.s32 %v451_v52, %v447_v34  ;;  %v5616_v44 = vld [vmem:[%s8229_s2 + $0x18] sm:$0xff] }
 0x14c   :  { %v1321_v30 = vadd.f32 1.0, %v855_v29  ;;  %v431_v8 = vsel %vm429_vm4, %v6535_v54, 2102212464  ;;  %v456_v50 = vsel %vm455_vm13, 1, %v5696_v45  ;;  %v470_v15 = vmul.u32 %v468_v43, %v443_v37 }
 0x14d   :  { %vm4567_vm14 = vcmp.lt.s32.totalorder %v4566_v60, 0  ;;  %v430_v32 = vsel %vm426_vm5, %v410_v36, %v6528_v22  ;;  %v458_v4 = vadd.s32 %v456_v50, %v450_v35  ;;  %vm459_vm0 = vc.u32 %v457_v16, %v453_v56 }
 0x14e   :  { %v1328_v48 = vmul.f32 0.5, %v1321_v30  ;;  %v965_v26 = vsel %vm4567_vm14, 0, %v4566_v60  ;;  %v460_v25 = vsel %vm459_vm0, 1, %v5696_v45  ;;  %v471_v39 = vmul.u32 %v467_v1, %v444_v5 }
 0x14f   :  { %v966_v12 = vsub.s32 32, %v965_v26  ;;  %v970_v59 = vsub.s32 4294967266, %v965_v26  ;;  %v432_v54 = vsel %vm428_vm7, %v6533_v47, %v431_v8  ;;  %v462_v63 = vadd.s32 %v460_v25, %v458_v4 }
 0x150   :  { %v6598_v42 = vmul.f32 %v4577_v14, %v1328_v48  ;;  %v452_v34 = vshrl.u32 %v448_v33, 16  ;;  %v469_v7 = vmul.u32 %v467_v1, %v443_v37  ;;  %v473_v49 = vshll.u32 %v470_v15, 16 }
 0x151   :  { %v967_v22 = vshll.u32 %v958_v27, %v965_v26  ;;  %v968_v36 = vshrl.u32 %v950_v46, %v966_v12  ;;  %v971_v6 = vadd.s32 127, %v970_v59  ;;  %v472_v52 = vmul.u32 %v468_v43, %v444_v5 }
 0x152   :  { %8422 = vst [vmem:[#allocation27_spill] sm:$0xff] %v6598_v42  ;;  %v6604_v35 = vmul.f32 %v5616_v44, %v6598_v42  ;;  %v475_v56 = vshll.u32 %v471_v39, 16  ;;  %vm477_vm3 = vc.u32 %v469_v7, %v473_v49  ;;  %v479_v47 = vadd.s32 %v473_v49, %v469_v7 }
 0x153   :  { %v969_v29 = vor.u32 %v968_v36, %v967_v22  ;;  %v972_v14 = vshll.u32 %v971_v6, 23  ;;  %v463_v60 = vadd.s32 %v462_v63, %v452_v34  ;;  %v478_v37 = vsel %vm477_vm3, 1, %v5696_v45 }
 0x154   :  { %v6608_v27 = vand.u32 31, %v6144_v62  ;;  %v6611_v5 = vshrl.u32 %v6152_v19, 5  ;;  %1599 = vperm.xlu1 %5377, %v6604_v35   ;;  %v480_v46 = vadd.s32 %v478_v37, %v472_v52  ;;  %vm481_vm4 = vc.u32 %v479_v47, %v475_v56 }
 0x155   :  { %v973_v33 = vor.u32 4788187, %v972_v14  ;;  %v980_v43 = vsub.s32 4, %v6547_v23  ;;  %v454_v1 = vshrl.u32 %v6579_v57, 16  ;;  %v482_v16 = vsel %vm481_vm4, 1, %v5696_v45 }
 0x156   :  { %vm858_vm5 = vcmp.lt.s32.totalorder %v5963_v20, 0  ;;  %v433_v30 = vsel %vm427_vm6, %v430_v32, %v432_v54  ;;  %v474_v8 = vshrl.u32 %v470_v15, 16  ;;  %v484_v50 = vadd.s32 %v482_v16, %v480_v46 }
 0x157   :  { %v974_v19 = vand.u32 2147483647, %v973_v33  ;;  %v976_v4 = vcvt.s32.f32 %v969_v29  ;;  %v6620_v48 = vadd.s32 %v463_v60, %v454_v1  ;;  %v563_v26 = vsub.s32 32, %v6563_v58 }
 0x158   :  { %vm6625_vm7 = vcmp.le.f32.partialorder %v856_v40, 0.7853982  ;;  %v476_v57 = vshrl.u32 %v471_v39, 16  ;;  %v485_v12 = vadd.s32 %v484_v50, %v474_v8  ;;  %v548_v59 = vand.u32 2147483647, %v5920_v13 }
 0x159   :  { %v977_v3 = vmul.f32 %v976_v4, %v974_v19  ;;  %v981_v15 = vsel %vm858_vm5, %v980_v43, %v6547_v23  ;;  %vm1336_vm6 = vcmp.lt.f32.partialorder %v5902_v2, 5.0  ;;  %v6634_v32 = vadd.s32 %v479_v47, %v475_v56 }
 0x15a   :  { %v486_v54 = vadd.s32 %v485_v12, %v476_v57  ;;  %v487_v63 = vmul.u32 %v6560_v51, %v433_v30  ;;  %v568_v40 = vshll.u32 %v8413_v28, %v6563_v58  ;;  %v569_v39 = vshrl.u32 %v8401_v24, %v563_v26 }
 0x15b   :  { %v978_v34 = vxor.u32 2147483648, %v977_v3  ;;  %vm489_vm8 = vc.u32 %v6620_v48, %v6634_v32  ;;  %v571_v7 = vshll.u32 %v8401_v24, %v6563_v58  ;;  %v572_v23 = vshrl.u32 %v8403_v17, %v563_v26 }
 0x15c   :  { %v490_v49 = vadd.s32 1, %v486_v54  ;;  %v555_v22 = vand.u32 8388607, %v548_v59  ;;  %v574_v51 = vshll.u32 %v8403_v17, %v6563_v58  ;;  %v575_v36 = vshrl.u32 %v8404_v61, %v563_v26 }
 0x15d   :  { %v979_v6 = vsel %vm858_vm5, %v978_v34, %v977_v3  ;;  %v565_v52 = vshll.u32 %v8402_v31, %v6563_v58  ;;  %v577_v44 = vshll.u32 %v8404_v61, %v6563_v58  ;;  %v578_v56 = vshrl.u32 %v8405_v53, %v563_v26 }
 0x15e   :  { %v6660_v47 = vsel %vm6625_vm7, %v5963_v20, %v979_v6  ;;  %v491_v29 = vsel %vm489_vm8, %v490_v49, %v486_v54  ;;  %v566_v14 = vshrl.u32 %v8413_v28, %v563_v26  ;;  %v570_v60 = vor.u32 %v569_v39, %v568_v40 }
 0x15f   :  { %v984_v37 = vmul.f32 %v6660_v47, %v6660_v47  ;;  %v492_v46 = vadd.s32 %v491_v29, %v487_v63  ;;  %v573_v33 = vor.u32 %v572_v23, %v571_v7  ;;  %v579_v43 = vor.u32 %v578_v56, %v577_v44 }
 0x160   :  { %v556_v1 = vor.u32 8388608, %v555_v22  ;;  %v576_v16 = vor.u32 %v575_v36, %v574_v51  ;;  %vm580_vm10 = vcmp.lt.s32.totalorder %v6611_v5, 1  ;;  %vm583_vm11 = vcmp.lt.s32.totalorder %v6611_v5, 4 }
 0x161   :  { %v983_v58 = vsel %vm6625_vm7, 0, %v981_v15  ;;  %v985_v30 = vmul.f32 -0.001358992, %v984_v37  ;;  %v992_v8 = vmul.f32 -0.00019511016, %v984_v37  ;;  %v493_v50 = vadd.s32 536870912, %v492_v46 }
 0x162   :  { %v6672_v19 = vsel %vm1336_vm6, 1.0, %v8417_v38  ;;  %v567_v4 = vor.u32 %v566_v14, %v565_v52  ;;  %vm582_vm12 = vcmp.lt.s32.totalorder %v6611_v5, 3  ;;  %v593_v57 = vsel %vm583_vm11, %v579_v43, 1326507024 }
 0x163   :  { %v986_v12 = vadd.f32 0.041655596, %v985_v30  ;;  %v993_v3 = vadd.f32 0.008332121, %v992_v8  ;;  %v6677_v54 = vshrl.u32 %v493_v50, 30  ;;  %v592_v25 = vsel %vm580_vm10, %v570_v60, %v573_v33 }
 0x164   :  { %v1000_v15 = vand.u32 3, %v983_v58  ;;  %v589_v63 = vsel %vm583_vm11, %v576_v16, 920167782  ;;  %v594_v40 = vsel %vm582_vm12, %v576_v16, %v593_v57  ;;  %v6685_v39 = vshll.u32 %v556_v1, 8 }
 0x165   :  { %v987_v34 = vmul.f32 %v986_v12, %v984_v37  ;;  %v994_v7 = vmul.f32 %v993_v3, %v984_v37  ;;  %v495_v23 = vshll.u32 %v6677_v54, 30  ;;  %vm581_vm9 = vcmp.lt.s32.totalorder %v6611_v5, 2 }
 0x166   :  { %v564_v49 = vshrl.u32 %v8402_v31, %v563_v26  ;;  %v585_v22 = vsel %vm583_vm11, %v573_v33, 2102212464  ;;  %v588_v51 = vsel %vm580_vm10, %v567_v4, %v570_v60  ;;  %v595_v36 = vsel %vm581_vm9, %v592_v25, %v594_v40 }
 0x167   :  { %v988_v6 = vadd.f32 -0.4999988, %v987_v34  ;;  %v995_v52 = vadd.f32 -0.16666654, %v994_v7  ;;  %v6696_v44 = vsub.s32 %v492_v46, %v495_v23  ;;  %v590_v56 = vsel %vm582_vm12, %v573_v33, %v589_v63 }
 0x168   :  { %v597_v29 = vand.u32 65535, %v6685_v39  ;;  %v6702_v26 = vshrl.u32 %v6685_v39, 16  ;;  %v599_v14 = vand.u32 65535, %v595_v36  ;;  %v600_v43 = vshrl.u32 %v595_v36, 16 }
 0x169   :  { %v989_v1 = vmul.f32 %v988_v6, %v984_v37  ;;  %v996_v16 = vmul.f32 %v995_v52, %v984_v37  ;;  %vm1001_vm13 = vcmp.lt.s32.totalorder %v1000_v15, 2  ;;  %vm497_vm14 = vcmp.lt.s32.totalorder %v6696_v44, 0 }
 0x16a   :  { %v498_v58 = vsub.s32 0, %v6696_v44  ;;  %vm999_vm0 = vweird.f32 %v5963_v20  ;;  %vm1002_vm3 = vcmp.eq.s32.totalorder %v1000_v15, 0  ;;  %vm1005_vm4 = vcmp.eq.s32.totalorder %v1000_v15, 2 }
 0x16b   :  { %v591_v46 = vsel %vm581_vm9, %v588_v51, %v590_v56  ;;  %v602_v33 = vmul.u32 %v600_v43, %v597_v29  ;;  %v990_v30 = vadd.f32 1.0, %v989_v1  ;;  %v997_v8 = vadd.f32 1.0, %v996_v16 }
 0x16c   :  { %v499_v50 = vsel %vm497_vm14, %v498_v58, %v6696_v44  ;;  %v6711_v57 = vmul.u32 %v599_v14, %v6702_v26  ;;  %v488_v37 = vadd.s32 %v6634_v32, %v6620_v48  ;;  %v584_v3 = vsel %vm580_vm10, %v564_v49, %v567_v4 }
 0x16d   :  { %v500_v12 = vclz %v499_v50  ;;  %v586_v25 = vsel %vm582_vm12, %v570_v60, %v585_v22  ;;  %v998_v63 = vmul.f32 %v997_v8, %v6660_v47  ;;  %v1006_v40 = vxor.u32 2147483648, %v990_v30 }
 0x16e   :  { %v601_v34 = vmul.u32 %v599_v14, %v597_v29  ;;  %v605_v7 = vshll.u32 %v602_v33, 16  ;;  %vm396_vm5 = vcmp.lt.s32.totalorder %v5927_v21, 0  ;;  %v604_v51 = vmul.u32 %v600_v43, %v6702_v26 }
 0x16f   :  { %v4557_v23 = vadd.s32 4294967294, %v500_v12  ;;  %v621_v36 = vand.u32 65535, %v591_v46  ;;  %v622_v6 = vshrl.u32 %v591_v46, 16  ;;  %v1003_v48 = vxor.u32 2147483648, %v998_v63 }
 0x170   :  { %v607_v32 = vshll.u32 %v6711_v57, 16  ;;  %vm609_vm7 = vc.u32 %v601_v34, %v605_v7  ;;  %v611_v4 = vadd.s32 %v605_v7, %v601_v34  ;;  %v1007_v49 = vsel %vm1005_vm4, %v1006_v40, %v998_v63 }
 0x171   :  { %vm4558_vm6 = vcmp.lt.s32.totalorder %v4557_v23, 0  ;;  %v610_v47 = vsel %vm609_vm7, 1, %v5696_v45  ;;  %v624_v60 = vmul.u32 %v622_v6, %v597_v29  ;;  %v1004_v22 = vsel %vm1002_vm3, %v990_v30, %v1003_v48 }
 0x172   :  { %v503_v52 = vsel %vm4558_vm6, 0, %v4557_v23  ;;  %v612_v56 = vadd.s32 %v610_v47, %v604_v51  ;;  %vm613_vm8 = vc.u32 %v611_v4, %v607_v32  ;;  %v1008_v14 = vsel %vm1001_vm13, %v1004_v22, %v1007_v49 }
 0x173   :  { %v504_v43 = vsub.s32 32, %v503_v52  ;;  %v508_v1 = vsub.s32 4294967266, %v503_v52  ;;  %v518_v16 = vsub.s32 4, %v6677_v54  ;;  %v1009_v58 = vsel %vm999_vm0, nan, %v1008_v14 }
 0x174   :  { %v505_v46 = vshll.u32 %v6696_v44, %v503_v52  ;;  %v614_v8 = vsel %vm613_vm8, 1, %v5696_v45  ;;  %v625_v50 = vmul.u32 %v621_v36, %v6702_v26  ;;  %v1322_v12 = vadd.f32 1.0, %v1009_v58 }
 0x175   :  { %v506_v30 = vshrl.u32 %v488_v37, %v504_v43  ;;  %v509_v63 = vadd.s32 127, %v508_v1  ;;  %v616_v40 = vadd.s32 %v614_v8, %v612_v56  ;;  %vm6735_vm10 = vcmp.le.f32.partialorder %v394_v10, 0.7853982 }
 0x176   :  { %v6741_v20 = vsel %vm581_vm9, %v584_v3, %v586_v25  ;;  %v623_v34 = vmul.u32 %v621_v36, %v597_v29  ;;  %v627_v44 = vshll.u32 %v624_v60, 16  ;;  %v1329_v7 = vmul.f32 0.5, %v1322_v12 }
 0x177   :  { %v507_v23 = vor.u32 %v506_v30, %v505_v46  ;;  %v510_v51 = vshll.u32 %v509_v63, 23  ;;  %v606_v48 = vshrl.u32 %v602_v33, 16  ;;  %v6746_v37 = vsel %vm396_vm5, %v518_v16, %v6677_v54  ;;  %v8428_v33 = vld [vmem:[#allocation19_spill] sm:$0xff] }
 0x178   :  { %v629_v32 = vshll.u32 %v625_v50, 16  ;;  %vm631_vm11 = vc.u32 %v623_v34, %v627_v44  ;;  %v633_v10 = vadd.s32 %v627_v44, %v623_v34  ;;  %v6749_v4 = vmul.f32 %v6672_v19, %v1329_v7  ;;  %v6757_v54 = vld [vmem:[%s8229_s2 + $0x20] sm:$0xff] }
 0x179   :  { %v511_v5 = vor.u32 4788187, %v510_v51  ;;  %v617_v3 = vadd.s32 %v616_v40, %v606_v48  ;;  %v626_v29 = vmul.u32 %v622_v6, %v6702_v26  ;;  %v514_v25 = vcvt.s32.f32 %v507_v23 }
 0x17a   :  { %8427 = vst [vmem:[#allocation28_spill] sm:$0xff] %v6749_v4  ;;  %v632_v36 = vsel %vm631_vm11, 1, %v5696_v45  ;;  %vm635_vm12 = vc.u32 %v633_v10, %v629_v32  ;;  %v240_v49 = vand.u32 2147483647, %v8428_v33  ;;  %v6761_v47 = vmul.f32 %v6757_v54, %v6749_v4 }
 0x17b   :  { %v512_v19 = vand.u32 2147483647, %v511_v5  ;;  %v634_v22 = vadd.s32 %v632_v36, %v626_v29  ;;  %v636_v52 = vsel %vm635_vm12, 1, %v5696_v45  ;;  %v6765_v26 = vshrl.u32 %v6144_v62, 5 }
 0x17c   :  { %v521_v6 = vsel %vm6735_vm10, 0, %v6746_v37  ;;  %v608_v56 = vshrl.u32 %v6711_v57, 16  ;;  %v641_v14 = vmul.u32 %v6685_v39, %v6741_v20  ;;  %1603 = vperm.xlu2 %5378, %v6761_v47   ;;  %v628_v1 = vshrl.u32 %v624_v60, 16 }
 0x17d   :  { %v515_v43 = vmul.f32 %v514_v25, %v512_v19  ;;  %v638_v16 = vadd.s32 %v636_v52, %v634_v22  ;;  %v6775_v58 = vsub.s32 32, %v6608_v27  ;;  %v630_v62 = vshrl.u32 %v625_v50, 16 }
 0x17e   :  { %v6777_v46 = vadd.s32 %v617_v3, %v608_v56  ;;  %v6779_v8 = vadd.s32 %v633_v10, %v629_v32  ;;  %v247_v12 = vand.u32 8388607, %v240_v49  ;;  %v260_v39 = vshll.u32 %v8413_v28, %v6608_v27 }
 0x17f   :  { %v516_v57 = vxor.u32 2147483648, %v515_v43  ;;  %v639_v30 = vadd.s32 %v638_v16, %v628_v1  ;;  %v266_v60 = vshll.u32 %v8403_v17, %v6608_v27  ;;  %v261_v63 = vshrl.u32 %v8401_v24, %v6775_v58 }
 0x180   :  { %v263_v40 = vshll.u32 %v8401_v24, %v6608_v27  ;;  %v264_v50 = vshrl.u32 %v8403_v17, %v6775_v58  ;;  %v267_v20 = vshrl.u32 %v8404_v61, %v6775_v58  ;;  %v269_v7 = vshll.u32 %v8404_v61, %v6608_v27 }
 0x181   :  { %v517_v34 = vsel %vm396_vm5, %v516_v57, %v515_v43  ;;  %v640_v44 = vadd.s32 %v639_v30, %v630_v62  ;;  %v270_v23 = vshrl.u32 %v8405_v53, %v6775_v58  ;;  %vm643_vm9 = vc.u32 %v6777_v46, %v6779_v8 }
 0x182   :  { %v520_v24 = vsel %vm6735_vm10, %v5927_v21, %v517_v34  ;;  %v257_v17 = vshll.u32 %v8402_v31, %v6608_v27  ;;  %v258_v51 = vshrl.u32 %v8413_v28, %v6775_v58  ;;  %v248_v32 = vor.u32 8388608, %v247_v12  ;;  %v8429_v27 = vld [vmem:[#allocation18_spill] sm:$0xff] }
 0x183   :  { %v522_v48 = vmul.f32 %v520_v24, %v520_v24  ;;  %v644_v37 = vadd.s32 1, %v640_v44  ;;  %v268_v61 = vor.u32 %v267_v20, %v266_v60  ;;  %v6810_v10 = vor.u32 %v261_v63, %v260_v39 }
 0x184   :  { %v6812_v53 = vor.u32 %v264_v50, %v263_v40  ;;  %v271_v5 = vor.u32 %v270_v23, %v269_v7  ;;  %vm275_vm13 = vcmp.lt.s32.totalorder %v6765_v26, 4  ;;  %vm272_vm14 = vcmp.lt.s32.totalorder %v6765_v26, 1 }
 0x185   :  { %v523_v15 = vmul.f32 -0.001358992, %v522_v48  ;;  %v530_v3 = vmul.f32 -0.00019511016, %v522_v48  ;;  %v645_v29 = vsel %vm643_vm9, %v644_v37, %v640_v44  ;;  %vm1333_vm0 = vcmp.lt.f32.partialorder %v8429_v27, 5.0 }
 0x186   :  { %v646_v25 = vadd.s32 %v645_v29, %v641_v14  ;;  %v6817_v28 = vor.u32 %v258_v51, %v257_v17  ;;  %vm274_vm3 = vcmp.lt.s32.totalorder %v6765_v26, 3  ;;  %v281_v22 = vsel %vm275_vm13, %v268_v61, 920167782 }
 0x187   :  { %v524_v36 = vadd.f32 0.041655596, %v523_v15  ;;  %v531_v19 = vadd.f32 0.008332121, %v530_v3  ;;  %v538_v52 = vand.u32 3, %v521_v6  ;;  %vm273_vm4 = vcmp.lt.s32.totalorder %v6765_v26, 2 }
 0x188   :  { %v647_v56 = vadd.s32 536870912, %v646_v25  ;;  %v284_v43 = vsel %vm272_vm14, %v6810_v10, %v6812_v53  ;;  %v285_v16 = vsel %vm275_vm13, %v271_v5, 1326507024  ;;  %v6829_v62 = vshll.u32 %v248_v32, 8 }
 0x189   :  { %v525_v1 = vmul.f32 %v524_v36, %v522_v48  ;;  %v532_v14 = vmul.f32 %v531_v19, %v522_v48  ;;  %v280_v6 = vsel %vm272_vm14, %v6817_v28, %v6810_v10  ;;  %v282_v57 = vsel %vm274_vm3, %v6812_v53, %v281_v22 }
 0x18a   :  { %v6831_v12 = vshrl.u32 %v647_v56, 30  ;;  %v286_v30 = vsel %vm274_vm3, %v268_v61, %v285_v16  ;;  %v289_v40 = vand.u32 65535, %v6829_v62  ;;  %v290_v20 = vshrl.u32 %v6829_v62, 16 }
 0x18b   :  { %v526_v39 = vadd.f32 -0.4999988, %v525_v1  ;;  %v533_v60 = vadd.f32 -0.16666654, %v532_v14  ;;  %v287_v63 = vsel %vm273_vm4, %v284_v43, %v286_v30  ;;  %v283_v23 = vsel %vm273_vm4, %v280_v6, %v282_v57 }
 0x18c   :  { %v649_v50 = vshll.u32 %v6831_v12, 30  ;;  %v291_v34 = vand.u32 65535, %v287_v63  ;;  %v292_v17 = vshrl.u32 %v287_v63, 16  ;;  %vm537_vm5 = vweird.f32 %v5927_v21 }
 0x18d   :  { %v527_v44 = vmul.f32 %v526_v39, %v522_v48  ;;  %v534_v7 = vmul.f32 %v533_v60, %v522_v48  ;;  %v4575_v51 = vsel %vm1333_vm0, 1.0, %v8417_v38  ;;  %vm539_vm7 = vcmp.lt.s32.totalorder %v538_v52, 2 }
 0x18e   :  { %v650_v37 = vsub.s32 %v646_v25, %v649_v50  ;;  %v294_v5 = vmul.u32 %v292_v17, %v289_v40  ;;  %v6853_v3 = vmul.u32 %v291_v34, %v290_v20  ;;  %v314_v48 = vshrl.u32 %v283_v23, 16 }
 0x18f   :  { %v528_v32 = vadd.f32 1.0, %v527_v44  ;;  %v535_v61 = vadd.f32 1.0, %v534_v7  ;;  %vm540_vm8 = vcmp.eq.s32.totalorder %v538_v52, 0  ;;  %vm543_vm10 = vcmp.eq.s32.totalorder %v538_v52, 2 }
 0x190   :  { %vm651_vm6 = vcmp.lt.s32.totalorder %v650_v37, 0  ;;  %v652_v15 = vsub.s32 0, %v650_v37  ;;  %v297_v19 = vshll.u32 %v294_v5, 16  ;;  %v293_v56 = vmul.u32 %v291_v34, %v289_v40 }
 0x191   :  { %v536_v29 = vmul.f32 %v535_v61, %v520_v24  ;;  %v544_v36 = vxor.u32 2147483648, %v528_v32  ;;  %v313_v43 = vand.u32 65535, %v283_v23  ;;  %v642_v25 = vadd.s32 %v6779_v8, %v6777_v46 }
 0x192   :  { %v653_v22 = vsel %vm651_vm6, %v652_v15, %v650_v37  ;;  %v296_v16 = vmul.u32 %v292_v17, %v290_v20  ;;  %v299_v6 = vshll.u32 %v6853_v3, 16  ;;  %vm301_vm11 = vc.u32 %v293_v56, %v297_v19 }
 0x193   :  { %v541_v1 = vxor.u32 2147483648, %v536_v29  ;;  %v654_v14 = vclz %v653_v22  ;;  %v303_v57 = vadd.s32 %v297_v19, %v293_v56  ;;  %v316_v30 = vmul.u32 %v314_v48, %v289_v40 }
 0x194   :  { %v545_v24 = vsel %vm543_vm10, %v544_v36, %v536_v29  ;;  %v302_v63 = vsel %vm301_vm11, 1, %v5696_v45  ;;  %v317_v44 = vmul.u32 %v313_v43, %v290_v20  ;;  %v298_v36 = vshrl.u32 %v294_v5, 16 }
 0x195   :  { %v542_v39 = vsel %vm540_vm8, %v528_v32, %v541_v1  ;;  %v4560_v60 = vadd.s32 4294967294, %v654_v14  ;;  %v304_v34 = vadd.s32 %v302_v63, %v296_v16  ;;  %vm305_vm12 = vc.u32 %v303_v57, %v299_v6 }
 0x196   :  { %v546_v50 = vsel %vm539_vm7, %v542_v39, %v545_v24  ;;  %v306_v8 = vsel %vm305_vm12, 1, %v5696_v45  ;;  %v319_v7 = vshll.u32 %v316_v30, 16  ;;  %v315_v32 = vmul.u32 %v313_v43, %v289_v40 }
 0x197   :  { %v547_v46 = vsel %vm537_vm5, nan, %v546_v50  ;;  %vm4561_vm9 = vcmp.lt.s32.totalorder %v4560_v60, 0  ;;  %v308_v61 = vadd.s32 %v306_v8, %v304_v34  ;;  %v318_v19 = vmul.u32 %v314_v48, %v290_v20 }
 0x198   :  { %v1319_v23 = vadd.f32 1.0, %v547_v46  ;;  %v657_v17 = vsel %vm4561_vm9, 0, %v4560_v60  ;;  %v321_v56 = vshll.u32 %v317_v44, 16  ;;  %vm323_vm0 = vc.u32 %v315_v32, %v319_v7 }
 0x199   :  { %v658_v15 = vsub.s32 32, %v657_v17  ;;  %v662_v29 = vsub.s32 4294967266, %v657_v17  ;;  %v659_v22 = vshll.u32 %v650_v37, %v657_v17  ;;  %v324_v21 = vsel %vm323_vm0, 1, %v5696_v45  ;;  %v6874_v37 = vld [vmem:[%s8229_s2 + $0x8] sm:$0xff] }
 0x19a   :  { %v1326_v52 = vmul.f32 0.5, %v1319_v23  ;;  %v325_v16 = vadd.s32 %v319_v7, %v315_v32  ;;  %v256_v57 = vshrl.u32 %v8402_v31, %v6775_v58  ;;  %v309_v39 = vadd.s32 %v308_v61, %v298_v36 }
 0x19b   :  { %v660_v1 = vshrl.u32 %v642_v25, %v658_v15  ;;  %v663_v14 = vadd.s32 127, %v662_v29  ;;  %v326_v40 = vadd.s32 %v324_v21, %v318_v19  ;;  %v277_v20 = vsel %vm275_vm13, %v6812_v53, 2102212464 }
 0x19c   :  { %v6864_v6 = vmul.f32 %v4575_v51, %v1326_v52  ;;  %vm327_vm5 = vc.u32 %v325_v16, %v321_v56  ;;  %v300_v31 = vshrl.u32 %v6853_v3, 16  ;;  %v320_v48 = vshrl.u32 %v316_v30, 16 }
 0x19d   :  { %v661_v43 = vor.u32 %v660_v1, %v659_v22  ;;  %v664_v24 = vshll.u32 %v663_v14, 23  ;;  %v328_v58 = vsel %vm327_vm5, 1, %v5696_v45  ;;  %v276_v53 = vsel %vm272_vm14, %v256_v57, %v6817_v28 }
 0x19e   :  { %v6878_v51 = vmul.f32 %v6874_v37, %v6864_v6  ;;  %v330_v25 = vadd.s32 %v328_v58, %v326_v40  ;;  %v278_v60 = vsel %vm274_vm3, %v6810_v10, %v277_v20  ;;  %v310_v63 = vadd.s32 %v309_v39, %v300_v31 }
 0x19f   :  { %v665_v5 = vor.u32 4788187, %v664_v24  ;;  %v668_v34 = vcvt.s32.f32 %v661_v43  ;;  %v322_v46 = vshrl.u32 %v317_v44, 16  ;;  %v329_v8 = vadd.s32 %v325_v16, %v321_v56 }
 0x1a0   :  { %1591 = vperm.xlu1 %5377, %v6878_v51   ;;  %v331_v3 = vadd.s32 %v330_v25, %v320_v48  ;;  %v279_v30 = vsel %vm273_vm4, %v276_v53, %v278_v60  ;;  %vm550_vm14 = vcmp.lt.s32.totalorder %v5920_v13, 0  ;;  %vm6895_vm3 = vcmp.le.f32.partialorder %v548_v59, 0.7853982 }
 0x1a1   :  { %v666_v50 = vand.u32 2147483647, %v665_v5  ;;  %vm335_vm13 = vc.u32 %v310_v63, %v329_v8  ;;  %v333_v28 = vmul.u32 %v6829_v62, %v279_v30  ;;  %v5698_v32 = vmov 2  }
 0x1a2   :  { %v332_v23 = vadd.s32 %v331_v3, %v322_v46  ;;  %5383 = vset.pattern.permute.xlu0 %v5698_v32  ;;  %v672_v36 = vsub.s32 4, %v6831_v12  ;;  %v334_v3 = vadd.s32 %v329_v8, %v310_v63  ;;  %vm691_vm11 = vweird.f32 %v5920_v13 }
 0x1a3   :  { %v669_v7 = vmul.f32 %v668_v34, %v666_v50  ;;  %1646 = vperm.xlu0 %5383, %v6405_v11   ;;  %vm242_vm9 = vcmp.lt.s32.totalorder %v8428_v33, 0  ;;  %vm6939_vm0 = vcmp.le.f32.partialorder %v240_v49, 0.7853982 }
 0x1a4   :  { %v336_v61 = vadd.s32 1, %v332_v23  ;;  %v673_v21 = vsel %vm550_vm14, %v672_v36, %v6831_v12 }
 0x1a5   :  { %v670_v17 = vxor.u32 2147483648, %v669_v7  ;;  %v675_v24 = vsel %vm6895_vm3, 0, %v673_v21 }
 0x1a6   :  { %v337_v26 = vsel %vm335_vm13, %v336_v61, %v332_v23  ;;  %v692_v53 = vand.u32 3, %v675_v24 }
 0x1a7   :  { %v671_v44 = vsel %vm550_vm14, %v670_v17, %v669_v7  ;;  %v338_v62 = vadd.s32 %v337_v26, %v333_v28 }
 0x1a8   :  { %v674_v15 = vsel %vm6895_vm3, %v5920_v13, %v671_v44  ;;  %5381 = vset.pattern.permute.xlu1 %v5696_v45  ;;  %vm693_vm7 = vcmp.lt.s32.totalorder %v692_v53, 2  ;;  %vm694_vm8 = vcmp.eq.s32.totalorder %v692_v53, 0  ;;  %vm697_vm10 = vcmp.eq.s32.totalorder %v692_v53, 2 }
 0x1a9   :  { %v676_v59 = vmul.f32 %v674_v15, %v674_v15  ;;  %1566 = vperm.xlu1 %5381, %v6761_v47   ;;  %v339_v29 = vadd.s32 536870912, %v338_v62  ;;  %vm383_vm3 = vweird.f32 %v8428_v33 }
 0x1ab   :  { %v677_v19 = vmul.f32 -0.001358992, %v676_v59  ;;  %v684_v52 = vmul.f32 -0.00019511016, %v676_v59  ;;  %v6909_v22 = vshrl.u32 %v339_v29, 30 }
 0x1ad   :  { %v678_v56 = vadd.f32 0.041655596, %v677_v19  ;;  %v685_v1 = vadd.f32 0.008332121, %v684_v52  ;;  %v341_v14 = vshll.u32 %v6909_v22, 30 }
 0x1af   :  { %v679_v16 = vmul.f32 %v678_v56, %v676_v59  ;;  %v686_v57 = vmul.f32 %v685_v1, %v676_v59  ;;  %v342_v39 = vsub.s32 %v338_v62, %v341_v14  ;;  %v6929_v1 = vld [vmem:[%s8229_s2 + $0x10] sm:$0xff] }
 0x1b1   :  { %v680_v40 = vadd.f32 -0.4999988, %v679_v16  ;;  %v687_v43 = vadd.f32 -0.16666654, %v686_v57  ;;  %1561 = vperm.xlu1 %5381, %v6604_v35   ;;  %vm343_vm4 = vcmp.lt.s32.totalorder %v342_v39, 0  ;;  %v344_v20 = vsub.s32 0, %v342_v39 }
 0x1b3   :  { %v681_v31 = vmul.f32 %v680_v40, %v676_v59  ;;  %v688_v58 = vmul.f32 %v687_v43, %v676_v59  ;;  %v345_v5 = vsel %vm343_vm4, %v344_v20, %v342_v39  ;;  %v8432_v59 = vld [vmem:[#allocation17_spill] sm:$0xff]  ;;  %v364_v20 = vsub.s32 4, %v6909_v22 }
 0x1b4   :  { %v346_v60 = vclz %v345_v5  ;;  %vm1334_vm12 = vcmp.lt.f32.partialorder %v8432_v59, 5.0 }
 0x1b5   :  { %v682_v48 = vadd.f32 1.0, %v681_v31  ;;  %v689_v25 = vadd.f32 1.0, %v688_v58  ;;  %v4576_v63 = vsel %vm1334_vm12, 1.0, %v8417_v38  ;;  %v365_v49 = vsel %vm242_vm9, %v364_v20, %v6909_v22  ;;  %v6995_v20 = vld [vmem:[%s8229_s2 + $0x28] sm:$0xff] }
 0x1b6   :  { %v4554_v34 = vadd.s32 4294967294, %v346_v60  ;;  %v6953_v60 = vld [vmem:[%s8229_s2 + $0x30] sm:$0xff] }
 0x1b7   :  { %v690_v12 = vmul.f32 %v689_v25, %v674_v15  ;;  %v698_v50 = vxor.u32 2147483648, %v682_v48 }
 0x1b8   :  { %vm4555_vm6 = vcmp.lt.s32.totalorder %v4554_v34, 0 }
 0x1b9   :  { %v695_v46 = vxor.u32 2147483648, %v690_v12  ;;  %1551 = vperm.xlu1 %5381, %v6878_v51   ;;  %v349_v7 = vsel %vm4555_vm6, 0, %v4554_v34  ;;  %v699_v23 = vsel %vm697_vm10, %v698_v50, %v690_v12 }
 0x1ba   :  { %v350_v17 = vsub.s32 32, %v349_v7  ;;  %v354_v61 = vsub.s32 4294967266, %v349_v7  ;;  %v351_v44 = vshll.u32 %v342_v39, %v349_v7 }
 0x1bb   :  { %v696_v30 = vsel %vm694_vm8, %v682_v48, %v695_v46 }
 0x1bc   :  { %v700_v28 = vsel %vm693_vm7, %v696_v30, %v699_v23  ;;  %v352_v26 = vshrl.u32 %v334_v3, %v350_v17  ;;  %v355_v15 = vadd.s32 127, %v354_v61  ;;  %vm1668_vm7 = vcmask 457728  }
 0x1bd   :  { %v701_v10 = vsel %vm691_vm11, nan, %v700_v28 }
 0x1be   :  { %v1320_v62 = vadd.f32 1.0, %v701_v10  ;;  %v353_v29 = vor.u32 %v352_v26, %v351_v44  ;;  %v356_v36 = vshll.u32 %v355_v15, 23  ;;  %v8436_v44 = vld [vmem:[#allocation16_spill] sm:$0xff]  ;;  %v6964_v26 = vld [vmem:[%s8235_s8 + $0x5] ss:$0 sm:$0xff]  ;;  %v1790_v15 = vpop.f32.mrf.mxu0 }
 0x1bf   :  { %vm1332_vm4 = vcmp.lt.f32.partialorder %v8436_v44, 5.0 }
 0x1c0   :  { %v1327_v19 = vmul.f32 0.5, %v1320_v62  ;;  %v357_v8 = vor.u32 4788187, %v356_v36  ;;  %v360_v56 = vcvt.s32.f32 %v353_v29  ;;  %v4574_v29 = vsel %vm1332_vm4, 1.0, %v8417_v38 }
 0x1c1   :  { %5385 = vset.pattern.permute.xlu1 %v5698_v32  ;;  %v6968_v36 = vadd.f32 %v6964_v26, %v1790_v15 }
 0x1c2   :  { %v6923_v52 = vmul.f32 %v4576_v63, %v1327_v19  ;;  %1642 = vperm.xlu1 %5385, %v6468_v0   ;;  %v358_v13 = vand.u32 2147483647, %v357_v8  ;;  %v8437_v19 = vmov 1   ;;  %v6978_v8 = vld [vmem:[%s8229_s2] sm:$0xff]  ;;  %v6982_v0 = vpop.f32.mrf.mxu1 }
 0x1c3   :  { %v1824_v63 = vand.u32 2147483647, %v6968_v36 }
 0x1c4   :  { %8433 = vst [vmem:[#allocation19_spill] sm:$0xff] %v6923_v52  ;;  %v6933_v14 = vmul.f32 %v6929_v1, %v6923_v52  ;;  %v361_v21 = vmul.f32 %v360_v56, %v358_v13 }
 0x1c5   :  { %v1838_v38 = vsub.f32 0.0, %v1824_v63 }
 0x1c6   :  { %1595 = vperm.xlu2 %5378, %v6933_v14   ;;  %v362_v16 = vxor.u32 2147483648, %v361_v21 }
 0x1c7   :  { %v1853_v56 = vmul.f32 1.442695, %v1838_v38 }
 0x1c8   :  { %v363_v57 = vsel %vm242_vm9, %v362_v16, %v361_v21  ;;  %v1792_v21 = vpop.f32.mrf.mxu0  ;;  %v5255_v16 = vld [vmem:[#allocation2 + $0x1b8] sm:$0xff] }
 0x1c9   :  { %v366_v39 = vsel %vm6939_vm0, %v8428_v33, %v363_v57  ;;  %v6985_v57 = vadd.f32 %v6964_v26, %v1792_v21  ;;  %2126 = vmatpush.bf16.msrb.mxu1 %v5255_v16  ;;  %5464 = vpow2.f32 %v1853_v56  ;;  %v5248_v56 = vld [vmem:[#allocation2 + $0x180] sm:$0xff]  ;;  %v1810_v21 = vmax.f32 %v6968_v36, 0.0 }
 0x1ca   :  { %1634 = vperm.xlu1 %5385, %v6604_v35   ;;  %v368_v40 = vmul.f32 %v366_v39, %v366_v39  ;;  %v367_v35 = vsel %vm6939_vm0, 0, %v365_v49 }
 0x1cb   :  { %v384_v3 = vand.u32 3, %v367_v35  ;;  %v1812_v16 = vmax.f32 %v6985_v57, 0.0 }
 0x1cc   :  { %v369_v43 = vmul.f32 -0.001358992, %v368_v40  ;;  %v376_v24 = vmul.f32 -0.00019511016, %v368_v40 }
 0x1cd   :  { %vm386_vm5 = vcmp.eq.s32.totalorder %v384_v3, 0  ;;  %vm389_vm13 = vcmp.eq.s32.totalorder %v384_v3, 2  ;;  %vm385_vm14 = vcmp.lt.s32.totalorder %v384_v3, 2 }
 0x1ce   :  { %v370_v31 = vadd.f32 0.041655596, %v369_v43  ;;  %v377_v58 = vadd.f32 0.008332121, %v376_v24 }
 0x1d0   :  { %v371_v5 = vmul.f32 %v370_v31, %v368_v40  ;;  %v378_v48 = vmul.f32 %v377_v58, %v368_v40  ;;  %v1795_v31 = vpop.f32.mrf.mxu0  ;;  %v5253_v58 = vld [vmem:[#allocation2 + $0x1a8] sm:$0xff] }
 0x1d1   :  { %v7001_v49 = vadd.f32 %v6964_v26, %v1795_v31 }
 0x1d2   :  { %5386 = vset.pattern.permute.xlu1 %v5696_v45  ;;  %v372_v25 = vadd.f32 -0.4999988, %v371_v5  ;;  %v379_v53 = vadd.f32 -0.16666654, %v378_v48  ;;  %v6998_v5 = vpop.f32.mrf.mxu1  ;;  %v5465_v48 = vpop.eup %5464 }
 0x1d3   :  { %2399 = vperm.xlu1 %5386, %v6953_v60  }
 0x1d4   :  { %v373_v12 = vmul.f32 %v372_v25, %v368_v40  ;;  %v380_v50 = vmul.f32 %v379_v53, %v368_v40  ;;  %v1826_v40 = vand.u32 2147483647, %v6985_v57  ;;  %v5252_v25 = vld [vmem:[#allocation2 + $0x1a0] sm:$0xff]  ;;  %v1828_v53 = vand.u32 2147483647, %v7001_v49 }
 0x1d6   :  { %v374_v34 = vadd.f32 1.0, %v373_v12  ;;  %v381_v46 = vadd.f32 1.0, %v380_v50  ;;  %v1840_v43 = vsub.f32 0.0, %v1826_v40 }
 0x1d8   :  { %v382_v22 = vmul.f32 %v381_v46, %v366_v39  ;;  %v390_v7 = vxor.u32 2147483648, %v374_v34  ;;  %v5254_v39 = vld [vmem:[#allocation2 + $0x1b0] sm:$0xff]  ;;  %v1857_v24 = vmul.f32 1.442695, %v1840_v43  ;;  %v1797_v50 = vpop.f32.mrf.mxu0  ;;  %v7026_v43 = vld [vmem:[%s8229_s2 + $0x18] sm:$0xff] }
 0x1d9   :  { %2127 = vmatpush.bf16.msrb.mxu1 %v5254_v39  ;;  %v7010_v3 = vadd.f32 %v6964_v26, %v1797_v50 }
 0x1da   :  { %v387_v30 = vxor.u32 2147483648, %v382_v22  ;;  %v391_v17 = vsel %vm389_vm13, %v390_v7, %v382_v22  ;;  %5466 = vpow2.f32 %v1857_v24  ;;  %v7007_v46 = vpop.f32.mrf.mxu1  ;;  %v1842_v22 = vsub.f32 0.0, %v1828_v53  ;;  %v5250_v7 = vld [vmem:[#allocation2 + $0x190] sm:$0xff] }
 0x1db   :  { %2389 = vperm.xlu1 %5386, %v6757_v54  }
 0x1dc   :  { %v388_v23 = vsel %vm386_vm5, %v374_v34, %v387_v30  ;;  %v5251_v34 = vld [vmem:[#allocation2 + $0x198] sm:$0xff]  ;;  %v1830_v30 = vand.u32 2147483647, %v7010_v3 }
 0x1dd   :  { %v392_v61 = vsel %vm385_vm14, %v388_v23, %v391_v17  ;;  %2128 = vmatpush.bf16.msrb.mxu1 %v5253_v58 }
 0x1de   :  { %v393_v28 = vsel %vm383_vm3, nan, %v392_v61  ;;  %v1844_v23 = vsub.f32 0.0, %v1830_v30  ;;  %v1861_v61 = vmul.f32 1.442695, %v1842_v22 }
 0x1df   :  { %v1318_v10 = vadd.f32 1.0, %v393_v28 }
 0x1e0   :  { %v5467_v35 = vpop.eup %5466  ;;  %v1865_v28 = vmul.f32 1.442695, %v1844_v23  ;;  %v1800_v15 = vpop.f32.mrf.mxu0 }
 0x1e1   :  { %v1325_v62 = vmul.f32 0.5, %v1318_v10  ;;  %2129 = vmatpush.bf16.msrb.mxu1 %v5252_v25  ;;  %v1882_v12 = vadd.f32 1.0, %v5467_v35  ;;  %v7020_v39 = vadd.f32 %v6964_v26, %v1800_v15  ;;  %v1814_v15 = vmax.f32 %v7001_v49, 0.0 }
 0x1e3   :  { %5388 = vset.pattern.permute.xlu1 %v8437_v19  ;;  %v6971_v33 = vmul.f32 %v4574_v29, %v1325_v62  ;;  %v5249_v62 = vld [vmem:[#allocation2 + $0x188] sm:$0xff]  ;;  %v7015_v29 = vpop.f32.mrf.mxu1  ;;  %v1832_v36 = vand.u32 2147483647, %v7020_v39 }
 0x1e4   :  { %2426 = vperm.xlu1 %5388, %v6757_v54  }
 0x1e5   :  { %v1388_v13 = vmul.f32 %v6978_v8, %v6971_v33  ;;  %2130 = vmatpush.bf16.msrb.mxu1 %v5251_v34  ;;  %v1846_v35 = vsub.f32 0.0, %v1832_v36 }
 0x1e7   :  { %1587 = vperm.xlu2 %5378, %v1388_v13   ;;  %1622 = vperm.xlu0 %5383, %v1388_v13  }
 0x1e8   :  { %v1802_v24 = vpop.f32.mrf.mxu0 }
 0x1e9   :  { %2131 = vmatpush.bf16.msrb.mxu1 %v5250_v7 }
 0x1ec   :  { %5389 = vset.pattern.permute.xlu1 %v5698_v32 }
 0x1ed   :  { %2468 = vperm.xlu1 %5389, %v6757_v54   ;;  %2132 = vmatpush.bf16.msrb.mxu1 %v5249_v62  ;;  %v1816_v62 = vmax.f32 %v7010_v3, 0.0 }
 0x1ef   :  { %5380 = vset.pattern.permute.xlu2 %v5696_v45  ;;  %2472 = vperm.xlu0 %5383, %v6995_v20  }
 0x1f0   :  { %1576 = vperm.xlu2 %5380, %v6405_v11   ;;  %v1880_v11 = vadd.f32 1.0, %v5465_v48  ;;  %v7033_v48 = vadd.f32 %v6964_v26, %v1802_v24  ;;  %v1805_v30 = vpop.f32.mrf.mxu0 }
 0x1f1   :  { %2133 = vmatpush.bf16.msrb.mxu1 %v5248_v56 }
 0x1f2   :  { %5468 = vlog2.f32 %v1880_v11  ;;  %v7035_v11 = vpop.f32.mrf.mxu1 }
 0x1f3   :  { %5470 = vlog2.f32 %v1882_v12  ;;  %v1834_v12 = vand.u32 2147483647, %v7033_v48 }
 0x1f4   :  { %5472 = vpow2.f32 %v1861_v61 }
 0x1f5   :  { %5391 = vset.pattern.permute.xlu1 %v5696_v45  ;;  %5474 = vpow2.f32 %v1865_v28  ;;  %v1848_v22 = vsub.f32 0.0, %v1834_v12 }
 0x1f6   :  { %2379 = vperm.xlu1 %5391, %v6929_v1  }
 0x1f7   :  { %v1873_v7 = vmul.f32 1.442695, %v1848_v22 }
 0x1f8   :  { %1556 = vperm.xlu2 %5380, %v6933_v14   ;;  %v5469_v17 = vpop.eup %5468  ;;  %v1807_v28 = vpop.f32.mrf.mxu0 }
 0x1f9   :  { %v5471_v10 = vpop.eup %5470  ;;  %v1896_v63 = vmul.f32 0.6931472, %v5469_v17  ;;  %v1820_v28 = vmax.f32 %v7033_v48, 0.0 }
 0x1fa   :  { %v1900_v38 = vmul.f32 0.6931472, %v5471_v10  ;;  %v5473_v57 = vpop.eup %5472  ;;  %v7040_v23 = vpop.f32.mrf.mxu1 }
 0x1fb   :  { %v5475_v31 = vpop.eup %5474  ;;  %v1884_v53 = vadd.f32 1.0, %v5473_v57  ;;  %v7049_v57 = vpop.permute.xlu2 %1603 }
 0x1fc   :  { %v1924_v40 = vadd.f32 %v1900_v38, %v1812_v16  ;;  %v1886_v34 = vadd.f32 1.0, %v5475_v31  ;;  %8439 = vst [vmem:[#allocation16_spill] sm:$0xff] %v7049_v57 }
 0x1fd   :  { %5476 = vlog2.f32 %v1884_v53  ;;  %v7058_v53 = vpop.permute.xlu0 %1607 }
 0x1fe   :  { %5393 = vset.pattern.permute.xlu1 %v8437_v19  ;;  %v4651_v25 = vadd.f32 -0.6931472, %v1924_v40  ;;  %5478 = vlog2.f32 %v1886_v34  ;;  %8440 = vst [vmem:[#allocation29_spill] sm:$0xff] %v7058_v53  ;;  %v1619_v22 = vmul.f32 %v7058_v53, %v7040_v23 }
 0x1ff   :  { %2418 = vperm.xlu1 %5393, %v6929_v1  }
 0x200   :  { %1546 = vperm.xlu2 %5380, %v1388_v13   ;;  %v1922_v13 = vadd.f32 %v1896_v63, %v1810_v21 }
 0x202   :  { %v4649_v58 = vadd.f32 -0.6931472, %v1922_v13  ;;  %v7045_v56 = vpop.f32.mrf.mxu1  ;;  %v7047_v13 = vpop.permute.xlu1 %1611 }
 0x203   :  { %v5477_v17 = vpop.eup %5476  ;;  %8438 = vst [vmem:[#allocation17_spill] sm:$0xff] %v7047_v13  ;;  %v1620_v3 = vmul.f32 %v7047_v13, %v7045_v56 }
 0x204   :  { %v2073_v50 = vpack.c.bf16 %v4651_v25, %v4649_v58  ;;  %v5479_v61 = vpop.eup %5478  ;;  %v1904_v63 = vmul.f32 0.6931472, %v5477_v17 }
 0x205   :  { %v1908_v38 = vmul.f32 0.6931472, %v5479_v61  ;;  %v1818_v61 = vmax.f32 %v7020_v39, 0.0  ;;  %v7081_v39 = vmul.f32 3.0, %v6953_v60 }
 0x206   :  { %2134 = vmatmul.bf16.vlgmr.msrb.gmra.mxu1 %v2073_v50  ;;  %v1926_v21 = vadd.f32 %v1904_v63, %v1814_v15 }
 0x207   :  { %5395 = vset.pattern.permute.xlu1 %v5698_v32  ;;  %v1928_v16 = vadd.f32 %v1908_v38, %v1816_v62 }
 0x208   :  { %2464 = vperm.xlu1 %5395, %v7026_v43   ;;  %5384 = vset.pattern.permute.xlu2 %v5698_v32  ;;  %v4653_v24 = vadd.f32 -0.6931472, %v1926_v21 }
 0x209   :  { %1638 = vperm.xlu2 %5384, %v6761_v47   ;;  %v1869_v47 = vmul.f32 1.442695, %v1846_v35  ;;  %v4655_v49 = vadd.f32 -0.6931472, %v1928_v16  ;;  %v1666_v35 = vpack.c.bf16 %v1620_v3, %v1620_v3 }
 0x20a   :  { %v1542_v25 = vpop.f32.mrf.mxu1  ;;  %v7061_v50 = vpop.permute.xlu1 %1599 }
 0x20b   :  { %5480 = vpow2.f32 %v1869_v47  ;;  %v2074_v31 = vpack.c.bf16 %v4655_v49, %v4653_v24  ;;  %8441 = vst [vmem:[#allocation30_spill] sm:$0xff] %v7061_v50  ;;  %v1617_v17 = vmul.f32 %v7061_v50, %v7015_v29 }
 0x20c   :  { %5482 = vpow2.f32 %v1873_v7 }
 0x210   :  { %5397 = vset.pattern.permute.xlu1 %v5696_v45 }
 0x211   :  { %1630 = vperm.xlu2 %5384, %v6933_v14   ;;  %v5481_v10 = vpop.eup %5480 }
 0x212   :  { %v5483_v14 = vpop.eup %5482  ;;  %v1888_v40 = vadd.f32 1.0, %v5481_v10 }
 0x213   :  { %v1890_v36 = vadd.f32 1.0, %v5483_v14 }
 0x214   :  { %5484 = vlog2.f32 %v1888_v40  ;;  %v7078_v40 = vmul.f32 3.0, %v6995_v20 }
 0x215   :  { %5486 = vlog2.f32 %v1890_v36 }
 0x216   :  { %2139 = vmatmul.bf16.gmra.mxu1 %v2074_v31  ;;  %2527 = vperm.xlu1 %5397, %v7078_v40   ;;  %v7086_v31 = vpop.permute.xlu1 %1591 }
 0x217   :  { %2640 = vperm.xlu0 %5383, %v7078_v40   ;;  %8443 = vst [vmem:[#allocation32_spill] sm:$0xff] %v7086_v31 }
 0x219   :  { %1626 = vperm.xlu2 %5384, %v6878_v51   ;;  %v7052_v51 = vadd.f32 %v6964_v26, %v1805_v30  ;;  %v1676_v26 = vsel %vm1512_vm15, %v1666_v35, 0  ;;  %v1618_v30 = vmul.f32 %v7049_v57, %v7035_v11  ;;  %v1615_v35 = vmul.f32 %v7086_v31, %v6998_v5 }
 0x21a   :  { %v5485_v34 = vpop.eup %5484  ;;  %1698 = vmatpush.bf16.msra.mxu3 %v1676_v26 }
 0x21b   :  { %v1836_v58 = vand.u32 2147483647, %v7052_v51  ;;  %v5487_v47 = vpop.eup %5486  ;;  %v1912_v62 = vmul.f32 0.6931472, %v5485_v34  ;;  %v1663_v38 = vpack.c.bf16 %v1619_v22, %v1618_v30  ;;  %v1822_v34 = vmax.f32 %v7052_v51, 0.0 }
 0x21c   :  { %v1916_v63 = vmul.f32 0.6931472, %v5487_v47  ;;  %v4634_v51 = vld [vmem:[%s8234_s7] sm:$0xf] }
 0x21d   :  { %v1850_v12 = vsub.f32 0.0, %v1836_v58  ;;  %v1930_v14 = vadd.f32 %v1912_v62, %v1818_v61  ;;  %v7093_v58 = vmul.f32 3.0, %v6757_v54 }
 0x21e   :  { %v1932_v21 = vadd.f32 %v1916_v63, %v1820_v28  ;;  %1699 = vmatpush.bf16.msra.mxu3 %v1663_v38  ;;  %2374 = vperm.xlu1 %5397, %v6874_v37   ;;  %v7095_v25 = vpop.permute.xlu1 %1566  ;;  %v5239_v28 = vld [vmem:[%s8234_s7 + $0x4] sm:$0xf0]  ;;  %v7124_v63 = vpop.permute.xlu0 %1571 }
 0x21f   :  { %v1877_v10 = vmul.f32 1.442695, %v1850_v12  ;;  %v4657_v48 = vadd.f32 -0.6931472, %v1930_v14  ;;  %5407 = vset.pattern.permute.xlu0 %v5696_v45  ;;  %8444 = vst [vmem:[#allocation33_spill] sm:$0xff] %v7095_v25 }
 0x220   :  { %v7065_v7 = vpop.permute.xlu2 %1595  ;;  %v4659_v36 = vadd.f32 -0.6931472, %v1932_v21  ;;  %8447 = vst [vmem:[#allocation36_spill] sm:$0xff] %v7124_v63  ;;  %v1583_v21 = vmul.f32 %v7095_v25, %v7035_v11 }
 0x221   :  { %2476 = vperm.xlu2 %5384, %v6953_v60   ;;  %8442 = vst [vmem:[#allocation31_spill] sm:$0xff] %v7065_v7  ;;  %v1616_v15 = vmul.f32 %v7065_v7, %v7007_v46  ;;  %5488 = vpow2.f32 %v1877_v10  ;;  %v4635_v10 = vor.u32 %v5239_v28, %v4634_v51  ;;  %v7161_v51 = vmul.f32 3.0, %v6929_v1 }
 0x222   :  { %v2075_v24 = vpack.c.bf16 %v4659_v36, %v4657_v48  ;;  %v1584_v48 = vmul.f32 %v7124_v63, %v7040_v23 }
 0x223   :  { %v1660_v16 = vpack.c.bf16 %v1617_v17, %v1616_v15  ;;  %v7111_v17 = vld [vmem:[%s8231_s4] sm:$0xf] }
 0x225   :  { %1700 = vmatpush.bf16.msra.mxu3 %v1660_v16 }
 0x226   :  { %2144 = vmatmul.bf16.gmra.mxu1 %v2075_v24  ;;  %5399 = vset.pattern.permute.xlu1 %v5698_v32  ;;  %v7122_v62 = vpop.permute.xlu1 %1561  ;;  %v1662_v24 = vpack.c.bf16 %v1584_v48, %v1583_v21 }
 0x227   :  { %v5489_v49 = vpop.eup %5488  ;;  %2636 = vperm.xlu1 %5399, %v7093_v58   ;;  %8446 = vst [vmem:[#allocation35_spill] sm:$0xff] %v7122_v62 }
 0x228   :  { %v1892_v3 = vadd.f32 1.0, %v5489_v49  ;;  %v7139_v49 = vmul.f32 3.0, %v7026_v43 }
 0x229   :  { %5387 = vset.pattern.permute.xlu2 %v5696_v45 }
 0x22a   :  { %2394 = vperm.xlu2 %5387, %v6995_v20   ;;  %5490 = vlog2.f32 %v1892_v3  ;;  %v1582_v3 = vmul.f32 %v7122_v62, %v7015_v29 }
 0x22f   :  { %2456 = vperm.xlu1 %5399, %v6874_v37  }
 0x230   :  { %v5491_v12 = vpop.eup %5490 }
 0x231   :  { %v1920_v47 = vmul.f32 0.6931472, %v5491_v12 }
 0x232   :  { %2532 = vperm.xlu2 %5387, %v7081_v39  }
 0x233   :  { %v1934_v30 = vadd.f32 %v1920_v47, %v1822_v34  ;;  %v7148_v34 = vpop.permute.xlu1 %1551 }
 0x234   :  { %8450 = vst [vmem:[#allocation39_spill] sm:$0xff] %v7148_v34 }
 0x235   :  { %v4661_v61 = vadd.f32 -0.6931472, %v1934_v30  ;;  %v8452_v30 = vld [vmem:[#allocation21_spill] sm:$0xff] }
 0x237   :  { %v2076_v15 = vpack.c.bf16 %v4661_v61, %v4661_v61  ;;  %5402 = vset.pattern.permute.xlu1 %v5696_v45  ;;  %v1580_v61 = vmul.f32 %v7148_v34, %v6998_v5 }
 0x238   :  { %2517 = vperm.xlu1 %5402, %v7139_v49  }
 0x239   :  { %2149 = vmatmul.bf16.gmra.mxu1 %v2076_v15 }
 0x23a   :  { %5390 = vset.pattern.permute.xlu2 %v5698_v32 }
 0x23b   :  { %2644 = vperm.xlu2 %5390, %v7081_v39  }
 0x240   :  { %5404 = vset.pattern.permute.xlu1 %v5698_v32 }
 0x241   :  { %v7101_v26 = vpop.permute.xlu2 %1587  ;;  %2628 = vperm.xlu1 %5404, %v7161_v51  }
 0x242   :  { %8445 = vst [vmem:[#allocation34_spill] sm:$0xff] %v7101_v26  ;;  %v1614_v22 = vmul.f32 %v7101_v26, %v6982_v0 }
 0x243   :  { %5392 = vset.pattern.permute.xlu2 %v5696_v45 }
 0x244   :  { %2384 = vperm.xlu2 %5392, %v7026_v43   ;;  %v1657_v54 = vpack.c.bf16 %v1615_v35, %v1614_v22  ;;  %v7150_v22 = vpop.permute.xlu0 %1646 }
 0x245   :  { %8451 = vst [vmem:[#allocation40_spill] sm:$0xff] %v7150_v22 }
 0x246   :  { %1701 = vmatpush.bf16.msra.mxu3 %v1657_v54  ;;  %v1655_v54 = vmul.f32 %v7150_v22, %v7045_v56 }
 0x249   :  { %4630 = vmatmul.msk.bf16.vlgmr.msra.gmra.mxu3 %vm1668_vm7, %v7111_v17  ;;  %5406 = vset.pattern.permute.xlu1 %v5696_v45 }
 0x24a   :  { %v7126_v38 = vpop.permute.xlu2 %1576  ;;  %1760 = vmatpush.bf16.msrb.mxu3 %v4635_v10  ;;  %v1667_v10 = vpack.c.bf16 %v1655_v54, %v1655_v54 }
 0x24b   :  { %8448 = vst [vmem:[#allocation37_spill] sm:$0xff] %v7126_v38  ;;  %v1585_v14 = vmul.f32 %v7126_v38, %v7045_v56 }
 0x24c   :  { %5394 = vset.pattern.permute.xlu2 %v5698_v32  ;;  %v1679_v21 = vsel %vm1512_vm15, %v1667_v10, 0 }
 0x24d   :  { %2460 = vperm.xlu2 %5394, %v6929_v1   ;;  %v1665_v16 = vpack.c.bf16 %v1585_v14, %v1585_v14  ;;  %v7169_v14 = vpop.permute.xlu1 %1642 }
 0x24e   :  { %8454 = vst [vmem:[#allocation42_spill] sm:$0xff] %v7169_v14  ;;  %v1654_v1 = vmul.f32 %v7169_v14, %v7040_v23  ;;  %v8457_v23 = vld [vmem:[#allocation22_spill] sm:$0xff] }
 0x24f   :  { %v1673_v36 = vsel %vm1512_vm15, %v1665_v16, 0  ;;  %v7178_v16 = vmul.f32 3.0, %v6978_v8 }
 0x250   :  { %1685 = vmatpush.bf16.msra.mxu2 %v1673_v36 }
 0x251   :  { %2502 = vperm.xlu1 %5406, %v7178_v16  }
 0x252   :  { %v7143_v35 = vpop.permute.xlu2 %1556 }
 0x253   :  { %8449 = vst [vmem:[#allocation38_spill] sm:$0xff] %v7143_v35  ;;  %v1581_v12 = vmul.f32 %v7143_v35, %v7007_v46 }
 0x254   :  { %1686 = vmatpush.bf16.msra.mxu2 %v1662_v24 }
 0x255   :  { %5396 = vset.pattern.permute.xlu2 %v5696_v45  ;;  %v1659_v47 = vpack.c.bf16 %v1582_v3, %v1581_v12  ;;  %v7188_v3 = vpop.permute.xlu1 %1634 }
 0x256   :  { %2522 = vperm.xlu2 %5396, %v7093_v58   ;;  %8456 = vst [vmem:[#allocation44_spill] sm:$0xff] %v7188_v3  ;;  %v1652_v12 = vmul.f32 %v7188_v3, %v7015_v29  ;;  %v5261_v29 = vld [vmem:[#allocation2 + $0x68] sm:$0xff] }
 0x258   :  { %1687 = vmatpush.bf16.msra.mxu2 %v1659_v47  ;;  %v5263_v47 = vld [vmem:[#allocation2 + $0x78] sm:$0xff] }
 0x259   :  { %4640 = vmatmul.msk.bf16.vlgmr.msrb.gmra.mxu3 %vm1740_vm2, %v8452_v30  ;;  %5410 = vset.pattern.permute.xlu1 %v8437_v19 }
 0x25a   :  { %v7163_v28 = vpop.permute.xlu2 %1546  ;;  %2226 = vmatpush.bf16.msra.mxu3 %v5263_v47  ;;  %2576 = vperm.xlu1 %5410, %v7139_v49   ;;  %v5257_v47 = vld [vmem:[#allocation2 + $0x48] sm:$0xff] }
 0x25b   :  { %8453 = vst [vmem:[#allocation41_spill] sm:$0xff] %v7163_v28  ;;  %v1579_v15 = vmul.f32 %v7163_v28, %v6982_v0 }
 0x25d   :  { %v1656_v56 = vpack.c.bf16 %v1580_v61, %v1579_v15  ;;  %v5262_v61 = vld [vmem:[#allocation2 + $0x70] sm:$0xff]  ;;  %v7202_v15 = vpop.permute.xlu0 %1622 }
 0x25e   :  { %2369 = vperm.xlu2 %5396, %v6978_v8   ;;  %8459 = vst [vmem:[#allocation46_spill] sm:$0xff] %v7202_v15  ;;  %2227 = vmatpush.bf16.msra.mxu3 %v5262_v61  ;;  %v5247_v61 = vld [vmem:[#allocation2 + $0xb8] sm:$0xff] }
 0x25f   :  { %1688 = vmatpush.bf16.msra.mxu2 %v1656_v56 }
 0x262   :  { %4629 = vmatmul.msk.bf16.vlgmr.msra.gmra.mxu2 %vm1668_vm7, %v7111_v17  ;;  %2228 = vmatpush.bf16.msra.mxu3 %v5261_v29  ;;  %v5243_v29 = vld [vmem:[#allocation2 + $0x98] sm:$0xff] }
 0x263   :  { %1711 = vmatpush.bf16.msrb.mxu2 %v1679_v21  ;;  %v7180_v48 = vpop.permute.xlu2 %1638  ;;  %5412 = vset.pattern.permute.xlu1 %v5698_v32 }
 0x264   :  { %8455 = vst [vmem:[#allocation43_spill] sm:$0xff] %v7180_v48  ;;  %v1653_v36 = vmul.f32 %v7180_v48, %v7035_v11 }
 0x266   :  { %5398 = vset.pattern.permute.xlu2 %v8437_v19  ;;  %v1664_v24 = vpack.c.bf16 %v1654_v1, %v1653_v36  ;;  %v1396_v1 = vmul.f32 3.0, %v6874_v37 }
 0x267   :  { %2414 = vperm.xlu2 %5398, %v6874_v37   ;;  %v51_v37 = vld [vmem:[%s8228_s1] sm:$0xff] }
 0x268   :  { %1712 = vmatpush.bf16.msrb.mxu2 %v1664_v24  ;;  %2624 = vperm.xlu1 %5412, %v1396_v1   ;;  %v5260_v24 = vld [vmem:[#allocation2 + $0x60] sm:$0xff] }
 0x269   :  { %4641 = vmatmul.msk.bf16.gmra.mxu3 %vm1740_vm2, %v8457_v23  ;;  %2507 = vperm.xlu0 %5407, %v1396_v1  }
 0x26a   :  { %2229 = vmatpush.bf16.msra.mxu3 %v5260_v24 }
 0x26b   :  { %v7194_v54 = vpop.permute.xlu2 %1630 }
 0x26c   :  { %8458 = vst [vmem:[#allocation45_spill] sm:$0xff] %v7194_v54  ;;  %v1651_v11 = vmul.f32 %v7194_v54, %v7007_v46  ;;  %v1649_v46 = vmul.f32 %v7202_v15, %v6982_v0  ;;  %v5259_v0 = vld [vmem:[#allocation2 + $0x58] sm:$0xff] }
 0x26e   :  { %v1661_v10 = vpack.c.bf16 %v1652_v12, %v1651_v11  ;;  %v8461_v12 = vld [vmem:[#allocation23_spill] sm:$0xff]  ;;  %2230 = vmatpush.bf16.msra.mxu3 %v5259_v0 }
 0x26f   :  { %5400 = vset.pattern.permute.xlu2 %v5698_v32  ;;  %v5256_v11 = vld [vmem:[#allocation2 + $0x40] sm:$0xff] }
 0x270   :  { %2452 = vperm.xlu2 %5400, %v6978_v8   ;;  %1713 = vmatpush.bf16.msrb.mxu2 %v1661_v10  ;;  %v5246_v10 = vld [vmem:[#allocation2 + $0xb0] sm:$0xff] }
 0x271   :  { %5414 = vset.pattern.permute.xlu1 %v5696_v45  ;;  %5408 = vset.pattern.permute.xlu0 %v8437_v19 }
 0x272   :  { %2934 = vperm.xlu1 %5414, %v51_v37   ;;  %2434 = vperm.xlu0 %5408, %v6953_v60  }
 0x273   :  { %v7204_v56 = vpop.permute.xlu2 %1626 }
 0x274   :  { %8460 = vst [vmem:[#allocation47_spill] sm:$0xff] %v7204_v56  ;;  %v1650_v21 = vmul.f32 %v7204_v56, %v6998_v5  ;;  %v5258_v5 = vld [vmem:[#allocation2 + $0x50] sm:$0xff] }
 0x275   :  { %2231 = vmatpush.bf16.msra.mxu3 %v5258_v5  ;;  %v7266_v5 = vld [vmem:[%s8235_s8] ss:$0 sm:$0xff]  ;;  %v5626_v56 = vld [vmem:[%s8230_s3 + $0x10] sm:$0xff] }
 0x276   :  { %v1658_v36 = vpack.c.bf16 %v1650_v21, %v1649_v46  ;;  %v5242_v46 = vld [vmem:[#allocation2 + $0x90] sm:$0xff] }
 0x278   :  { %5401 = vset.pattern.permute.xlu2 %v5696_v45  ;;  %1714 = vmatpush.bf16.msrb.mxu2 %v1658_v36  ;;  %v8462_v45 = vld [vmem:[#allocation25_spill] sm:$0xff]  ;;  %v5240_v36 = vld [vmem:[#allocation2 + $0x80] sm:$0xff] }
 0x279   :  { %2512 = vperm.xlu2 %5401, %v7161_v51   ;;  %4642 = vmatmul.msk.bf16.gmra.mxu3 %vm1740_vm2, %v8461_v12 }
 0x27a   :  { %2232 = vmatpush.bf16.msra.mxu3 %v5257_v47  ;;  %5415 = vset.pattern.permute.xlu1 %v5698_v32 }
 0x27b   :  { %4631 = vmatmul.msk.bf16.vlgmr.msrb.gmra.mxu2 %vm1668_vm7, %v7111_v17  ;;  %2945 = vperm.xlu1 %5415, %v51_v37  }
 0x27c   :  { %2430 = vperm.xlu0 %5408, %v6995_v20   ;;  %v8464_v20 = vld [vmem:[#allocation8_spill] sm:$0xff]  ;;  %2020 = vmatpush.bf16.msra.mxu2 %v5247_v61 }
 0x27e   :  { %2233 = vmatpush.bf16.msra.mxu3 %v5256_v11 }
 0x280   :  { %2021 = vmatpush.bf16.msra.mxu2 %v5246_v10 }
 0x281   :  { %5403 = vset.pattern.permute.xlu2 %v8437_v19 }
 0x282   :  { %2584 = vperm.xlu2 %5403, %v7078_v40  }
 0x283   :  { %v7232_v60 = vpop.f32.mrf.mxu1 }
 0x284   :  { %2422 = vperm.xlu0 %5408, %v7026_v43   ;;  %v5245_v43 = vld [vmem:[#allocation2 + $0xa8] sm:$0xff] }
 0x285   :  { %2022 = vmatpush.bf16.msra.mxu2 %v5245_v43 }
 0x289   :  { %4643 = vmatmul.msk.bf16.gmra.mxu3 %vm1740_vm2, %v8462_v45 }
 0x28a   :  { %5405 = vset.pattern.permute.xlu2 %v5698_v32 }
 0x28b   :  { %2632 = vperm.xlu2 %5405, %v7139_v49   ;;  %v7237_v40 = vpop.f32.mrf.mxu1 }
 0x28c   :  { %8463 = vst [vmem:[#allocation48_spill] sm:$0xff] %v7237_v40  ;;  %2588 = vperm.xlu0 %5408, %v7081_v39  }
 0x293   :  { %5409 = vset.pattern.permute.xlu2 %v8437_v19  ;;  %v7243_v49 = vpop.f32.mrf.mxu1 }
 0x294   :  { %2572 = vperm.xlu2 %5409, %v7161_v51   ;;  %2410 = vperm.xlu0 %5408, %v6978_v8   ;;  %v5244_v51 = vld [vmem:[#allocation2 + $0xa0] sm:$0xff]  ;;  %v5241_v8 = vld [vmem:[#allocation2 + $0x88] sm:$0xff] }
 0x295   :  { %2023 = vmatpush.bf16.msra.mxu2 %v5244_v51 }
 0x299   :  { %2234 = vmatmul.bf16.vlgmr.msra.gmra.mxu3 %v8464_v20  ;;  %2024 = vmatpush.bf16.msra.mxu2 %v5243_v29 }
 0x29b   :  { %v7248_v39 = vpop.f32.mrf.mxu1 }
 0x29c   :  { %5411 = vset.pattern.permute.xlu2 %v5698_v32  ;;  %2580 = vperm.xlu0 %5408, %v7093_v58   ;;  %8465 = vst [vmem:[#allocation8_spill] sm:$0xff] %v7248_v39 }
 0x29d   :  { %2620 = vperm.xlu2 %5411, %v7178_v16   ;;  %2025 = vmatpush.bf16.msra.mxu2 %v5242_v46 }
 0x2a1   :  { %2026 = vmatpush.bf16.msra.mxu2 %v5241_v8 }
 0x2a3   :  { %v7251_v21 = vpop.f32.mrf.mxu1 }
 0x2a4   :  { %2564 = vperm.xlu0 %5408, %v7178_v16  }
 0x2a5   :  { %5413 = vset.pattern.permute.xlu2 %v8437_v19  ;;  %2027 = vmatpush.bf16.msra.mxu2 %v5240_v36 }
 0x2a6   :  { %2568 = vperm.xlu2 %5413, %v1396_v1  }
 0x2ab   :  { %v7254_v19 = vpop.f32.mrf.mxu1 }
 0x2ac   :  { %5416 = vset.pattern.permute.xlu0 %v5698_v32  ;;  %8466 = vst [vmem:[#allocation49_spill] sm:$0xff] %v7254_v19 }
 0x2ae   :  { %2939 = vperm.xlu2 %5413, %v51_v37  }
 0x2b6   :  { %v7256_v58 = vpop.f32.mrf.mxu1 }
 0x2b7   :  { %8467 = vst [vmem:[#allocation50_spill] sm:$0xff] %v7256_v58 }
 0x2be   :  { %v2152_v0 = vpop.f32.mrf.mxu1 }
 0x2cc   :  { %v7258_v1 = vpop.f32.mrf.mxu3 }
 0x2cd   :  { %8468 = vst [vmem:[#allocation51_spill] sm:$0xff] %v7258_v1  ;;  %v2241_v24 = vpack.c.bf16 %v7258_v1, %v7258_v1 }
 0x2cf   :  { %v2250_v16 = vsel %vm1512_vm15, %v2241_v24, 0 }
 0x2d0   :  { %2318 = vmatpush.bf16.msrb.mxu2 %v2250_v16 }
 0x2d4   :  { %v1705_v37 = vpop.f32.mrf.mxu3 }
 0x2dc   :  { %v1762_v32 = vpop.f32.mrf.mxu3 }
 0x2dd   :  { %v1763_v47 = vadd.f32 %v7266_v5, %v1762_v32  ;;  %v7278_v32 = vld [vmem:[%s8230_s3] sm:$0xff] }
 0x2df   :  { %v1823_v11 = vand.u32 2147483647, %v1763_v47 }
 0x2e1   :  { %v1837_v61 = vsub.f32 0.0, %v1823_v11 }
 0x2e3   :  { %v1851_v20 = vmul.f32 1.442695, %v1837_v61 }
 0x2e4   :  { %v1764_v10 = vpop.f32.mrf.mxu3 }
 0x2e5   :  { %5492 = vpow2.f32 %v1851_v20  ;;  %v1765_v43 = vadd.f32 %v7266_v5, %v1764_v10  ;;  %v7270_v51 = vpop.f32.mrf.mxu2 }
 0x2e6   :  { %8469 = vst [vmem:[#allocation52_spill] sm:$0xff] %v7270_v51  ;;  %v2240_v29 = vpack.c.bf16 %v7270_v51, %v7270_v51 }
 0x2e7   :  { %v1825_v46 = vand.u32 2147483647, %v1765_v43  ;;  %v1811_v26 = vmax.f32 %v1765_v43, 0.0 }
 0x2e8   :  { %v2247_v8 = vsel %vm1512_vm15, %v2240_v29, 0 }
 0x2e9   :  { %v1839_v36 = vsub.f32 0.0, %v1825_v46  ;;  %2290 = vmatpush.bf16.msrb.mxu3 %v2247_v8 }
 0x2eb   :  { %v5493_v24 = vpop.eup %5492  ;;  %v1855_v0 = vmul.f32 1.442695, %v1839_v36 }
 0x2ec   :  { %v1879_v16 = vadd.f32 1.0, %v5493_v24  ;;  %v1767_v37 = vpop.f32.mrf.mxu3  ;;  %4762 = vmatmul.msk.bf16.vlgmr.msrb.gmra.mxu3 %vm1499_vm1, %v7278_v32 }
 0x2ed   :  { %5494 = vpow2.f32 %v1855_v0  ;;  %v7283_v11 = vadd.f32 %v7266_v5, %v1767_v37  ;;  %v1692_v61 = vpop.f32.mrf.mxu2  ;;  %v1809_v37 = vmax.f32 %v1763_v47, 0.0 }
 0x2ee   :  { %5496 = vlog2.f32 %v1879_v16 }
 0x2ef   :  { %v1827_v20 = vand.u32 2147483647, %v7283_v11 }
 0x2f1   :  { %v1841_v10 = vsub.f32 0.0, %v1827_v20  ;;  %v7290_v20 = vld [vmem:[%s8230_s3 + $0x8] sm:$0xff] }
 0x2f3   :  { %v5495_v29 = vpop.eup %5494  ;;  %v1859_v46 = vmul.f32 1.442695, %v1841_v10 }
 0x2f4   :  { %v1881_v8 = vadd.f32 1.0, %v5495_v29  ;;  %v1769_v36 = vpop.f32.mrf.mxu3  ;;  %v5497_v45 = vpop.eup %5496 }
 0x2f5   :  { %5498 = vpow2.f32 %v1859_v46  ;;  %v1770_v24 = vadd.f32 %v7266_v5, %v1769_v36  ;;  %v1894_v23 = vmul.f32 0.6931472, %v5497_v45 }
 0x2f6   :  { %5500 = vlog2.f32 %v1881_v8 }
 0x2f7   :  { %v1829_v12 = vand.u32 2147483647, %v1770_v24  ;;  %v1921_v10 = vadd.f32 %v1894_v23, %v1809_v37 }
 0x2f9   :  { %v1843_v0 = vsub.f32 0.0, %v1829_v12  ;;  %v4648_v46 = vadd.f32 -0.6931472, %v1921_v10 }
 0x2fb   :  { %v5499_v30 = vpop.eup %5498  ;;  %v1863_v15 = vmul.f32 1.442695, %v1843_v0 }
 0x2fc   :  { %v5501_v61 = vpop.eup %5500  ;;  %v1883_v28 = vadd.f32 1.0, %v5499_v30  ;;  %v1772_v16 = vpop.f32.mrf.mxu3  ;;  %4763 = vmatmul.msk.bf16.gmra.mxu3 %vm1499_vm1, %v7290_v20 }
 0x2fd   :  { %v1898_v29 = vmul.f32 0.6931472, %v5501_v61  ;;  %5502 = vpow2.f32 %v1863_v15  ;;  %v7295_v12 = vadd.f32 %v7266_v5, %v1772_v16 }
 0x2fe   :  { %v7297_v45 = vpop.f32.mrf.mxu2  ;;  %5504 = vlog2.f32 %v1883_v28 }
 0x2ff   :  { %8470 = vst [vmem:[#allocation53_spill] sm:$0xff] %v7297_v45  ;;  %v1923_v47 = vadd.f32 %v1898_v29, %v1811_v26  ;;  %v1831_v30 = vand.u32 2147483647, %v7295_v12  ;;  %v2242_v43 = vpack.c.bf16 %v7297_v45, %v7297_v45 }
 0x301   :  { %v4650_v8 = vadd.f32 -0.6931472, %v1923_v47  ;;  %v1845_v36 = vsub.f32 0.0, %v1831_v30  ;;  %v2253_v0 = vsel %vm1512_vm15, %v2242_v43, 0 }
 0x302   :  { %2346 = vmatpush.bf16.msra.mxu1 %v2253_v0  ;;  %v1813_v0 = vmax.f32 %v7283_v11, 0.0 }
 0x303   :  { %v5503_v23 = vpop.eup %5502  ;;  %v1867_v15 = vmul.f32 1.442695, %v1845_v36  ;;  %v1967_v37 = vpack.c.bf16 %v4650_v8, %v4648_v46  ;;  %v1815_v8 = vmax.f32 %v1770_v24, 0.0 }
 0x304   :  { %v1885_v61 = vadd.f32 1.0, %v5503_v23  ;;  %v1774_v16 = vpop.f32.mrf.mxu3  ;;  %v5505_v29 = vpop.eup %5504 }
 0x305   :  { %5506 = vpow2.f32 %v1867_v15  ;;  %4770 = vmatmul.msk.bf16.vlgmr.msra.gmra.mxu1 %vm1499_vm1, %v7278_v32  ;;  %v1775_v26 = vadd.f32 %v7266_v5, %v1774_v16  ;;  %2028 = vmatmul.bf16.vlgmr.msra.gmra.mxu2 %v1967_v37  ;;  %v1902_v30 = vmul.f32 0.6931472, %v5505_v29 }
 0x306   :  { %5508 = vlog2.f32 %v1885_v61  ;;  %v1718_v28 = vpop.f32.mrf.mxu2 }
 0x307   :  { %v1833_v10 = vand.u32 2147483647, %v1775_v26  ;;  %v1925_v16 = vadd.f32 %v1902_v30, %v1813_v0  ;;  %v1817_v0 = vmax.f32 %v7295_v12, 0.0 }
 0x309   :  { %v1847_v47 = vsub.f32 0.0, %v1833_v10  ;;  %v4652_v10 = vadd.f32 -0.6931472, %v1925_v16 }
 0x30b   :  { %v5507_v43 = vpop.eup %5506  ;;  %v1871_v36 = vmul.f32 1.442695, %v1847_v47 }
 0x30c   :  { %v5509_v46 = vpop.eup %5508  ;;  %v1887_v23 = vadd.f32 1.0, %v5507_v43  ;;  %v1777_v15 = vpop.f32.mrf.mxu3  ;;  %4764 = vmatmul.msk.bf16.gmra.mxu3 %vm1499_vm1, %v5626_v56 }
 0x30d   :  { %5510 = vpow2.f32 %v1871_v36  ;;  %v1778_v37 = vadd.f32 %v7266_v5, %v1777_v15  ;;  %v1906_v61 = vmul.f32 0.6931472, %v5509_v46  ;;  %v8471_v15 = vld [vmem:[#allocation24_spill] sm:$0xff] }
 0x30e   :  { %5512 = vlog2.f32 %v1887_v23 }
 0x30f   :  { %v1835_v29 = vand.u32 2147483647, %v1778_v37  ;;  %v1927_v28 = vadd.f32 %v1906_v61, %v1815_v8  ;;  %v1819_v61 = vmax.f32 %v1775_v26, 0.0 }
 0x311   :  { %v1849_v11 = vsub.f32 0.0, %v1835_v29  ;;  %v4654_v47 = vadd.f32 -0.6931472, %v1927_v28 }
 0x313   :  { %v5511_v24 = vpop.eup %5510  ;;  %v1875_v43 = vmul.f32 1.442695, %v1849_v11  ;;  %v1968_v31 = vpack.c.bf16 %v4654_v47, %v4652_v10 }
 0x314   :  { %v1889_v34 = vadd.f32 1.0, %v5511_v24  ;;  %v1779_v54 = vpop.f32.mrf.mxu3  ;;  %v5513_v36 = vpop.eup %5512  ;;  %v1821_v24 = vmax.f32 %v1778_v37, 0.0 }
 0x315   :  { %5514 = vpow2.f32 %v1875_v43  ;;  %4771 = vmatmul.msk.bf16.gmra.mxu1 %vm1499_vm1, %v7290_v20  ;;  %2033 = vmatmul.bf16.gmra.mxu2 %v1968_v31  ;;  %v1910_v5 = vmul.f32 0.6931472, %v5513_v36  ;;  %v7332_v37 = vpop.permute.xlu2 %2476 }
 0x316   :  { %5516 = vlog2.f32 %v1889_v34  ;;  %8472 = vst [vmem:[#allocation54_spill] sm:$0xff] %v7332_v37 }
 0x317   :  { %v1929_v29 = vadd.f32 %v1910_v5, %v1817_v0  ;;  %v7337_v0 = vpop.permute.xlu1 %2399 }
 0x318   :  { %8474 = vst [vmem:[#allocation56_spill] sm:$0xff] %v7337_v0 }
 0x319   :  { %v4656_v34 = vadd.f32 -0.6931472, %v1929_v29 }
 0x31b   :  { %v5515_v30 = vpop.eup %5514 }
 0x31c   :  { %v5517_v46 = vpop.eup %5516  ;;  %v1891_v8 = vadd.f32 1.0, %v5515_v30  ;;  %v2235_v23 = vpop.f32.mrf.mxu3  ;;  %4765 = vmatmul.msk.bf16.gmra.mxu3 %vm1499_vm1, %v8471_v15 }
 0x31d   :  { %v2239_v16 = vpack.c.bf16 %v2235_v23, %v2235_v23  ;;  %v1914_v54 = vmul.f32 0.6931472, %v5517_v46  ;;  %v7334_v30 = vpop.permute.xlu2 %2394  ;;  %v7343_v23 = vpop.permute.xlu0 %2472 }
 0x31e   :  { %5518 = vlog2.f32 %v1891_v8  ;;  %8473 = vst [vmem:[#allocation55_spill] sm:$0xff] %v7334_v30 }
 0x31f   :  { %v2244_v28 = vsel %vm1512_vm15, %v2239_v16, 0  ;;  %v1931_v31 = vadd.f32 %v1914_v54, %v1819_v61  ;;  %8476 = vst [vmem:[#allocation58_spill] sm:$0xff] %v7343_v23 }
 0x320   :  { %2262 = vmatpush.bf16.msra.mxu0 %v2244_v28 }
 0x321   :  { %v4658_v11 = vadd.f32 -0.6931472, %v1931_v31 }
 0x323   :  { %4758 = vmatmul.msk.bf16.vlgmr.msra.gmra.mxu0 %vm1499_vm1, %v7278_v32  ;;  %v1969_v12 = vpack.c.bf16 %v4658_v11, %v4656_v34 }
 0x324   :  { %v5519_v10 = vpop.eup %5518  ;;  %v2237_v47 = vpop.f32.mrf.mxu3 }
 0x325   :  { %4772 = vmatmul.msk.bf16.gmra.mxu1 %vm1499_vm1, %v5626_v56  ;;  %2038 = vmatmul.bf16.gmra.mxu2 %v1969_v12  ;;  %v1918_v26 = vmul.f32 0.6931472, %v5519_v10  ;;  %v7339_v46 = vpop.permute.xlu2 %2532  ;;  %v7353_v16 = vpop.permute.xlu0 %2640 }
 0x326   :  { %8475 = vst [vmem:[#allocation57_spill] sm:$0xff] %v7339_v46 }
 0x327   :  { %v1933_v43 = vadd.f32 %v1918_v26, %v1821_v24  ;;  %8480 = vst [vmem:[#allocation62_spill] sm:$0xff] %v7353_v16 }
 0x329   :  { %v4660_v36 = vadd.f32 -0.6931472, %v1933_v43 }
 0x32b   :  { %v1970_v5 = vpack.c.bf16 %v4660_v36, %v4660_v36 }
 0x32d   :  { %v7351_v61 = vpop.permute.xlu2 %2644  ;;  %v7363_v31 = vpop.permute.xlu0 %2507 }
 0x32e   :  { %8479 = vst [vmem:[#allocation61_spill] sm:$0xff] %v7351_v61 }
 0x32f   :  { %8484 = vst [vmem:[#allocation66_spill] sm:$0xff] %v7363_v31 }
 0x333   :  { %4759 = vmatmul.msk.bf16.gmra.mxu0 %vm1499_vm1, %v7290_v20 }
 0x335   :  { %4773 = vmatmul.msk.bf16.gmra.mxu1 %vm1499_vm1, %v8471_v15  ;;  %2043 = vmatmul.bf16.gmra.mxu2 %v1970_v5  ;;  %v7361_v28 = vpop.permute.xlu2 %2384  ;;  %v7377_v24 = vpop.permute.xlu0 %2434 }
 0x336   :  { %8483 = vst [vmem:[#allocation65_spill] sm:$0xff] %v7361_v28 }
 0x337   :  { %8489 = vst [vmem:[#allocation71_spill] sm:$0xff] %v7377_v24 }
 0x33d   :  { %v7373_v47 = vpop.permute.xlu2 %2460  ;;  %v7391_v50 = vpop.permute.xlu0 %2430 }
 0x33e   :  { %8488 = vst [vmem:[#allocation70_spill] sm:$0xff] %v7373_v47 }
 0x33f   :  { %8493 = vst [vmem:[#allocation75_spill] sm:$0xff] %v7391_v50 }
 0x343   :  { %4760 = vmatmul.msk.bf16.gmra.mxu0 %vm1499_vm1, %v5626_v56 }
 0x345   :  { %4766 = vmatmul.msk.bf16.vlgmr.msrb.gmra.mxu2 %vm1499_vm1, %v7278_v32  ;;  %v7347_v32 = vpop.permute.xlu1 %2389  ;;  %v7385_v7 = vpop.permute.xlu2 %2522 }
 0x346   :  { %8477 = vst [vmem:[#allocation59_spill] sm:$0xff] %v7347_v32  ;;  %v7405_v22 = vpop.permute.xlu0 %2422 }
 0x347   :  { %8491 = vst [vmem:[#allocation73_spill] sm:$0xff] %v7385_v7 }
 0x348   :  { %8498 = vst [vmem:[#allocation80_spill] sm:$0xff] %v7405_v22 }
 0x34d   :  { %v7357_v54 = vpop.permute.xlu1 %2426  ;;  %v7401_v53 = vpop.permute.xlu2 %2369 }
 0x34e   :  { %8481 = vst [vmem:[#allocation63_spill] sm:$0xff] %v7357_v54  ;;  %v7415_v40 = vpop.permute.xlu0 %2588 }
 0x34f   :  { %8497 = vst [vmem:[#allocation79_spill] sm:$0xff] %v7401_v53 }
 0x350   :  { %8502 = vst [vmem:[#allocation84_spill] sm:$0xff] %v7415_v40 }
 0x353   :  { %4761 = vmatmul.msk.bf16.gmra.mxu0 %vm1499_vm1, %v8471_v15 }
 0x355   :  { %4767 = vmatmul.msk.bf16.gmra.mxu2 %vm1499_vm1, %v7290_v20  ;;  %v7371_v10 = vpop.permute.xlu1 %2468  ;;  %v7413_v51 = vpop.permute.xlu2 %2414 }
 0x356   :  { %8487 = vst [vmem:[#allocation69_spill] sm:$0xff] %v7371_v10 }
 0x357   :  { %8501 = vst [vmem:[#allocation83_spill] sm:$0xff] %v7413_v51  ;;  %v8509_v51 = vld [vmem:[#allocation14_spill] sm:$0xff] }
 0x358   :  { %v1360_v40 = vmul.f32 %v8509_v51, %v8509_v51 }
 0x35d   :  { %v7383_v5 = vpop.permute.xlu1 %2379 }
 0x35e   :  { %8490 = vst [vmem:[#allocation72_spill] sm:$0xff] %v7383_v5 }
 0x365   :  { %4768 = vmatmul.msk.bf16.gmra.mxu2 %vm1499_vm1, %v5626_v56  ;;  %v7395_v48 = vpop.permute.xlu1 %2418 }
 0x366   :  { %8495 = vst [vmem:[#allocation77_spill] sm:$0xff] %v7395_v48 }
 0x36d   :  { %v7409_v45 = vpop.permute.xlu1 %2464 }
 0x36e   :  { %8499 = vst [vmem:[#allocation81_spill] sm:$0xff] %v7409_v45 }
 0x36f   :  { %v7341_v8 = vpop.f32.mrf.mxu3 }
 0x375   :  { %4769 = vmatmul.msk.bf16.gmra.mxu2 %vm1499_vm1, %v8471_v15  ;;  %v7421_v16 = vpop.permute.xlu1 %2527 }
 0x376   :  { %8504 = vst [vmem:[#allocation86_spill] sm:$0xff] %v7421_v16  ;;  %v1367_v16 = vmul.f32 %v1360_v40, %v8436_v44  ;;  %v5421_v44 = vld [vmem:[%s8235_s8 + $0x1] ss:$0 sm:$0xff] }
 0x377   :  { %v7349_v20 = vpop.f32.mrf.mxu3 }
 0x378   :  { %8478 = vst [vmem:[#allocation60_spill] sm:$0xff] %v7349_v20  ;;  %v2402_v20 = vmul.f32 %v7401_v53, %v7341_v8  ;;  %5520 = vrcp.f32 %v1367_v16 }
 0x37e   :  { %v5521_v30 = vpop.eup %5520 }
 0x37f   :  { %v7355_v56 = vpop.f32.mrf.mxu3 }
 0x382   :  { %v7359_v29 = vpop.f32.mrf.mxu1 }
 0x383   :  { %8482 = vst [vmem:[#allocation64_spill] sm:$0xff] %v7359_v29 }
 0x387   :  { %v7365_v34 = vpop.f32.mrf.mxu3 }
 0x388   :  { %8485 = vst [vmem:[#allocation67_spill] sm:$0xff] %v7365_v34  ;;  %v7367_v11 = vpop.f32.mrf.mxu2  ;;  %v7462_v34 = vmul.f32 %v5521_v30, %v6971_v33 }
 0x38a   :  { %v7369_v12 = vpop.f32.mrf.mxu1  ;;  %8515 = vst [vmem:[#allocation94_spill] sm:$0xff] %v7462_v34 }
 0x38b   :  { %8486 = vst [vmem:[#allocation68_spill] sm:$0xff] %v7369_v12  ;;  %v7423_v12 = vpop.permute.xlu2 %2452 }
 0x38c   :  { %8505 = vst [vmem:[#allocation87_spill] sm:$0xff] %v7423_v12 }
 0x38f   :  { %v7375_v26 = vpop.f32.mrf.mxu3 }
 0x390   :  { %v7379_v43 = vpop.f32.mrf.mxu2 }
 0x392   :  { %v7381_v36 = vpop.f32.mrf.mxu1 }
 0x393   :  { %v7429_v23 = vpop.permute.xlu2 %2512 }
 0x394   :  { %8508 = vst [vmem:[#allocation90_spill] sm:$0xff] %v7429_v23 }
 0x397   :  { %v7387_v35 = vpop.f32.mrf.mxu3 }
 0x398   :  { %8492 = vst [vmem:[#allocation74_spill] sm:$0xff] %v7387_v35  ;;  %v7389_v3 = vpop.f32.mrf.mxu2  ;;  %v8514_v35 = vld [vmem:[#allocation13_spill] sm:$0xff] }
 0x39a   :  { %v7393_v62 = vpop.f32.mrf.mxu1 }
 0x39b   :  { %8494 = vst [vmem:[#allocation76_spill] sm:$0xff] %v7393_v62  ;;  %v7451_v19 = vpop.permute.xlu2 %2584 }
 0x39c   :  { %8512 = vst [vmem:[#allocation92_spill] sm:$0xff] %v7451_v19 }
 0x39f   :  { %v7397_v57 = vpop.f32.mrf.mxu3 }
 0x3a0   :  { %8496 = vst [vmem:[#allocation78_spill] sm:$0xff] %v7397_v57  ;;  %v2036_v25 = vpop.f32.mrf.mxu2  ;;  %v7399_v14 = vpop.f32.mrf.mxu0 }
 0x3a1   :  { %v7427_v57 = vpop.permute.xlu1 %2374  ;;  %v2037_v30 = vadd.f32 %v5421_v44, %v2036_v25 }
 0x3a2   :  { %v7403_v63 = vpop.f32.mrf.mxu1  ;;  %8507 = vst [vmem:[#allocation89_spill] sm:$0xff] %v7427_v57  ;;  %v7443_v57 = vld [vmem:[%s8235_s8 + $0x6] ss:$0 sm:$0xff] }
 0x3a3   :  { %v2136_v27 = vadd.f32 %v7443_v57, %v7232_v60  ;;  %v2051_v25 = vmul.f32 %v2037_v30, %v6598_v42 }
 0x3a7   :  { %v2309_v13 = vpop.f32.mrf.mxu3 }
 0x3a8   :  { %v2039_v38 = vpop.f32.mrf.mxu2  ;;  %v7407_v15 = vpop.f32.mrf.mxu0 }
 0x3a9   :  { %v7425_v13 = vpop.permute.xlu0 %2410 }
 0x3aa   :  { %v7411_v1 = vpop.f32.mrf.mxu1  ;;  %8506 = vst [vmem:[#allocation88_spill] sm:$0xff] %v7425_v13 }
 0x3ab   :  { %8500 = vst [vmem:[#allocation82_spill] sm:$0xff] %v7411_v1 }
 0x3b0   :  { %v2041_v31 = vpop.f32.mrf.mxu2  ;;  %v7417_v61 = vpop.f32.mrf.mxu0 }
 0x3b1   :  { %v7433_v62 = vpop.permute.xlu0 %2580  ;;  %v2042_v28 = vadd.f32 %v5421_v44, %v2041_v31 }
 0x3b2   :  { %v7419_v46 = vpop.f32.mrf.mxu1  ;;  %8510 = vst [vmem:[#allocation14_spill] sm:$0xff] %v7433_v62 }
 0x3b3   :  { %8503 = vst [vmem:[#allocation85_spill] sm:$0xff] %v7419_v46  ;;  %v7436_v46 = vpop.permute.xlu1 %2636  ;;  %v2053_v50 = vmul.f32 %v2042_v28, %v6462_v55 }
 0x3b4   :  { %8511 = vst [vmem:[#allocation91_spill] sm:$0xff] %v7436_v46 }
 0x3b8   :  { %v2044_v37 = vpop.f32.mrf.mxu2  ;;  %v2271_v24 = vpop.f32.mrf.mxu0 }
 0x3b9   :  { %v2045_v53 = vadd.f32 %v5421_v44, %v2044_v37  ;;  %v7453_v39 = vpop.permute.xlu0 %2564 }
 0x3ba   :  { %v2365_v0 = vpop.f32.mrf.mxu1  ;;  %8513 = vst [vmem:[#allocation93_spill] sm:$0xff] %v7453_v39 }
 0x3bb   :  { %v7473_v31 = vpop.permute.xlu1 %2456 }
 0x3c0   :  { %v2046_v1 = vpop.f32.mrf.mxu2  ;;  %v2274_v45 = vpop.f32.mrf.mxu0 }
 0x3c1   :  { %v2479_v1 = vmul.f32 %v7423_v12, %v7359_v29  ;;  %v1362_v12 = vmul.f32 %v8514_v35, %v8514_v35 }
 0x3c3   :  { %v7496_v30 = vpop.permute.xlu1 %2517 }
 0x3c8   :  { %v2276_v0 = vpop.f32.mrf.mxu0  ;;  %v2320_v58 = vpop.f32.mrf.mxu2 }
 0x3c9   :  { %v2437_v40 = vmul.f32 %v7425_v13, %v2320_v58  ;;  %v2556_v13 = vmul.f32 %v2320_v58, %v8509_v51  ;;  %v1369_v58 = vmul.f32 %v1362_v12, %v8432_v59  ;;  %v2404_v59 = vmul.f32 %v7383_v5, %v7355_v56  ;;  %v8554_v5 = vld [vmem:[#allocation54_spill] sm:$0xff] }
 0x3cb   :  { %v2444_v16 = vadd.f32 %v2437_v40, %v2402_v20  ;;  %v2054_v20 = vmul.f32 %v2045_v53, %v6391_v41  ;;  %v2040_v40 = vadd.f32 %v5421_v44, %v2039_v38  ;;  %v7480_v38 = vpop.permute.xlu2 %2632  ;;  %v2035_v41 = vadd.f32 %v5421_v44, %v7389_v3 }
 0x3cc   :  { %5522 = vrcp.f32 %v1369_v58  ;;  %v2671_v3 = vmul.f32 %v2271_v24, %v2051_v25 }
 0x3cd   :  { %v7457_v22 = vadd.f32 %v2479_v1, %v2444_v16  ;;  %v7471_v1 = vmul.f32 %v2136_v27, %v7462_v34  ;;  %v2052_v27 = vmul.f32 %v2040_v40, %v6749_v4  ;;  %v2673_v34 = vmul.f32 %v2276_v0, %v2053_v50 }
 0x3ce   :  { %v2050_v12 = vmul.f32 %v2035_v41, %v6923_v52  ;;  %v2481_v0 = vmul.f32 %v7373_v47, %v7381_v36 }
 0x3cf   :  { %v2591_v37 = vmul.f32 %v7453_v39, %v7457_v22  ;;  %v2672_v28 = vmul.f32 %v2274_v45, %v2052_v27 }
 0x3d0   :  { %v2279_v19 = vpop.f32.mrf.mxu0  ;;  %v7468_v60 = vpop.f32.mrf.mxu2  ;;  %v2670_v40 = vmul.f32 %v7417_v61, %v2050_v12 }
 0x3d1   :  { %v2598_v16 = vsub.f32 %v2556_v13, %v2591_v37  ;;  %v2674_v29 = vmul.f32 %v2279_v19, %v2054_v20  ;;  %v2032_v13 = vadd.f32 %v5421_v44, %v7379_v43  ;;  %v2683_v37 = vpack.c.bf16 %v2673_v34, %v2672_v28 }
 0x3d2   :  { %v2679_v34 = vpack.c.bf16 %v2671_v3, %v2670_v40  ;;  %v5523_v24 = vpop.eup %5522  ;;  %v8519_v3 = vld [vmem:[#allocation11_spill] sm:$0xff] }
 0x3d3   :  { %v7478_v39 = vmul.f32 %v2598_v16, %v7471_v1  ;;  %v2687_v53 = vpack.c.bf16 %v2674_v29, %v2674_v29  ;;  %v2030_v29 = vadd.f32 %v5421_v44, %v7367_v11  ;;  %v2049_v45 = vmul.f32 %v2032_v13, %v6864_v6 }
 0x3d4   :  { %v2141_v44 = vadd.f32 %v7443_v57, %v7243_v49  ;;  %v7506_v61 = vmul.f32 %v5523_v24, %v6923_v52  ;;  %v8518_v49 = vld [vmem:[#allocation12_spill] sm:$0xff] }
 0x3d5   :  { %v2692_v19 = vsel %vm1512_vm15, %v2687_v53, 0  ;;  %v2048_v11 = vmul.f32 %v2030_v29, %v6971_v33  ;;  %v2669_v41 = vmul.f32 %v7407_v15, %v2049_v45  ;;  %v7502_v53 = vpop.permute.xlu2 %2572  ;;  %v8522_v45 = vld [vmem:[#allocation9_spill] sm:$0xff] }
 0x3d6   :  { %2707 = vmatpush.bf16.msrb.mxu0 %v2692_v19  ;;  %8516 = vst [vmem:[#allocation95_spill] sm:$0xff] %v7502_v53  ;;  %v7513_v28 = vmul.f32 %v2141_v44, %v7506_v61 }
 0x3d7   :  { %v2668_v27 = vmul.f32 %v7399_v14, %v2048_v11  ;;  %8517 = vst [vmem:[#allocation96_spill] sm:$0xff] %v7506_v61  ;;  %v2483_v11 = vmul.f32 %v7371_v10, %v7403_v63  ;;  %v8532_v10 = vld [vmem:[#allocation55_spill] sm:$0xff]  ;;  %v8544_v61 = vld [vmem:[#allocation58_spill] sm:$0xff] }
 0x3d8   :  { %v2281_v20 = vpop.f32.mrf.mxu0  ;;  %v2325_v50 = vpop.f32.mrf.mxu2 }
 0x3d9   :  { %v2439_v43 = vmul.f32 %v7395_v48, %v2325_v50  ;;  %v2558_v19 = vmul.f32 %v2325_v50, %v8514_v35  ;;  %v2675_v25 = vpack.c.bf16 %v2669_v41, %v2668_v27  ;;  %v7525_v20 = vpop.permute.xlu1 %2628  ;;  %v8521_v50 = vld [vmem:[#allocation10_spill] sm:$0xff]  ;;  %v8524_v27 = vld [vmem:[#allocation15_spill] sm:$0xff]  ;;  %v8555_v48 = vld [vmem:[#allocation68_spill] sm:$0xff] }
 0x3da   :  { %2708 = vmatpush.bf16.msrb.mxu0 %v2683_v37  ;;  %v1363_v37 = vmul.f32 %v8519_v3, %v8519_v3  ;;  %8520 = vst [vmem:[#allocation11_spill] sm:$0xff] %v7525_v20 }
 0x3db   :  { %v2446_v16 = vadd.f32 %v2439_v43, %v2404_v59  ;;  %v1364_v59 = vmul.f32 %v8518_v49, %v8518_v49 }
 0x3dc   :  { %v1370_v43 = vmul.f32 %v1363_v37, %v5841_v18  ;;  %v1361_v18 = vmul.f32 %v8524_v27, %v8524_v27 }
 0x3dd   :  { %v2488_v58 = vadd.f32 %v2481_v0, %v2446_v16  ;;  %v1371_v14 = vmul.f32 %v1364_v59, %v5902_v2  ;;  %v1365_v0 = vmul.f32 %v8521_v50, %v8521_v50  ;;  %v1366_v2 = vmul.f32 %v8522_v45, %v8522_v45 }
 0x3de   :  { %2709 = vmatpush.bf16.msrb.mxu0 %v2679_v34  ;;  %v8523_v34 = vld [vmem:[#allocation20_spill] sm:$0xff] }
 0x3df   :  { %v2593_v13 = vmul.f32 %v7502_v53, %v2488_v58  ;;  %5524 = vrcp.f32 %v1371_v14  ;;  %v1372_v16 = vmul.f32 %v1365_v0, %v5914_v9  ;;  %v1373_v24 = vmul.f32 %v1366_v2, %v8523_v34  ;;  %v8531_v53 = vld [vmem:[#allocation74_spill] sm:$0xff] }
 0x3e0   :  { %v7510_v15 = vpop.f32.mrf.mxu2  ;;  %5526 = vrcp.f32 %v1370_v43  ;;  %v2495_v9 = vmul.f32 %v7355_v56, %v8514_v35  ;;  %v2537_v59 = vmul.f32 %v7429_v23, %v2488_v58  ;;  %v2497_v14 = vmul.f32 %v7375_v26, %v8518_v49 }
 0x3e1   :  { %v2600_v29 = vsub.f32 %v2558_v19, %v2593_v13  ;;  %v2146_v19 = vadd.f32 %v7443_v57, %v7251_v21  ;;  %5528 = vrcp.f32 %v1372_v16  ;;  %v7556_v16 = vpop.permute.xlu1 %2502  ;;  %v2614_v34 = vmul.f32 %v7381_v36, %v8514_v35 }
 0x3e2   :  { %2710 = vmatpush.bf16.msrb.mxu0 %v2675_v25  ;;  %5530 = vrcp.f32 %v1373_v24  ;;  %v2544_v2 = vsub.f32 %v2495_v9, %v2537_v59  ;;  %8526 = vst [vmem:[#allocation20_spill] sm:$0xff] %v7556_v16  ;;  %v2535_v24 = vmul.f32 %v7556_v16, %v7457_v22  ;;  %v8534_v16 = vld [vmem:[#allocation18_spill] sm:$0xff] }
 0x3e3   :  { %v7519_v12 = vmul.f32 %v2600_v29, %v7513_v28 }
 0x3e5   :  { %4774 = vmatmul.msk.bf16.vlgmr.msrb.gmra.mxu0 %vm1668_vm7, %v7111_v17  ;;  %v2406_v17 = vmul.f32 %v7347_v32, %v7375_v26  ;;  %v5525_v13 = vpop.eup %5524 }
 0x3e6   :  { %v7547_v29 = vmul.f32 %v5525_v13, %v6749_v4  ;;  %v5527_v13 = vpop.eup %5526 }
 0x3e7   :  { %v5529_v59 = vpop.eup %5528 }
 0x3e8   :  { %v2330_v40 = vpop.f32.mrf.mxu2  ;;  %8525 = vst [vmem:[#allocation10_spill] sm:$0xff] %v7547_v29  ;;  %v2158_v56 = vmul.f32 %v2146_v19, %v7547_v29  ;;  %v1368_v29 = vmul.f32 %v1361_v18, %v8534_v16  ;;  %v8540_v18 = vld [vmem:[#allocation89_spill] sm:$0xff] }
 0x3e9   :  { %v2441_v41 = vmul.f32 %v7357_v54, %v2330_v40  ;;  %v2560_v37 = vmul.f32 %v2330_v40, %v8518_v49  ;;  %v2649_v40 = vmul.f32 %v7525_v20, %v2488_v58  ;;  %v7576_v58 = vmul.f32 %v2544_v2, %v7513_v28  ;;  %v8538_v54 = vld [vmem:[#allocation50_spill] sm:$0xff] }
 0x3ea   :  { %v8549_v20 = vld [vmem:[#allocation78_spill] sm:$0xff]  ;;  %5532 = vrcp.f32 %v1368_v29  ;;  %v2480_v29 = vmul.f32 %v7473_v31, %v8555_v48 }
 0x3eb   :  { %v2448_v44 = vadd.f32 %v2441_v41, %v2406_v17  ;;  %v2493_v17 = vmul.f32 %v7341_v8, %v8509_v51  ;;  %v7565_v41 = vpop.permute.xlu2 %2620 }
 0x3ec   :  { %v2647_v8 = vmul.f32 %v7565_v41, %v7457_v22 }
 0x3ed   :  { %v2490_v25 = vadd.f32 %v2483_v11, %v2448_v44  ;;  %v2616_v11 = vmul.f32 %v7403_v63, %v8518_v49  ;;  %v8527_v63 = vld [vmem:[#allocation75_spill] sm:$0xff] }
 0x3ef   :  { %v2595_v0 = vmul.f32 %v7433_v62, %v2490_v25  ;;  %v2539_v21 = vmul.f32 %v7385_v7, %v2490_v25  ;;  %v2651_v43 = vmul.f32 %v7436_v46, %v2490_v25  ;;  %v8528_v46 = vld [vmem:[#allocation64_spill] sm:$0xff] }
 0x3f0   :  { %v7562_v26 = vpop.f32.mrf.mxu2  ;;  %v2612_v36 = vmul.f32 %v8528_v46, %v8509_v51 }
 0x3f1   :  { %v2602_v44 = vsub.f32 %v2560_v37, %v2595_v0  ;;  %v2546_v19 = vsub.f32 %v2497_v14, %v2539_v21  ;;  %v2442_v9 = vmul.f32 %v8527_v63, %v7562_v26  ;;  %v2658_v25 = vsub.f32 %v2616_v11, %v2651_v43  ;;  %v5531_v37 = vpop.eup %5530  ;;  %v8529_v0 = vld [vmem:[#allocation67_spill] sm:$0xff]  ;;  %v8530_v21 = vld [vmem:[#allocation65_spill] sm:$0xff]  ;;  %v8533_v43 = vld [vmem:[#allocation80_spill] sm:$0xff] }
 0x3f2   :  { %v2656_v14 = vsub.f32 %v2614_v34, %v2649_v40  ;;  %v2405_v22 = vmul.f32 %v8530_v21, %v8529_v0  ;;  %v2407_v63 = vmul.f32 %v8532_v10, %v8531_v53  ;;  %v2440_v2 = vmul.f32 %v8533_v43, %v7510_v15  ;;  %v8536_v34 = vld [vmem:[#allocation8_spill] sm:$0xff]  ;;  %v8537_v10 = vld [vmem:[#allocation49_spill] sm:$0xff]  ;;  %v8551_v43 = vld [vmem:[#allocation71_spill] sm:$0xff]  ;;  %v5533_v4 = vpop.eup %5532 }
 0x3f3   :  { %v7580_v62 = vmul.f32 %v2602_v44, %v2158_v56  ;;  %v7582_v7 = vmul.f32 %v2546_v19, %v2158_v56  ;;  %v7590_v11 = vmul.f32 %v2658_v25, %v2158_v56  ;;  %v2542_v44 = vsub.f32 %v2493_v17, %v2535_v24  ;;  %v8539_v25 = vld [vmem:[#allocation60_spill] sm:$0xff]  ;;  %v8542_v24 = vld [vmem:[#allocation81_spill] sm:$0xff] }
 0x3f4   :  { %v7594_v46 = vmul.f32 %v2656_v14, %v7513_v28  ;;  %v7597_v40 = vmul.f32 %v5527_v13, %v6598_v42  ;;  %v2143_v19 = vadd.f32 %v7443_v57, %v8536_v34  ;;  %v2449_v23 = vadd.f32 %v2442_v9, %v2407_v63  ;;  %v8541_v17 = vld [vmem:[#allocation76_spill] sm:$0xff]  ;;  %v8543_v14 = vld [vmem:[#allocation82_spill] sm:$0xff] }
 0x3f5   :  { %v2654_v49 = vsub.f32 %v2612_v36, %v2647_v8  ;;  %v2148_v32 = vadd.f32 %v7443_v57, %v8537_v10  ;;  %v2151_v56 = vadd.f32 %v7443_v57, %v8538_v54  ;;  %v2403_v16 = vmul.f32 %v8540_v18, %v8539_v25  ;;  %v8545_v8 = vld [vmem:[#allocation83_spill] sm:$0xff]  ;;  %v8547_v54 = vld [vmem:[#allocation26_spill] sm:$0xff] }
 0x3f6   :  { %8535 = vst [vmem:[#allocation15_spill] sm:$0xff] %v7597_v40  ;;  %v7608_v28 = vmul.f32 %v2542_v44, %v7471_v1  ;;  %v2482_v13 = vmul.f32 %v8542_v24, %v8541_v17  ;;  %v2484_v34 = vmul.f32 %v8544_v61, %v8543_v14  ;;  %v2438_v63 = vmul.f32 %v8545_v8, %v7468_v60  ;;  %v8550_v44 = vld [vmem:[#allocation56_spill] sm:$0xff] }
 0x3f7   :  { %v2447_v9 = vadd.f32 %v2440_v2, %v2405_v22  ;;  %v7617_v36 = vmul.f32 %v5529_v59, %v6462_v55  ;;  %v7620_v21 = vmul.f32 %v5531_v37, %v8547_v54  ;;  %v2408_v35 = vmul.f32 %v8550_v44, %v8549_v20  ;;  %v7633_v2 = vpop.permute.xlu1 %2576  ;;  %v8553_v37 = vld [vmem:[#allocation85_spill] sm:$0xff] }
 0x3f8   :  { %v2335_v10 = vpop.f32.mrf.mxu2  ;;  %v7626_v24 = vmul.f32 %v2143_v19, %v7597_v40  ;;  %v2491_v61 = vadd.f32 %v2484_v34, %v2449_v23  ;;  %v7629_v52 = vmul.f32 %v2654_v49, %v7471_v1  ;;  %8552 = vst [vmem:[#allocation74_spill] sm:$0xff] %v7633_v2  ;;  %v2485_v42 = vmul.f32 %v8554_v5, %v8553_v37  ;;  %v8557_v5 = vld [vmem:[#allocation86_spill] sm:$0xff] }
 0x3f9   :  { %8546 = vst [vmem:[#allocation64_spill] sm:$0xff] %v7617_v36  ;;  %v2443_v47 = vmul.f32 %v8551_v43, %v2335_v10  ;;  %v2159_v22 = vmul.f32 %v2148_v32, %v7617_v36  ;;  %v2160_v59 = vmul.f32 %v2151_v56, %v7620_v21  ;;  %v7641_v19 = vmul.f32 %v8529_v0, %v8519_v3  ;;  %v8558_v36 = vld [vmem:[#allocation62_spill] sm:$0xff] }
 0x3fa   :  { %8548 = vst [vmem:[#allocation67_spill] sm:$0xff] %v7620_v21  ;;  %v2445_v23 = vadd.f32 %v2438_v63, %v2403_v16  ;;  %v2489_v1 = vadd.f32 %v2482_v13, %v2447_v9  ;;  %v2498_v32 = vmul.f32 %v8531_v53, %v8521_v50  ;;  %v2499_v49 = vmul.f32 %v8549_v20, %v8522_v45  ;;  %v8559_v63 = vld [vmem:[#allocation84_spill] sm:$0xff]  ;;  %v8560_v9 = vld [vmem:[#allocation57_spill] sm:$0xff] }
 0x3fb   :  { %v2450_v44 = vadd.f32 %v2443_v47, %v2408_v35  ;;  %v2617_v56 = vmul.f32 %v8543_v14, %v8521_v50  ;;  %v2618_v35 = vmul.f32 %v8553_v37, %v8522_v45  ;;  %v8556_v47 = vld [vmem:[#allocation92_spill] sm:$0xff]  ;;  %v2540_v0 = vmul.f32 %v8557_v5, %v2491_v61  ;;  %v8561_v20 = vld [vmem:[#allocation61_spill] sm:$0xff] }
 0x3fc   :  { %v2596_v21 = vmul.f32 %v8556_v47, %v2491_v61  ;;  %v2652_v16 = vmul.f32 %v8558_v36, %v2491_v61  ;;  %v2562_v13 = vmul.f32 %v2335_v10, %v8522_v45  ;;  %v2487_v14 = vadd.f32 %v2480_v29, %v2445_v23 }
 0x3fd   :  { %v2492_v34 = vadd.f32 %v2485_v42, %v2450_v44  ;;  %v2594_v42 = vmul.f32 %v7633_v2, %v2489_v1  ;;  %v2561_v44 = vmul.f32 %v7562_v26, %v8521_v50  ;;  %v2538_v37 = vmul.f32 %v7496_v30, %v2489_v1 }
 0x3fe   :  { %v2650_v10 = vmul.f32 %v7480_v38, %v2489_v1  ;;  %v2547_v23 = vsub.f32 %v2498_v32, %v2540_v0  ;;  %v2659_v2 = vsub.f32 %v2617_v56, %v2652_v16 }
 0x3ff   :  { %v2597_v53 = vmul.f32 %v8559_v63, %v2492_v34  ;;  %v2541_v43 = vmul.f32 %v8560_v9, %v2492_v34  ;;  %v2653_v40 = vmul.f32 %v8561_v20, %v2492_v34  ;;  %v2615_v63 = vmul.f32 %v8541_v17, %v8519_v3  ;;  %v7667_v20 = vpop.permute.xlu2 %2568  ;;  %v7673_v17 = vpop.permute.xlu1 %2624 }
 0x400   :  { %v2337_v47 = vpop.f32.mrf.mxu2  ;;  %v2559_v34 = vmul.f32 %v7510_v15, %v8519_v3  ;;  %v2603_v29 = vsub.f32 %v2561_v44, %v2596_v21  ;;  %v2666_v16 = vmul.f32 %v2659_v2, %v2159_v22 }
 0x401   :  { %v2604_v5 = vsub.f32 %v2562_v13, %v2597_v53  ;;  %v2548_v61 = vsub.f32 %v2499_v49, %v2541_v43  ;;  %v2660_v36 = vsub.f32 %v2618_v35, %v2653_v40  ;;  %v2557_v43 = vmul.f32 %v7468_v60, %v8524_v27 }
 0x402   :  { %v2592_v40 = vmul.f32 %v7667_v20, %v2487_v14  ;;  %v2601_v1 = vsub.f32 %v2559_v34, %v2594_v42  ;;  %v2545_v49 = vsub.f32 %v7641_v19, %v2538_v37  ;;  %v2657_v32 = vsub.f32 %v2615_v63, %v2650_v10  ;;  %v8563_v19 = vld [vmem:[#allocation48_spill] sm:$0xff] }
 0x403   :  { %v2611_v9 = vmul.f32 %v2604_v5, %v2160_v59  ;;  %v2555_v26 = vmul.f32 %v2548_v61, %v2160_v59  ;;  %v2667_v45 = vmul.f32 %v2660_v36, %v2160_v59  ;;  %v2554_v47 = vmul.f32 %v2547_v23, %v2159_v22  ;;  %v8562_v5 = vld [vmem:[#allocation66_spill] sm:$0xff] }
 0x404   :  { %v2610_v0 = vmul.f32 %v2603_v29, %v2159_v22  ;;  %v2536_v13 = vmul.f32 %v8562_v5, %v2487_v14  ;;  %v2648_v36 = vmul.f32 %v7673_v17, %v2487_v14  ;;  %v2138_v53 = vadd.f32 %v7443_v57, %v8563_v19  ;;  %v5265_v19 = vld [vmem:[#allocation2 + $0xc8] sm:$0xff] }
 0x405   :  { %v2688_v35 = vpack.c.bf16 %v2555_v26, %v2555_v26  ;;  %v2689_v15 = vpack.c.bf16 %v2611_v9, %v2611_v9  ;;  %v2690_v21 = vpack.c.bf16 %v2667_v45, %v2667_v45  ;;  %v2494_v45 = vmul.f32 %v8539_v25, %v8524_v27 }
 0x406   :  { %v7685_v63 = vmul.f32 %v5533_v4, %v6864_v6  ;;  %v2613_v9 = vmul.f32 %v8555_v48, %v8524_v27  ;;  %v2599_v14 = vsub.f32 %v2557_v43, %v2592_v40  ;;  %v2608_v42 = vmul.f32 %v2601_v1, %v7626_v24  ;;  %v5270_v43 = vld [vmem:[#allocation2 + $0xf0] sm:$0xff]  ;;  %v5284_v40 = vld [vmem:[#allocation2 + $0x160] sm:$0xff] }
 0x407   :  { %v2695_v59 = vsel %vm1512_vm15, %v2688_v35, 0  ;;  %v2698_v60 = vsel %vm1512_vm15, %v2689_v15, 0  ;;  %v2701_v56 = vsel %vm1512_vm15, %v2690_v21, 0  ;;  %v2684_v22 = vpack.c.bf16 %v2554_v47, %v7582_v7  ;;  %v5268_v1 = vld [vmem:[#allocation2 + $0xe0] sm:$0xff]  ;;  %v5267_v35 = vld [vmem:[#allocation2 + $0xd8] sm:$0xff]  ;;  %v5282_v15 = vld [vmem:[#allocation2 + $0x150] sm:$0xff] }
 0x408   :  { %2720 = vmatpush.bf16.msra.mxu3 %v2695_v59  ;;  %2733 = vmatpush.bf16.msra.mxu0 %v2698_v60  ;;  %v2685_v2 = vpack.c.bf16 %v2610_v0, %v7580_v62  ;;  %v2552_v57 = vmul.f32 %v2545_v49, %v7626_v24  ;;  %v2543_v44 = vsub.f32 %v2494_v45, %v2536_v13  ;;  %v5283_v49 = vld [vmem:[#allocation2 + $0x158] sm:$0xff]  ;;  %v5266_v21 = vld [vmem:[#allocation2 + $0xd0] sm:$0xff]  ;;  %v8566_v0 = vld [vmem:[#allocation52_spill] sm:$0xff] }
 0x409   :  { %2746 = vmatpush.bf16.msra.mxu2 %v2701_v56  ;;  %v2686_v25 = vpack.c.bf16 %v2666_v16, %v7590_v11  ;;  %v2664_v37 = vmul.f32 %v2657_v32, %v7626_v24  ;;  %v2655_v4 = vsub.f32 %v2613_v9, %v2648_v36  ;;  %v2155_v61 = vmul.f32 %v2138_v53, %v7685_v63  ;;  %v5287_v11 = vld [vmem:[#allocation2 + $0x178] sm:$0xff]  ;;  %v7715_v32 = vpop.permute.xlu2 %2939  ;;  %v5281_v36 = vld [vmem:[#allocation2 + $0x148] sm:$0xff]  ;;  %v8567_v59 = vld [vmem:[#allocation51_spill] sm:$0xff] }
 0x40a   :  { %v2680_v48 = vpack.c.bf16 %v2552_v57, %v7576_v58  ;;  %v2681_v10 = vpack.c.bf16 %v2608_v42, %v7519_v12  ;;  %v5271_v58 = vld [vmem:[#allocation2 + $0xf8] sm:$0xff]  ;;  %v5286_v12 = vld [vmem:[#allocation2 + $0x170] sm:$0xff]  ;;  %v2942_v60 = vmul.f32 %v7715_v32, %v8567_v59  ;;  %v5280_v45 = vld [vmem:[#allocation2 + $0x140] sm:$0xff] }
 0x40b   :  { %v2550_v7 = vmul.f32 %v2543_v44, %v2155_v61  ;;  %v2606_v34 = vmul.f32 %v2599_v14, %v2155_v61  ;;  %v2682_v62 = vpack.c.bf16 %v2664_v37, %v7594_v46  ;;  %v2662_v29 = vmul.f32 %v2655_v4, %v2155_v61  ;;  %2828 = vmatpush.bf16.msrb.mxu1 %v5271_v58  ;;  %v7705_v46 = vld [vmem:[%s8231_s4] sm:$0xf]  ;;  %v8568_v56 = vld [vmem:[#allocation53_spill] sm:$0xff]  ;;  %v5293_v57 = vld [vmem:[#allocation2 + $0x1e8] sm:$0xff] }
 0x40c   :  { %2721 = vmatpush.bf16.msra.mxu3 %v2684_v22  ;;  %2734 = vmatpush.bf16.msra.mxu0 %v2685_v2  ;;  %v5264_v42 = vld [vmem:[#allocation2 + $0xc0] sm:$0xff]  ;;  %v5295_v22 = vld [vmem:[#allocation2 + $0x1f8] sm:$0xff]  ;;  %v5294_v2 = vld [vmem:[#allocation2 + $0x1f0] sm:$0xff] }
 0x40d   :  { %2747 = vmatpush.bf16.msra.mxu2 %v2686_v25  ;;  %v2676_v24 = vpack.c.bf16 %v2550_v7, %v7608_v28  ;;  %v2677_v23 = vpack.c.bf16 %v2606_v34, %v7478_v39  ;;  %v2678_v26 = vpack.c.bf16 %v2662_v29, %v7629_v52  ;;  %v5285_v52 = vld [vmem:[#allocation2 + $0x168] sm:$0xff]  ;;  %v7713_v28 = vpop.permute.xlu1 %2934  ;;  %v5292_v44 = vld [vmem:[#allocation2 + $0x1e0] sm:$0xff]  ;;  %v5291_v61 = vld [vmem:[#allocation2 + $0x1d8] sm:$0xff] }
 0x40e   :  { %v5269_v39 = vld [vmem:[#allocation2 + $0xe8] sm:$0xff]  ;;  %8564 = vst [vmem:[#allocation18_spill] sm:$0xff] %v7713_v28  ;;  %v2937_v13 = vmul.f32 %v7713_v28, %v8566_v0  ;;  %v5288_v7 = vld [vmem:[#allocation2 + $0x1c0] sm:$0xff]  ;;  %v8603_v28 = vld [vmem:[#allocation77_spill] sm:$0xff] }
 0x40f   :  { %2829 = vmatpush.bf16.msrb.mxu1 %v5270_v43 }
 0x410   :  { %2722 = vmatpush.bf16.msra.mxu3 %v2680_v48  ;;  %2735 = vmatpush.bf16.msra.mxu0 %v2681_v10  ;;  %v2943_v53 = vadd.f32 %v2942_v60, %v2937_v13  ;;  %v5290_v48 = vld [vmem:[#allocation2 + $0x1d0] sm:$0xff]  ;;  %v5289_v10 = vld [vmem:[#allocation2 + $0x1c8] sm:$0xff] }
 0x411   :  { %2748 = vmatpush.bf16.msra.mxu2 %v2682_v62  ;;  %v5278_v13 = vld [vmem:[#allocation2 + $0x130] sm:$0xff] }
 0x413   :  { %2830 = vmatpush.bf16.msrb.mxu1 %v5269_v39 }
 0x414   :  { %2723 = vmatpush.bf16.msra.mxu3 %v2676_v24  ;;  %2736 = vmatpush.bf16.msra.mxu0 %v2677_v23 }
 0x415   :  { %2749 = vmatpush.bf16.msra.mxu2 %v2678_v26  ;;  %v7717_v47 = vpop.permute.xlu1 %2945 }
 0x416   :  { %8565 = vst [vmem:[#allocation8_spill] sm:$0xff] %v7717_v47  ;;  %v2948_v16 = vmul.f32 %v7717_v47, %v8568_v56 }
 0x417   :  { %4775 = vmatmul.msk.bf16.vlgmr.msra.gmra.mxu3 %vm1668_vm7, %v7705_v46  ;;  %4776 = vmatmul.msk.bf16.vlgmr.msra.gmra.mxu0 %vm1668_vm7, %v7705_v46 }
 0x418   :  { %3018 = vmatpush.bf16.msrb.mxu0 %v5287_v11  ;;  %4777 = vmatmul.msk.bf16.vlgmr.msra.gmra.mxu2 %vm1668_vm7, %v7705_v46  ;;  %v2949_v9 = vadd.f32 %v2948_v16, %v2943_v53  ;;  %v5277_v16 = vld [vmem:[#allocation2 + $0x128] sm:$0xff] }
 0x419   :  { %2831 = vmatpush.bf16.msrb.mxu1 %v5268_v1  ;;  %3109 = vmatpush.bf16.msrb.mxu2 %v5295_v22  ;;  %v5274_v22 = vld [vmem:[#allocation2 + $0x110] sm:$0xff] }
 0x41a   :  { %v2968_v14 = vpack.c.bf16 %v2949_v9, %v2949_v9  ;;  %v5275_v9 = vld [vmem:[#allocation2 + $0x118] sm:$0xff] }
 0x41c   :  { %3019 = vmatpush.bf16.msrb.mxu0 %v5286_v12 }
 0x41d   :  { %2832 = vmatpush.bf16.msrb.mxu1 %v5267_v35  ;;  %3110 = vmatpush.bf16.msrb.mxu2 %v5294_v2  ;;  %v5279_v35 = vld [vmem:[#allocation2 + $0x138] sm:$0xff]  ;;  %v5273_v2 = vld [vmem:[#allocation2 + $0x108] sm:$0xff] }
 0x41e   :  { %2919 = vmatpush.bf16.msrb.mxu3 %v5279_v35 }
 0x420   :  { %3020 = vmatpush.bf16.msrb.mxu0 %v5285_v52 }
 0x421   :  { %2833 = vmatpush.bf16.msrb.mxu1 %v5266_v21  ;;  %3111 = vmatpush.bf16.msrb.mxu2 %v5293_v57 }
 0x422   :  { %2920 = vmatpush.bf16.msrb.mxu3 %v5278_v13  ;;  %v5297_v13 = vld [vmem:[#allocation2 + $0x208] sm:$0xff] }
 0x424   :  { %3021 = vmatpush.bf16.msrb.mxu0 %v5284_v40 }
 0x425   :  { %2834 = vmatpush.bf16.msrb.mxu1 %v5265_v19  ;;  %3112 = vmatpush.bf16.msrb.mxu2 %v5292_v44 }
 0x426   :  { %2921 = vmatpush.bf16.msrb.mxu3 %v5277_v16 }
 0x428   :  { %3022 = vmatpush.bf16.msrb.mxu0 %v5283_v49  ;;  %v5423_v49 = vld [vmem:[%s8235_s8 + $0x2] ss:$0 sm:$0xff] }
 0x429   :  { %2835 = vmatpush.bf16.msrb.mxu1 %v5264_v42  ;;  %3113 = vmatpush.bf16.msrb.mxu2 %v5291_v61 }
 0x42c   :  { %3023 = vmatpush.bf16.msrb.mxu0 %v5282_v15 }
 0x42d   :  { %3114 = vmatpush.bf16.msrb.mxu2 %v5290_v48 }
 0x430   :  { %3024 = vmatpush.bf16.msrb.mxu0 %v5281_v36 }
 0x431   :  { %3115 = vmatpush.bf16.msrb.mxu2 %v5289_v10  ;;  %v5303_v10 = vld [vmem:[#allocation2 + $0x238] sm:$0xff] }
 0x432   :  { %3201 = vmatpush.bf16.msra.mxu1 %v5303_v10 }
 0x434   :  { %3025 = vmatpush.bf16.msrb.mxu0 %v5280_v45  ;;  %v5276_v45 = vld [vmem:[#allocation2 + $0x120] sm:$0xff] }
 0x435   :  { %3116 = vmatpush.bf16.msrb.mxu2 %v5288_v7  ;;  %2922 = vmatpush.bf16.msrb.mxu3 %v5276_v45  ;;  %v5302_v7 = vld [vmem:[#allocation2 + $0x230] sm:$0xff] }
 0x436   :  { %3202 = vmatpush.bf16.msra.mxu1 %v5302_v7 }
 0x437   :  { %3026 = vmatmul.bf16.vlgmr.msrb.gmra.mxu0 %v2968_v14 }
 0x439   :  { %2923 = vmatpush.bf16.msrb.mxu3 %v5275_v9 }
 0x43d   :  { %2924 = vmatpush.bf16.msrb.mxu3 %v5274_v22 }
 0x441   :  { %2925 = vmatpush.bf16.msrb.mxu3 %v5273_v2  ;;  %v5425_v2 = vld [vmem:[%s8235_s8 + $0x3] ss:$0 sm:$0xff] }
 0x462   :  { %v2712_v25 = vpop.f32.mrf.mxu0 }
 0x463   :  { %v2778_v37 = vpack.c.bf16 %v2712_v25, %v2712_v25 }
 0x465   :  { %2836 = vmatmul.bf16.vlgmr.msrb.gmra.mxu1 %v2778_v37  ;;  %v5272_v37 = vld [vmem:[#allocation2 + $0x100] sm:$0xff] }
 0x466   :  { %2926 = vmatpush.bf16.msrb.mxu3 %v5272_v37 }
 0x46a   :  { %v2714_v4 = vpop.f32.mrf.mxu0 }
 0x494   :  { %v2738_v34 = vpop.f32.mrf.mxu0 }
 0x495   :  { %v2756_v29 = vmul.f32 %v2738_v34, %v8567_v59 }
 0x49a   :  { %v2725_v62 = vpop.f32.mrf.mxu3 }
 0x49b   :  { %v2755_v11 = vmul.f32 %v2725_v62, %v8566_v0  ;;  %v2751_v24 = vpop.f32.mrf.mxu2  ;;  %v5301_v62 = vld [vmem:[#allocation2 + $0x228] sm:$0xff] }
 0x49c   :  { %v2740_v23 = vpop.f32.mrf.mxu0  ;;  %v2757_v58 = vmul.f32 %v2751_v24, %v8568_v56  ;;  %3203 = vmatpush.bf16.msra.mxu1 %v5301_v62  ;;  %v5299_v24 = vld [vmem:[#allocation2 + $0x218] sm:$0xff] }
 0x49d   :  { %v2758_v26 = vadd.f32 %v2756_v29, %v2755_v11  ;;  %v5300_v29 = vld [vmem:[#allocation2 + $0x220] sm:$0xff]  ;;  %v5298_v23 = vld [vmem:[#allocation2 + $0x210] sm:$0xff] }
 0x49f   :  { %v2759_v12 = vadd.f32 %v2758_v26, %v2757_v58  ;;  %v5422_v26 = vld [vmem:[%s8235_s8 + $0x4] ss:$0 sm:$0xff]  ;;  %v5424_v58 = vld [vmem:[%s8235_s8 + $0x7] ss:$0 sm:$0xff] }
 0x4a0   :  { %3204 = vmatpush.bf16.msra.mxu1 %v5300_v29 }
 0x4a1   :  { %v3059_v43 = vpack.c.bf16 %v2759_v12, %v2759_v12 }
 0x4a2   :  { %v2727_v52 = vpop.f32.mrf.mxu3 }
 0x4a3   :  { %3117 = vmatmul.bf16.vlgmr.msrb.gmra.mxu2 %v3059_v43  ;;  %v2753_v39 = vpop.f32.mrf.mxu2 }
 0x4a4   :  { %3205 = vmatpush.bf16.msra.mxu1 %v5299_v24 }
 0x4a8   :  { %3206 = vmatpush.bf16.msra.mxu1 %v5298_v23  ;;  %v7755_v23 = vld [vmem:[%s8230_s3 + $0x8] sm:$0xff] }
 0x4ac   :  { %3207 = vmatpush.bf16.msra.mxu1 %v5297_v13  ;;  %v8571_v13 = vld [vmem:[#allocation17_spill] sm:$0xff] }
 0x4b4   :  { %v3027_v40 = vpop.f32.mrf.mxu0 }
 0x4b5   :  { %v3028_v12 = vadd.f32 %v5422_v26, %v3027_v40  ;;  %v7762_v26 = vld [vmem:[%s8230_s3 + $0x10] sm:$0xff] }
 0x4b7   :  { %v3032_v52 = vand.u32 2147483647, %v3028_v12  ;;  %v3031_v9 = vmax.f32 %v3028_v12, 0.0 }
 0x4bc   :  { %v3029_v1 = vpop.f32.mrf.mxu0 }
 0x4bd   :  { %v3033_v1 = vsub.f32 0.0, %v3032_v52 }
 0x4bf   :  { %v3034_v35 = vmul.f32 1.442695, %v3033_v1 }
 0x4e2   :  { %v2837_v15 = vpop.f32.mrf.mxu1 }
 0x4e3   :  { %v2838_v21 = vadd.f32 %v5423_v49, %v2837_v15 }
 0x4e5   :  { %v2842_v36 = vand.u32 2147483647, %v2838_v21  ;;  %v2841_v44 = vmax.f32 %v2838_v21, 0.0 }
 0x4e7   :  { %v2843_v60 = vsub.f32 0.0, %v2842_v36 }
 0x4e9   :  { %v2844_v19 = vmul.f32 1.442695, %v2843_v60  ;;  %v5296_v60 = vld [vmem:[#allocation2 + $0x200] sm:$0xff] }
 0x4ea   :  { %v2839_v53 = vpop.f32.mrf.mxu1  ;;  %3208 = vmatpush.bf16.msra.mxu1 %v5296_v60  ;;  %v8572_v60 = vld [vmem:[#allocation40_spill] sm:$0xff] }
 0x4eb   :  { %5534 = vpow2.f32 %v2844_v19 }
 0x4f1   :  { %v5535_v14 = vpop.eup %5534 }
 0x4f2   :  { %v2846_v42 = vadd.f32 1.0, %v5535_v14 }
 0x4f4   :  { %5536 = vlog2.f32 %v2846_v42 }
 0x4f5   :  { %5538 = vpow2.f32 %v3034_v35 }
 0x4fa   :  { %v5537_v57 = vpop.eup %5536 }
 0x4fb   :  { %v2848_v25 = vmul.f32 0.6931472, %v5537_v57  ;;  %v5539_v21 = vpop.eup %5538 }
 0x4fc   :  { %v3036_v16 = vadd.f32 1.0, %v5539_v21 }
 0x4fd   :  { %v2849_v4 = vadd.f32 %v2848_v25, %v2841_v44 }
 0x4ff   :  { %v4810_v61 = vadd.f32 -0.6931472, %v2849_v4 }
 0x501   :  { %v2869_v48 = vpack.c.bf16 %v4810_v61, %v4810_v61 }
 0x503   :  { %2927 = vmatmul.bf16.vlgmr.msrb.gmra.mxu3 %v2869_v48 }
 0x526   :  { %v3118_v34 = vpop.f32.mrf.mxu2 }
 0x527   :  { %v3119_v43 = vadd.f32 %v5424_v58, %v3118_v34  ;;  %v8569_v58 = vld [vmem:[#allocation24_spill] sm:$0xff] }
 0x529   :  { %v3123_v39 = vand.u32 2147483647, %v3119_v43  ;;  %v3122_v22 = vmax.f32 %v3119_v43, 0.0 }
 0x52b   :  { %v3124_v49 = vsub.f32 0.0, %v3123_v39 }
 0x52d   :  { %v3125_v15 = vmul.f32 1.442695, %v3124_v49 }
 0x52e   :  { %v3120_v11 = vpop.f32.mrf.mxu2 }
 0x52f   :  { %5540 = vpow2.f32 %v3125_v15  ;;  %v7748_v11 = vld [vmem:[%s8230_s3] sm:$0xff]  ;;  %v8570_v15 = vld [vmem:[#allocation37_spill] sm:$0xff]  ;;  %s4541_s3 = sshll.u32 %s5699_s29, 4  ;;  %s4542_s3 = int_to_ptr.vmem [resolvable:$true] %s4541_s3 }
 0x530   :  { %5542 = vlog2.f32 %v3036_v16 }
 0x535   :  { %v5541_v36 = vpop.eup %5540 }
 0x536   :  { %v3127_v19 = vadd.f32 1.0, %v5541_v36  ;;  %v5543_v40 = vpop.eup %5542 }
 0x537   :  { %v3038_v45 = vmul.f32 0.6931472, %v5543_v40 }
 0x538   :  { %5544 = vlog2.f32 %v3127_v19 }
 0x539   :  { %v3039_v42 = vadd.f32 %v3038_v45, %v3031_v9  ;;  %v8573_v45 = vld [vmem:[#allocation36_spill] sm:$0xff] }
 0x53b   :  { %v4875_v37 = vadd.f32 -0.6931472, %v3039_v42 }
 0x53e   :  { %v5545_v53 = vpop.eup %5544 }
 0x53f   :  { %v3129_v14 = vmul.f32 0.6931472, %v5545_v53 }
 0x541   :  { %v3130_v57 = vadd.f32 %v3129_v14, %v3122_v22  ;;  %v8574_v14 = vld [vmem:[#allocation29_spill] sm:$0xff]  ;;  %v8575_v22 = vld [vmem:[#allocation42_spill] sm:$0xff] }
 0x543   :  { %v4908_v4 = vadd.f32 -0.6931472, %v3130_v57 }
 0x586   :  { %v2928_v44 = vpop.f32.mrf.mxu3 }
 0x587   :  { %v2929_v25 = vadd.f32 %v5425_v2, %v2928_v44 }
 0x589   :  { %v3132_v61 = vadd.f32 %v4875_v37, %v2929_v25  ;;  %v8576_v37 = vld [vmem:[#allocation33_spill] sm:$0xff] }
 0x58b   :  { %v7740_v48 = vadd.f32 %v4908_v4, %v3132_v61  ;;  %v8577_v61 = vld [vmem:[#allocation16_spill] sm:$0xff] }
 0x58d   :  { %v3152_v10 = vpack.c.bf16 %v7740_v48, %v7740_v48 }
 0x58e   :  { %v2930_v7 = vpop.f32.mrf.mxu3 }
 0x58f   :  { %3209 = vmatmul.bf16.vlgmr.msra.gmra.mxu1 %v3152_v10  ;;  %v8578_v7 = vld [vmem:[#allocation43_spill] sm:$0xff] }
 0x60c   :  { %v3210_v34 = vpop.f32.mrf.mxu1 }
 0x60d   :  { %v3214_v62 = vpack.c.bf16 %v3210_v34, %v3210_v34 }
 0x60f   :  { %v3216_v29 = vsel %vm1512_vm15, %v3214_v62, 0  ;;  %v8579_v62 = vld [vmem:[#allocation35_spill] sm:$0xff] }
 0x610   :  { %3225 = vmatpush.bf16.msra.mxu3 %v3216_v29 }
 0x613   :  { %4941 = vmatmul.msk.bf16.vlgmr.msra.gmra.mxu3 %vm1499_vm1, %v7748_v11 }
 0x614   :  { %v3212_v24 = vpop.f32.mrf.mxu1 }
 0x615   :  { %v8580_v24 = vld [vmem:[#allocation30_spill] sm:$0xff] }
 0x623   :  { %4942 = vmatmul.msk.bf16.gmra.mxu3 %vm1499_vm1, %v7755_v23 }
 0x633   :  { %4943 = vmatmul.msk.bf16.gmra.mxu3 %vm1499_vm1, %v7762_v26 }
 0x643   :  { %4944 = vmatmul.msk.bf16.gmra.mxu3 %vm1499_vm1, %v8569_v58 }
 0x696   :  { %v3227_v12 = vpop.f32.mrf.mxu3 }
 0x69e   :  { %v3229_v43 = vpop.f32.mrf.mxu3 }
 0x6a6   :  { %v3232_v52 = vpop.f32.mrf.mxu3 }
 0x6ae   :  { %v3234_v39 = vpop.f32.mrf.mxu3 }
 0x6af   :  { %v3249_v29 = vmul.f32 %v3234_v39, %v8579_v62 }
 0x6b6   :  { %v3237_v1 = vpop.f32.mrf.mxu3 }
 0x6b7   :  { %v3250_v4 = vmul.f32 %v3237_v1, %v8576_v37  ;;  %v3257_v10 = vmul.f32 %v3237_v1, %v8577_v61  ;;  %v3264_v34 = vmul.f32 %v3237_v1, %v8578_v7  ;;  %v8585_v1 = vld [vmem:[#allocation39_spill] sm:$0xff]  ;;  %v4954_v61 = vld [vmem:[%s8234_s7 + $0x18] sm:$0xf0] }
 0x6be   :  { %v3239_v49 = vpop.f32.mrf.mxu3 }
 0x6bf   :  { %v3251_v9 = vmul.f32 %v3239_v49, %v8573_v45  ;;  %v3258_v42 = vmul.f32 %v3239_v49, %v8574_v14  ;;  %v3265_v2 = vmul.f32 %v3239_v49, %v8575_v22  ;;  %v8584_v45 = vld [vmem:[#allocation45_spill] sm:$0xff]  ;;  %v3247_v22 = vmul.f32 %v3229_v43, %v8585_v1  ;;  %v5321_v1 = vld [vmem:[#allocation2 + $0x3b8] sm:$0xff] }
 0x6c0   :  { %v3262_v14 = vmul.f32 %v3232_v52, %v8584_v45  ;;  %v5322_v45 = vld [vmem:[#allocation2 + $0x240] sm:$0xff]  ;;  %3720 = vmatpush.bf16.msrb.mxu3 %v5321_v1  ;;  %v7866_v1 = vld [vmem:[%s8235_s8 + $0xd] ss:$0 sm:$0xff] }
 0x6c6   :  { %v3242_v35 = vpop.f32.mrf.mxu3 }
 0x6c7   :  { %v3252_v21 = vmul.f32 %v3242_v35, %v8570_v15  ;;  %v3259_v36 = vmul.f32 %v3242_v35, %v8571_v13  ;;  %v3266_v16 = vmul.f32 %v3242_v35, %v8572_v60  ;;  %v3256_v35 = vmul.f32 %v3234_v39, %v8580_v24  ;;  %v8581_v13 = vld [vmem:[#allocation44_spill] sm:$0xff] }
 0x6c8   :  { %v3273_v15 = vpack.c.bf16 %v3251_v9, %v3250_v4  ;;  %v3275_v60 = vpack.c.bf16 %v3265_v2, %v3264_v34  ;;  %v5305_v9 = vld [vmem:[%s8234_s7 + $0x14] sm:$0xf0] }
 0x6c9   :  { %v3276_v19 = vpack.c.bf16 %v3252_v21, %v3252_v21  ;;  %v3277_v40 = vpack.c.bf16 %v3259_v36, %v3259_v36  ;;  %v3278_v53 = vpack.c.bf16 %v3266_v16, %v3266_v16  ;;  %v3274_v21 = vpack.c.bf16 %v3258_v42, %v3257_v10  ;;  %v8582_v16 = vld [vmem:[#allocation38_spill] sm:$0xff]  ;;  %v8587_v42 = vld [vmem:[#allocation47_spill] sm:$0xff]  ;;  %v8588_v10 = vld [vmem:[#allocation41_spill] sm:$0xff] }
 0x6ca   :  { %v3263_v36 = vmul.f32 %v3234_v39, %v8581_v13  ;;  %v4952_v39 = vld [vmem:[%s8234_s7 + $0x10] sm:$0xf]  ;;  %v3261_v2 = vmul.f32 %v3229_v43, %v8587_v42  ;;  %v3246_v7 = vmul.f32 %v3227_v12, %v8588_v10  ;;  %v8589_v34 = vld [vmem:[#allocation34_spill] sm:$0xff] }
 0x6cb   :  { %v3280_v57 = vsel %vm1512_vm15, %v3276_v19, 0  ;;  %v3283_v44 = vsel %vm1512_vm15, %v3277_v40, 0  ;;  %v3286_v25 = vsel %vm1512_vm15, %v3278_v53, 0  ;;  %v3248_v19 = vmul.f32 %v3232_v52, %v8582_v16  ;;  %v8583_v40 = vld [vmem:[#allocation31_spill] sm:$0xff]  ;;  %v5329_v13 = vld [vmem:[#allocation2 + $0x278] sm:$0xff] }
 0x6cc   :  { %3292 = vmatpush.bf16.msra.mxu0 %v3280_v57  ;;  %3305 = vmatpush.bf16.msra.mxu2 %v3283_v44  ;;  %v3255_v53 = vmul.f32 %v3232_v52, %v8583_v40  ;;  %v8586_v57 = vld [vmem:[#allocation32_spill] sm:$0xff]  ;;  %v3272_v4 = vpack.c.bf16 %v3263_v36, %v3262_v14  ;;  %v5304_v52 = vld [vmem:[%s8234_s7 + $0x14] sm:$0xf]  ;;  %v3253_v62 = vmul.f32 %v3227_v12, %v8589_v34  ;;  %v5326_v16 = vld [vmem:[#allocation2 + $0x260] sm:$0xff] }
 0x6cd   :  { %3318 = vmatpush.bf16.msrb.mxu1 %v3286_v25  ;;  %v3254_v44 = vmul.f32 %v3229_v43, %v8586_v57  ;;  %v3270_v25 = vpack.c.bf16 %v3249_v29, %v3248_v19  ;;  %v8590_v29 = vld [vmem:[#allocation46_spill] sm:$0xff]  ;;  %v3267_v43 = vpack.c.bf16 %v3247_v22, %v3246_v7  ;;  %v5328_v36 = vld [vmem:[#allocation2 + $0x270] sm:$0xff]  ;;  %v8593_v14 = vld [vmem:[#allocation23_spill] sm:$0xff] }
 0x6ce   :  { %v3244_v49 = vpop.f32.mrf.mxu3  ;;  %v3271_v37 = vpack.c.bf16 %v3256_v35, %v3255_v53  ;;  %v3260_v24 = vmul.f32 %v3227_v12, %v8590_v29  ;;  %v4953_v35 = vor.u32 %v5305_v9, %v4952_v39  ;;  %v8591_v12 = vld [vmem:[#allocation21_spill] sm:$0xff]  ;;  %v8592_v19 = vld [vmem:[#allocation22_spill] sm:$0xff]  ;;  %v5323_v53 = vld [vmem:[#allocation2 + $0x248] sm:$0xff] }
 0x6cf   :  { %v3268_v49 = vpack.c.bf16 %v3254_v44, %v3253_v62  ;;  %v5324_v40 = vld [vmem:[#allocation2 + $0x250] sm:$0xff]  ;;  %v5313_v22 = vld [vmem:[#allocation2 + $0x2b8] sm:$0xff]  ;;  %v5318_v39 = vld [vmem:[#allocation2 + $0x3a0] sm:$0xff] }
 0x6d0   :  { %3293 = vmatpush.bf16.msra.mxu0 %v3273_v15  ;;  %3306 = vmatpush.bf16.msra.mxu2 %v3274_v21  ;;  %v4957_v15 = vor.u32 %v5304_v52, %v4954_v61  ;;  %v3269_v21 = vpack.c.bf16 %v3261_v2, %v3260_v24  ;;  %v5320_v57 = vld [vmem:[#allocation2 + $0x3b0] sm:$0xff]  ;;  %v5310_v9 = vld [vmem:[#allocation2 + $0x2a0] sm:$0xff]  ;;  %v5317_v42 = vld [vmem:[#allocation2 + $0x398] sm:$0xff] }
 0x6d1   :  { %3319 = vmatpush.bf16.msrb.mxu1 %v3275_v60  ;;  %v5327_v60 = vld [vmem:[#allocation2 + $0x268] sm:$0xff]  ;;  %v5312_v44 = vld [vmem:[#allocation2 + $0x2b0] sm:$0xff]  ;;  %3721 = vmatpush.bf16.msrb.mxu3 %v5320_v57  ;;  %v5309_v2 = vld [vmem:[#allocation2 + $0x298] sm:$0xff] }
 0x6d2   :  { %v5316_v52 = vld [vmem:[#allocation2 + $0x390] sm:$0xff]  ;;  %v5631_v61 = vld [vmem:[%s8227_s0] sm:$0xff]  ;;  %v5315_v34 = vld [vmem:[#allocation2 + $0x388] sm:$0xff] }
 0x6d3   :  { %v7830_v10 = vadd.f32 %v5631_v61, %v7740_v48  ;;  %v5308_v62 = vld [vmem:[#allocation2 + $0x290] sm:$0xff]  ;;  %v5314_v29 = vld [vmem:[#allocation2 + $0x380] sm:$0xff]  ;;  %v5307_v24 = vld [vmem:[#allocation2 + $0x288] sm:$0xff] }
 0x6d4   :  { %3294 = vmatpush.bf16.msra.mxu0 %v3270_v25  ;;  %3307 = vmatpush.bf16.msra.mxu2 %v3271_v37  ;;  %v5319_v25 = vld [vmem:[#allocation2 + $0x3a8] sm:$0xff] }
 0x6d5   :  { %3320 = vmatpush.bf16.msrb.mxu1 %v3272_v4  ;;  %v5311_v37 = vld [vmem:[#allocation2 + $0x2a8] sm:$0xff]  ;;  %3722 = vmatpush.bf16.msrb.mxu3 %v5319_v25  ;;  %v8594_v4 = vld [vmem:[#allocation25_spill] sm:$0xff]  ;;  %8595 = vst [vmem:[#allocation49_spill] sm:$0xff] %v7830_v10  ;;  %v3772_v7 = vpack.c.bf16 %v7830_v10, %v7830_v10  ;;  %v8601_v10 = vld [vmem:[#allocation94_spill] sm:$0xff] }
 0x6d8   :  { %3295 = vmatpush.bf16.msra.mxu0 %v3267_v43  ;;  %3308 = vmatpush.bf16.msra.mxu2 %v3268_v49 }
 0x6d9   :  { %3321 = vmatpush.bf16.msrb.mxu1 %v3269_v21  ;;  %3723 = vmatpush.bf16.msrb.mxu3 %v5318_v39 }
 0x6db   :  { %4945 = vmatmul.msk.bf16.vlgmr.msra.gmra.mxu0 %vm1668_vm7, %v7705_v46  ;;  %4946 = vmatmul.msk.bf16.vlgmr.msra.gmra.mxu2 %vm1668_vm7, %v7705_v46 }
 0x6dc   :  { %3354 = vmatpush.bf16.msrb.mxu0 %v4953_v35  ;;  %3382 = vmatpush.bf16.msrb.mxu2 %v4957_v15  ;;  %v5306_v35 = vld [vmem:[#allocation2 + $0x280] sm:$0xff] }
 0x6dd   :  { %4947 = vmatmul.msk.bf16.vlgmr.msrb.gmra.mxu1 %vm1668_vm7, %v7705_v46  ;;  %v5325_v46 = vld [vmem:[#allocation2 + $0x258] sm:$0xff]  ;;  %3724 = vmatpush.bf16.msrb.mxu3 %v5317_v42 }
 0x6de   :  { %3614 = vmatpush.bf16.msra.mxu1 %v5313_v22 }
 0x6e0   :  { %3821 = vmatpush.bf16.msra.mxu0 %v5329_v13 }
 0x6e1   :  { %3725 = vmatpush.bf16.msrb.mxu3 %v5316_v52 }
 0x6e2   :  { %3615 = vmatpush.bf16.msra.mxu1 %v5312_v44 }
 0x6e4   :  { %3822 = vmatpush.bf16.msra.mxu0 %v5328_v36 }
 0x6e5   :  { %3726 = vmatpush.bf16.msrb.mxu3 %v5315_v34 }
 0x6e6   :  { %3616 = vmatpush.bf16.msra.mxu1 %v5311_v37 }
 0x6e8   :  { %3823 = vmatpush.bf16.msra.mxu0 %v5327_v60 }
 0x6e9   :  { %3727 = vmatpush.bf16.msrb.mxu3 %v5314_v29 }
 0x6ea   :  { %3617 = vmatpush.bf16.msra.mxu1 %v5310_v9 }
 0x6eb   :  { %4958 = vmatmul.msk.bf16.vlgmr.msrb.gmra.mxu0 %vm1740_vm2, %v8591_v12  ;;  %4962 = vmatmul.msk.bf16.vlgmr.msrb.gmra.mxu2 %vm1740_vm2, %v8591_v12 }
 0x6ec   :  { %3824 = vmatpush.bf16.msra.mxu0 %v5326_v16 }
 0x6ee   :  { %3618 = vmatpush.bf16.msra.mxu1 %v5309_v2 }
 0x6f0   :  { %3825 = vmatpush.bf16.msra.mxu0 %v5325_v46 }
 0x6f2   :  { %3619 = vmatpush.bf16.msra.mxu1 %v5308_v62 }
 0x6f4   :  { %3826 = vmatpush.bf16.msra.mxu0 %v5324_v40  ;;  %v7857_v40 = vld [vmem:[%s8235_s8 + $0x8] ss:$0 sm:$0xff] }
 0x6f6   :  { %3620 = vmatpush.bf16.msra.mxu1 %v5307_v24 }
 0x6f8   :  { %3827 = vmatpush.bf16.msra.mxu0 %v5323_v53 }
 0x6fa   :  { %3621 = vmatpush.bf16.msra.mxu1 %v5306_v35 }
 0x6fb   :  { %4959 = vmatmul.msk.bf16.gmra.mxu0 %vm1740_vm2, %v8592_v19  ;;  %4963 = vmatmul.msk.bf16.gmra.mxu2 %vm1740_vm2, %v8592_v19 }
 0x6fc   :  { %3828 = vmatpush.bf16.msra.mxu0 %v5322_v45 }
 0x70b   :  { %4960 = vmatmul.msk.bf16.gmra.mxu0 %vm1740_vm2, %v8593_v14  ;;  %4964 = vmatmul.msk.bf16.gmra.mxu2 %vm1740_vm2, %v8593_v14 }
 0x71b   :  { %4961 = vmatmul.msk.bf16.gmra.mxu0 %vm1740_vm2, %v8594_v4  ;;  %4965 = vmatmul.msk.bf16.gmra.mxu2 %vm1740_vm2, %v8594_v4 }
 0x72b   :  { %3829 = vmatmul.bf16.vlgmr.msra.gmra.mxu0 %v3772_v7 }
 0x758   :  { %v3297_v43 = vpop.f32.mrf.mxu0 }
 0x759   :  { %v7835_v49 = vadd.f32 %v3297_v43, %v8566_v0 }
 0x75a   :  { %v3323_v48 = vpop.f32.mrf.mxu1 }
 0x75b   :  { %8596 = vst [vmem:[#allocation50_spill] sm:$0xff] %v7835_v49  ;;  %v7838_v15 = vadd.f32 %v3323_v48, %v8568_v56  ;;  %v3835_v21 = vpack.c.bf16 %v7835_v49, %v7835_v49 }
 0x75d   :  { %8597 = vst [vmem:[#allocation60_spill] sm:$0xff] %v7838_v15  ;;  %v3837_v12 = vpack.c.bf16 %v7838_v15, %v7838_v15  ;;  %v3842_v13 = vsel %vm1512_vm15, %v3835_v21, 0 }
 0x75e   :  { %v3310_v36 = vpop.f32.mrf.mxu2  ;;  %3885 = vmatpush.bf16.msrb.mxu0 %v3842_v13 }
 0x75f   :  { %v3848_v60 = vsel %vm1512_vm15, %v3837_v12, 0  ;;  %v7847_v16 = vadd.f32 %v3310_v36, %v8567_v59 }
 0x760   :  { %3941 = vmatpush.bf16.msra.mxu3 %v3848_v60  ;;  %v3299_v0 = vpop.f32.mrf.mxu0 }
 0x761   :  { %v3836_v56 = vpack.c.bf16 %v7847_v16, %v7847_v16  ;;  %5080 = vmatmul.msk.bf16.vlgmr.msrb.gmra.mxu0 %vm1499_vm1, %v7748_v11 }
 0x762   :  { %v3325_v19 = vpop.f32.mrf.mxu1 }
 0x763   :  { %v3845_v46 = vsel %vm1512_vm15, %v3836_v56, 0 }
 0x764   :  { %3913 = vmatpush.bf16.msrb.mxu1 %v3845_v46 }
 0x766   :  { %v3312_v53 = vpop.f32.mrf.mxu2 }
 0x768   :  { %v3356_v59 = vpop.f32.mrf.mxu0 }
 0x769   :  { %v7860_v45 = vadd.f32 %v7857_v40, %v3356_v59 }
 0x76b   :  { %v3417_v14 = vand.u32 2147483647, %v7860_v45 }
 0x76d   :  { %v3431_v22 = vsub.f32 0.0, %v3417_v14 }
 0x76e   :  { %v3384_v57 = vpop.f32.mrf.mxu2 }
 0x76f   :  { %v3445_v44 = vmul.f32 1.442695, %v3431_v22  ;;  %v7869_v25 = vadd.f32 %v7866_v1, %v3384_v57 }
 0x770   :  { %v3358_v37 = vpop.f32.mrf.mxu0 }
 0x771   :  { %5546 = vpow2.f32 %v3445_v44  ;;  %v3418_v39 = vand.u32 2147483647, %v7869_v25  ;;  %v3359_v9 = vadd.f32 %v7857_v40, %v3358_v37  ;;  %5081 = vmatmul.msk.bf16.gmra.mxu0 %vm1499_vm1, %v7755_v23 }
 0x773   :  { %v3432_v42 = vsub.f32 0.0, %v3418_v39  ;;  %v3419_v2 = vand.u32 2147483647, %v3359_v9 }
 0x775   :  { %v3447_v4 = vmul.f32 1.442695, %v3432_v42  ;;  %v3433_v52 = vsub.f32 0.0, %v3419_v2 }
 0x776   :  { %v3386_v61 = vpop.f32.mrf.mxu2 }
 0x777   :  { %v5547_v7 = vpop.eup %5546  ;;  %5548 = vpow2.f32 %v3447_v4  ;;  %v3449_v34 = vmul.f32 1.442695, %v3433_v52  ;;  %v7876_v62 = vadd.f32 %v7866_v1, %v3386_v61 }
 0x778   :  { %v3473_v29 = vadd.f32 1.0, %v5547_v7  ;;  %v3361_v24 = vpop.f32.mrf.mxu0 }
 0x779   :  { %5550 = vpow2.f32 %v3449_v34  ;;  %v3420_v35 = vand.u32 2147483647, %v7876_v62  ;;  %v7880_v43 = vadd.f32 %v7857_v40, %v3361_v24 }
 0x77a   :  { %5552 = vlog2.f32 %v3473_v29  ;;  %v3403_v29 = vmax.f32 %v7860_v45, 0.0 }
 0x77b   :  { %v3434_v48 = vsub.f32 0.0, %v3420_v35  ;;  %v3421_v21 = vand.u32 2147483647, %v7880_v43 }
 0x77d   :  { %v5549_v12 = vpop.eup %5548  ;;  %v3451_v13 = vmul.f32 1.442695, %v3434_v48  ;;  %v3435_v36 = vsub.f32 0.0, %v3421_v21 }
 0x77e   :  { %v3474_v60 = vadd.f32 1.0, %v5549_v12  ;;  %v3389_v0 = vpop.f32.mrf.mxu2 }
 0x77f   :  { %v5551_v56 = vpop.eup %5550  ;;  %5554 = vpow2.f32 %v3451_v13  ;;  %v3453_v19 = vmul.f32 1.442695, %v3435_v36  ;;  %v7884_v46 = vadd.f32 %v7866_v1, %v3389_v0  ;;  %v3405_v13 = vmax.f32 %v3359_v9, 0.0 }
 0x780   :  { %5556 = vlog2.f32 %v3474_v60  ;;  %v3475_v53 = vadd.f32 1.0, %v5551_v56  ;;  %v3363_v59 = vpop.f32.mrf.mxu0  ;;  %v5553_v22 = vpop.eup %5552 }
 0x781   :  { %5558 = vpow2.f32 %v3453_v19  ;;  %v3422_v14 = vand.u32 2147483647, %v7884_v46  ;;  %5082 = vmatmul.msk.bf16.gmra.mxu0 %vm1499_vm1, %v7762_v26  ;;  %v7890_v57 = vadd.f32 %v7857_v40, %v3363_v59  ;;  %v3488_v42 = vmul.f32 0.6931472, %v5553_v22 }
 0x782   :  { %5560 = vlog2.f32 %v3475_v53  ;;  %v3404_v59 = vmax.f32 %v7869_v25, 0.0 }
 0x783   :  { %v3436_v44 = vsub.f32 0.0, %v3422_v14  ;;  %v3423_v37 = vand.u32 2147483647, %v7890_v57  ;;  %v3515_v12 = vadd.f32 %v3488_v42, %v3403_v29  ;;  %v3406_v14 = vmax.f32 %v7876_v62, 0.0 }
 0x785   :  { %v5555_v39 = vpop.eup %5554  ;;  %v3455_v2 = vmul.f32 1.442695, %v3436_v44  ;;  %v3437_v61 = vsub.f32 0.0, %v3423_v37  ;;  %v4966_v37 = vadd.f32 -0.6931472, %v3515_v12 }
 0x786   :  { %v5557_v4 = vpop.eup %5556  ;;  %v3476_v52 = vadd.f32 1.0, %v5555_v39  ;;  %v3391_v7 = vpop.f32.mrf.mxu2 }
 0x787   :  { %v5559_v34 = vpop.eup %5558  ;;  %5562 = vpow2.f32 %v3455_v2  ;;  %v7895_v24 = vadd.f32 %v7866_v1, %v3391_v7  ;;  %v3457_v48 = vmul.f32 1.442695, %v3437_v61  ;;  %v3490_v0 = vmul.f32 0.6931472, %v5557_v4 }
 0x788   :  { %v5561_v35 = vpop.eup %5560  ;;  %5564 = vlog2.f32 %v3476_v52  ;;  %v3366_v21 = vpop.f32.mrf.mxu0  ;;  %v3477_v56 = vadd.f32 1.0, %v5559_v34 }
 0x789   :  { %v3492_v36 = vmul.f32 0.6931472, %v5561_v35  ;;  %v3424_v60 = vand.u32 2147483647, %v7895_v24  ;;  %v7899_v19 = vadd.f32 %v7857_v40, %v3366_v21  ;;  %5566 = vpow2.f32 %v3457_v48 }
 0x78a   :  { %v3516_v2 = vadd.f32 %v3490_v0, %v3404_v59  ;;  %5568 = vlog2.f32 %v3477_v56 }
 0x78b   :  { %v3517_v53 = vadd.f32 %v3492_v36, %v3405_v13  ;;  %v3438_v45 = vsub.f32 0.0, %v3424_v60  ;;  %v3425_v22 = vand.u32 2147483647, %v7899_v19 }
 0x78c   :  { %v4967_v36 = vadd.f32 -0.6931472, %v3516_v2 }
 0x78d   :  { %v5563_v44 = vpop.eup %5562  ;;  %v4968_v9 = vadd.f32 -0.6931472, %v3517_v53  ;;  %v3459_v39 = vmul.f32 1.442695, %v3438_v45  ;;  %v3439_v52 = vsub.f32 0.0, %v3425_v22 }
 0x78e   :  { %v5565_v42 = vpop.eup %5564  ;;  %v3478_v4 = vadd.f32 1.0, %v5563_v44  ;;  %v3394_v61 = vpop.f32.mrf.mxu2 }
 0x78f   :  { %v3561_v7 = vpack.c.bf16 %v4968_v9, %v4966_v37  ;;  %v3494_v34 = vmul.f32 0.6931472, %v5565_v42  ;;  %5570 = vpow2.f32 %v3459_v39  ;;  %v7905_v29 = vadd.f32 %v7866_v1, %v3394_v61  ;;  %v5567_v35 = vpop.eup %5566 }
 0x790   :  { %v3461_v25 = vmul.f32 1.442695, %v3439_v52  ;;  %v3368_v62 = vpop.f32.mrf.mxu0  ;;  %5572 = vlog2.f32 %v3478_v4  ;;  %v3479_v12 = vadd.f32 1.0, %v5567_v35  ;;  %v5569_v56 = vpop.eup %5568 }
 0x791   :  { %v3518_v48 = vadd.f32 %v3494_v34, %v3406_v14  ;;  %v3426_v21 = vand.u32 2147483647, %v7905_v29  ;;  %3622 = vmatmul.bf16.vlgmr.msra.gmra.mxu1 %v3561_v7  ;;  %5083 = vmatmul.msk.bf16.gmra.mxu0 %vm1499_vm1, %v8569_v58  ;;  %v7911_v13 = vadd.f32 %v7857_v40, %v3368_v62  ;;  %v3496_v2 = vmul.f32 0.6931472, %v5569_v56 }
 0x792   :  { %5574 = vpow2.f32 %v3461_v25  ;;  %v3407_v25 = vmax.f32 %v7880_v43, 0.0 }
 0x793   :  { %v4969_v60 = vadd.f32 -0.6931472, %v3518_v48  ;;  %v3440_v0 = vsub.f32 0.0, %v3426_v21  ;;  %5576 = vlog2.f32 %v3479_v12  ;;  %v3427_v53 = vand.u32 2147483647, %v7911_v13 }
 0x794   :  { %v3409_v48 = vmax.f32 %v7890_v57, 0.0 }
 0x795   :  { %v5571_v45 = vpop.eup %5570  ;;  %v3667_v59 = vpack.c.bf16 %v4969_v60, %v4967_v36  ;;  %v3463_v14 = vmul.f32 1.442695, %v3440_v0  ;;  %v3441_v44 = vsub.f32 0.0, %v3427_v53  ;;  %v3519_v36 = vadd.f32 %v3496_v2, %v3407_v25 }
 0x796   :  { %v3480_v22 = vadd.f32 1.0, %v5571_v45  ;;  %v3396_v37 = vpop.f32.mrf.mxu2  ;;  %v5573_v9 = vpop.eup %5572  ;;  %v3408_v60 = vmax.f32 %v7884_v46, 0.0 }
 0x797   :  { %5578 = vpow2.f32 %v3463_v14  ;;  %v7915_v39 = vadd.f32 %v7866_v1, %v3396_v37  ;;  %3728 = vmatmul.bf16.vlgmr.msrb.gmra.mxu3 %v3667_v59  ;;  %v3465_v4 = vmul.f32 1.442695, %v3441_v44  ;;  %v3498_v62 = vmul.f32 0.6931472, %v5573_v9 }
 0x798   :  { %v5575_v42 = vpop.eup %5574  ;;  %5580 = vlog2.f32 %v3480_v22  ;;  %v3371_v52 = vpop.f32.mrf.mxu0  ;;  %v3410_v14 = vmax.f32 %v7895_v24, 0.0 }
 0x799   :  { %v3481_v61 = vadd.f32 1.0, %v5575_v42  ;;  %v3428_v7 = vand.u32 2147483647, %v7915_v39  ;;  %v5577_v34 = vpop.eup %5576  ;;  %5582 = vpow2.f32 %v3465_v4  ;;  %v7920_v35 = vadd.f32 %v7857_v40, %v3371_v52 }
 0x79a   :  { %v3500_v21 = vmul.f32 0.6931472, %v5577_v34  ;;  %v3520_v43 = vadd.f32 %v3498_v62, %v3408_v60  ;;  %v4970_v42 = vadd.f32 -0.6931472, %v3519_v36 }
 0x79b   :  { %v3442_v12 = vsub.f32 0.0, %v3428_v7  ;;  %v3429_v0 = vand.u32 2147483647, %v7920_v35  ;;  %5584 = vlog2.f32 %v3481_v61 }
 0x79c   :  { %v3521_v53 = vadd.f32 %v3500_v21, %v3409_v48  ;;  %v4971_v25 = vadd.f32 -0.6931472, %v3520_v43 }
 0x79d   :  { %v5579_v56 = vpop.eup %5578  ;;  %v3467_v45 = vmul.f32 1.442695, %v3442_v12  ;;  %v3443_v40 = vsub.f32 0.0, %v3429_v0 }
 0x79e   :  { %v5581_v59 = vpop.eup %5580  ;;  %v3482_v22 = vadd.f32 1.0, %v5579_v56  ;;  %v3399_v44 = vpop.f32.mrf.mxu2  ;;  %v4972_v37 = vadd.f32 -0.6931472, %v3521_v53 }
 0x79f   :  { %v3502_v57 = vmul.f32 0.6931472, %v5581_v59  ;;  %5586 = vpow2.f32 %v3467_v45  ;;  %v7927_v9 = vadd.f32 %v7866_v1, %v3399_v44  ;;  %v5583_v46 = vpop.eup %5582  ;;  %v3469_v2 = vmul.f32 1.442695, %v3443_v40 }
 0x7a0   :  { %v3373_v4 = vpop.f32.mrf.mxu0  ;;  %5588 = vlog2.f32 %v3482_v22  ;;  %v3483_v61 = vadd.f32 1.0, %v5583_v46  ;;  %v3562_v24 = vpack.c.bf16 %v4972_v37, %v4970_v42  ;;  %v3411_v45 = vmax.f32 %v7899_v19, 0.0 }
 0x7a1   :  { %v3522_v52 = vadd.f32 %v3502_v57, %v3410_v14  ;;  %v3430_v7 = vand.u32 2147483647, %v7927_v9  ;;  %5590 = vpow2.f32 %v3469_v2  ;;  %v5585_v34 = vpop.eup %5584  ;;  %v3413_v44 = vmax.f32 %v7911_v13, 0.0 }
 0x7a2   :  { %5592 = vlog2.f32 %v3483_v61  ;;  %3627 = vmatmul.bf16.gmra.mxu1 %v3562_v24  ;;  %v3504_v60 = vmul.f32 0.6931472, %v5585_v34  ;;  %v3412_v4 = vmax.f32 %v7905_v29, 0.0  ;;  %v3414_v34 = vmax.f32 %v7915_v39, 0.0 }
 0x7a3   :  { %v4973_v62 = vadd.f32 -0.6931472, %v3522_v52  ;;  %v3444_v48 = vsub.f32 0.0, %v3430_v7 }
 0x7a4   :  { %v3523_v40 = vadd.f32 %v3504_v60, %v3411_v45 }
 0x7a5   :  { %v5587_v21 = vpop.eup %5586  ;;  %v3471_v1 = vmul.f32 1.442695, %v3444_v48  ;;  %v3668_v12 = vpack.c.bf16 %v4973_v62, %v4971_v25 }
 0x7a6   :  { %v3484_v36 = vadd.f32 1.0, %v5587_v21  ;;  %v3401_v0 = vpop.f32.mrf.mxu2  ;;  %v5589_v56 = vpop.eup %5588  ;;  %v4974_v19 = vadd.f32 -0.6931472, %v3523_v40 }
 0x7a7   :  { %5594 = vpow2.f32 %v3471_v1  ;;  %3733 = vmatmul.bf16.gmra.mxu3 %v3668_v12  ;;  %v5591_v53 = vpop.eup %5590  ;;  %v3506_v57 = vmul.f32 0.6931472, %v5589_v56  ;;  %v3415_v0 = vmax.f32 %v7920_v35, 0.0 }
 0x7a8   :  { %5596 = vlog2.f32 %v3484_v36  ;;  %v3830_v59 = vpop.f32.mrf.mxu0  ;;  %v5593_v14 = vpop.eup %5592  ;;  %v3485_v43 = vadd.f32 1.0, %v5591_v53  ;;  %v3416_v53 = vmax.f32 %v7927_v9, 0.0 }
 0x7a9   :  { %v3834_v22 = vpack.c.bf16 %v3830_v59, %v3830_v59  ;;  %v3508_v37 = vmul.f32 0.6931472, %v5593_v14  ;;  %v3524_v24 = vadd.f32 %v3506_v57, %v3412_v4 }
 0x7aa   :  { %5598 = vlog2.f32 %v3485_v43 }
 0x7ab   :  { %v3839_v46 = vsel %vm1512_vm15, %v3834_v22, 0  ;;  %v3525_v42 = vadd.f32 %v3508_v37, %v3413_v44  ;;  %v4975_v1 = vadd.f32 -0.6931472, %v3524_v24 }
 0x7ac   :  { %3857 = vmatpush.bf16.msra.mxu2 %v3839_v46 }
 0x7ad   :  { %v5595_v2 = vpop.eup %5594  ;;  %v4976_v61 = vadd.f32 -0.6931472, %v3525_v42 }
 0x7ae   :  { %v5597_v52 = vpop.eup %5596  ;;  %v3486_v7 = vadd.f32 1.0, %v5595_v2 }
 0x7af   :  { %v3510_v25 = vmul.f32 0.6931472, %v5597_v52  ;;  %5076 = vmatmul.msk.bf16.vlgmr.msra.gmra.mxu2 %vm1499_vm1, %v7748_v11  ;;  %v3563_v62 = vpack.c.bf16 %v4976_v61, %v4974_v19  ;;  %v5428_v61 = vld [vmem:[%s8235_s8 + $0x9] ss:$0 sm:$0xff] }
 0x7b0   :  { %5600 = vlog2.f32 %v3486_v7  ;;  %v3832_v13 = vpop.f32.mrf.mxu0  ;;  %v5599_v21 = vpop.eup %5598 }
 0x7b1   :  { %v3526_v48 = vadd.f32 %v3510_v25, %v3414_v34  ;;  %v3512_v36 = vmul.f32 0.6931472, %v5599_v21 }
 0x7b2   :  { %3632 = vmatmul.bf16.gmra.mxu1 %v3563_v62 }
 0x7b3   :  { %v4977_v12 = vadd.f32 -0.6931472, %v3526_v48  ;;  %v3527_v39 = vadd.f32 %v3512_v36, %v3415_v0 }
 0x7b5   :  { %v3669_v29 = vpack.c.bf16 %v4977_v12, %v4975_v1  ;;  %v4978_v59 = vadd.f32 -0.6931472, %v3527_v39 }
 0x7b6   :  { %v5601_v60 = vpop.eup %5600 }
 0x7b7   :  { %3738 = vmatmul.bf16.gmra.mxu3 %v3669_v29  ;;  %v3514_v56 = vmul.f32 0.6931472, %v5601_v60  ;;  %v3564_v43 = vpack.c.bf16 %v4978_v59, %v4978_v59 }
 0x7b9   :  { %v3528_v45 = vadd.f32 %v3514_v56, %v3416_v53 }
 0x7bb   :  { %v4979_v14 = vadd.f32 -0.6931472, %v3528_v45 }
 0x7bd   :  { %v3670_v22 = vpack.c.bf16 %v4979_v14, %v4979_v14  ;;  %v8599_v14 = vld [vmem:[#allocation88_spill] sm:$0xff] }
 0x7bf   :  { %5077 = vmatmul.msk.bf16.gmra.mxu2 %vm1499_vm1, %v7755_v23 }
 0x7c2   :  { %3637 = vmatmul.bf16.gmra.mxu1 %v3564_v43 }
 0x7c7   :  { %3743 = vmatmul.bf16.gmra.mxu3 %v3670_v22 }
 0x7cf   :  { %5078 = vmatmul.msk.bf16.gmra.mxu2 %vm1499_vm1, %v7762_v26 }
 0x7d2   :  { %5084 = vmatmul.msk.bf16.vlgmr.msrb.gmra.mxu1 %vm1499_vm1, %v7748_v11 }
 0x7d7   :  { %5088 = vmatmul.msk.bf16.vlgmr.msra.gmra.mxu3 %vm1499_vm1, %v7748_v11 }
 0x7de   :  { %v7947_v35 = vpop.f32.mrf.mxu0 }
 0x7df   :  { %5079 = vmatmul.msk.bf16.gmra.mxu2 %vm1499_vm1, %v8569_v58 }
 0x7e2   :  { %5085 = vmatmul.msk.bf16.gmra.mxu1 %vm1499_vm1, %v7755_v23 }
 0x7e6   :  { %v7953_v9 = vpop.f32.mrf.mxu0 }
 0x7e7   :  { %5089 = vmatmul.msk.bf16.gmra.mxu3 %vm1499_vm1, %v7755_v23  ;;  %v3963_v60 = vmul.f32 %v7953_v9, %v8540_v18 }
 0x7ee   :  { %v7957_v40 = vpop.f32.mrf.mxu0 }
 0x7f2   :  { %5086 = vmatmul.msk.bf16.gmra.mxu1 %vm1499_vm1, %v7762_v26 }
 0x7f6   :  { %v7961_v44 = vpop.f32.mrf.mxu0 }
 0x7f7   :  { %5090 = vmatmul.msk.bf16.gmra.mxu3 %vm1499_vm1, %v7762_v26 }
 0x7fe   :  { %v7965_v11 = vpop.f32.mrf.mxu0 }
 0x802   :  { %5087 = vmatmul.msk.bf16.gmra.mxu1 %vm1499_vm1, %v8569_v58 }
 0x806   :  { %v7969_v37 = vpop.f32.mrf.mxu0 }
 0x807   :  { %5091 = vmatmul.msk.bf16.gmra.mxu3 %vm1499_vm1, %v8569_v58 }
 0x80e   :  { %v3623_v23 = vpop.f32.mrf.mxu1  ;;  %v7973_v57 = vpop.f32.mrf.mxu0 }
 0x80f   :  { %v3624_v58 = vadd.f32 %v5428_v61, %v3623_v23 }
 0x811   :  { %v3642_v13 = vmul.f32 %v3624_v58, %v6971_v33 }
 0x816   :  { %v3904_v46 = vpop.f32.mrf.mxu0  ;;  %v3625_v42 = vpop.f32.mrf.mxu1 }
 0x817   :  { %v3626_v25 = vadd.f32 %v5428_v61, %v3625_v42  ;;  %v8005_v42 = vld [vmem:[%s8235_s8 + $0xe] ss:$0 sm:$0xff] }
 0x819   :  { %v3643_v48 = vmul.f32 %v3626_v25, %v6864_v6  ;;  %v8598_v6 = vld [vmem:[#allocation79_spill] sm:$0xff] }
 0x81a   :  { %v3729_v2 = vpop.f32.mrf.mxu3  ;;  %v3962_v59 = vmul.f32 %v7947_v35, %v8598_v6 }
 0x81f   :  { %v3628_v4 = vpop.f32.mrf.mxu1 }
 0x822   :  { %v3731_v52 = vpop.f32.mrf.mxu3 }
 0x827   :  { %v3630_v19 = vpop.f32.mrf.mxu1 }
 0x828   :  { %v3631_v49 = vadd.f32 %v5428_v61, %v3630_v19 }
 0x82a   :  { %v7975_v26 = vpop.f32.mrf.mxu3 }
 0x82f   :  { %v3633_v7 = vpop.f32.mrf.mxu1 }
 0x832   :  { %v7980_v24 = vpop.f32.mrf.mxu3  ;;  %v3859_v34 = vpop.f32.mrf.mxu2 }
 0x833   :  { %v7986_v12 = vmul.f32 %v3859_v34, %v3642_v13  ;;  %v8600_v13 = vld [vmem:[#allocation87_spill] sm:$0xff] }
 0x837   :  { %v3635_v62 = vpop.f32.mrf.mxu1 }
 0x83a   :  { %v7984_v21 = vpop.f32.mrf.mxu3  ;;  %v3861_v1 = vpop.f32.mrf.mxu2 }
 0x83b   :  { %v7988_v29 = vmul.f32 %v3861_v1, %v3643_v48  ;;  %v3730_v1 = vadd.f32 %v8005_v42, %v3729_v2 }
 0x83d   :  { %v8021_v15 = vmul.f32 %v3730_v1, %v8601_v10  ;;  %v3732_v10 = vadd.f32 %v8005_v42, %v3731_v52 }
 0x83f   :  { %v3638_v36 = vpop.f32.mrf.mxu1 }
 0x842   :  { %v7992_v0 = vpop.f32.mrf.mxu3  ;;  %v3864_v56 = vpop.f32.mrf.mxu2 }
 0x847   :  { %v3640_v39 = vpop.f32.mrf.mxu1 }
 0x848   :  { %v3639_v39 = vadd.f32 %v5428_v61, %v3638_v36 }
 0x84a   :  { %v7994_v53 = vpop.f32.mrf.mxu3  ;;  %v3866_v33 = vpop.f32.mrf.mxu2  ;;  %v3648_v36 = vmul.f32 %v3639_v39, %v8547_v54  ;;  %v8602_v54 = vld [vmem:[#allocation28_spill] sm:$0xff] }
 0x84f   :  { %v7996_v45 = vpop.f32.mrf.mxu1 }
 0x850   :  { %v3969_v43 = vmul.f32 %v7996_v45, %v8599_v14 }
 0x852   :  { %v3746_v22 = vpop.f32.mrf.mxu3  ;;  %v3869_v23 = vpop.f32.mrf.mxu2  ;;  %v3976_v46 = vadd.f32 %v3969_v43, %v3962_v59 }
 0x853   :  { %v3636_v22 = vadd.f32 %v5428_v61, %v3635_v62 }
 0x855   :  { %v3647_v18 = vmul.f32 %v3636_v22, %v6462_v55  ;;  %v8604_v55 = vld [vmem:[#allocation27_spill] sm:$0xff] }
 0x856   :  { %v3645_v19 = vmul.f32 %v3631_v49, %v8604_v55 }
 0x857   :  { %v8007_v34 = vpop.f32.mrf.mxu1 }
 0x858   :  { %v3970_v14 = vmul.f32 %v8007_v34, %v8545_v8 }
 0x85a   :  { %v3871_v58 = vpop.f32.mrf.mxu2  ;;  %v3943_v25 = vpop.f32.mrf.mxu3  ;;  %v3977_v47 = vadd.f32 %v3970_v14, %v3963_v60 }
 0x85b   :  { %v3983_v48 = vmul.f32 %v3943_v25, %v8600_v13  ;;  %v4053_v59 = vmul.f32 %v3943_v25, %v8509_v51  ;;  %v4086_v39 = vmul.f32 %v3871_v58, %v3647_v18 }
 0x85d   :  { %v8011_v6 = vadd.f32 %v3983_v48, %v3976_v46  ;;  %v3634_v46 = vadd.f32 %v5428_v61, %v3633_v7 }
 0x85f   :  { %v4060_v43 = vmul.f32 %v8011_v6, %v7565_v41  ;;  %v8023_v2 = vpop.f32.mrf.mxu1  ;;  %v3646_v7 = vmul.f32 %v3634_v46, %v8602_v54  ;;  %v4084_v46 = vmul.f32 %v3866_v33, %v3645_v19  ;;  %v8608_v54 = vld [vmem:[#allocation80_spill] sm:$0xff]  ;;  %v8609_v33 = vld [vmem:[#allocation13_spill] sm:$0xff] }
 0x860   :  { %v3971_v60 = vmul.f32 %v8023_v2, %v8603_v28  ;;  %v8606_v28 = vld [vmem:[#allocation19_spill] sm:$0xff] }
 0x861   :  { %v4067_v13 = vsub.f32 %v4053_v59, %v4060_v43  ;;  %v3629_v43 = vadd.f32 %v5428_v61, %v3628_v4  ;;  %v4085_v52 = vmul.f32 %v3869_v23, %v3646_v7  ;;  %v8045_v61 = vmul.f32 %v3732_v10, %v7685_v63  ;;  %v8607_v23 = vld [vmem:[#allocation70_spill] sm:$0xff] }
 0x862   :  { %v3874_v48 = vpop.f32.mrf.mxu2  ;;  %v3945_v8 = vpop.f32.mrf.mxu3  ;;  %v3735_v63 = vadd.f32 %v8005_v42, %v7975_v26 }
 0x863   :  { %v8027_v25 = vmul.f32 %v4067_v13, %v8021_v15  ;;  %v4087_v41 = vmul.f32 %v3874_v48, %v3648_v36  ;;  %v3984_v62 = vmul.f32 %v3945_v8, %v7473_v31  ;;  %v4054_v13 = vmul.f32 %v3945_v8, %v8524_v27 }
 0x864   :  { %v3644_v36 = vmul.f32 %v3629_v43, %v8606_v28  ;;  %v4096_v48 = vpack.c.bf16 %v4086_v39, %v4085_v52  ;;  %v8610_v39 = vld [vmem:[#allocation11_spill] sm:$0xff]  ;;  %v8614_v28 = vpack.c.bf16 %v7988_v29, %v7986_v12  ;;  %v4000_v12 = vmul.f32 %v7961_v44, %v8519_v3 }
 0x865   :  { %v4100_v1 = vpack.c.bf16 %v4087_v41, %v4087_v41  ;;  %v8032_v59 = vadd.f32 %v3984_v62, %v3977_v47  ;;  %v8605_v47 = vld [vmem:[#allocation72_spill] sm:$0xff]  ;;  %v8615_v29 = vld [vmem:[#allocation63_spill] sm:$0xff] }
 0x866   :  { %v3964_v4 = vmul.f32 %v7957_v40, %v8605_v47  ;;  %v4083_v18 = vmul.f32 %v3864_v56, %v3644_v36  ;;  %v3737_v36 = vadd.f32 %v8005_v42, %v7980_v24 }
 0x867   :  { %v4105_v14 = vsel %vm1512_vm15, %v4100_v1, 0  ;;  %v4061_v31 = vmul.f32 %v8032_v59, %v7673_v17  ;;  %v8047_v22 = vpop.f32.mrf.mxu1 }
 0x868   :  { %4120 = vmatpush.bf16.msrb.mxu2 %v4105_v14  ;;  %v3978_v17 = vadd.f32 %v3971_v60, %v3964_v4  ;;  %v4092_v1 = vpack.c.bf16 %v4084_v46, %v4083_v18  ;;  %v3972_v43 = vmul.f32 %v8047_v22, %v8608_v54  ;;  %v8611_v60 = vld [vmem:[#allocation65_spill] sm:$0xff]  ;;  %v8618_v18 = vld [vmem:[#allocation55_spill] sm:$0xff] }
 0x869   :  { %v4068_v58 = vsub.f32 %v4054_v13, %v4061_v31  ;;  %v3965_v13 = vmul.f32 %v7961_v44, %v8611_v60  ;;  %v8612_v31 = vld [vmem:[#allocation96_spill] sm:$0xff]  ;;  %v8613_v4 = vld [vmem:[#allocation81_spill] sm:$0xff] }
 0x86a   :  { %v3948_v8 = vpop.f32.mrf.mxu3  ;;  %v3876_v41 = vpop.f32.mrf.mxu2  ;;  %v8063_v55 = vmul.f32 %v3735_v63, %v8612_v31  ;;  %v3967_v63 = vmul.f32 %v7969_v37, %v8618_v18 }
 0x86b   :  { %v8051_v49 = vmul.f32 %v4068_v58, %v8045_v61  ;;  %v3985_v62 = vmul.f32 %v3948_v8, %v8607_v23  ;;  %v4055_v7 = vmul.f32 %v3948_v8, %v8609_v33  ;;  %v3979_v26 = vadd.f32 %v3972_v43, %v3965_v13  ;;  %v8620_v43 = vld [vmem:[#allocation90_spill] sm:$0xff] }
 0x86c   :  { %4121 = vmatpush.bf16.msrb.mxu2 %v4096_v48  ;;  %v8076_v48 = vmul.f32 %v7947_v35, %v8509_v51  ;;  %v8080_v8 = vmul.f32 %v7953_v9, %v8524_v27  ;;  %v3999_v41 = vmul.f32 %v7957_v40, %v8609_v33  ;;  %v8094_v9 = vld [vmem:[%s8231_s4] sm:$0xf]  ;;  %v8621_v13 = vld [vmem:[#allocation10_spill] sm:$0xff] }
 0x86d   :  { %v3992_v10 = vadd.f32 %v3985_v62, %v3978_v17  ;;  %v3740_v17 = vadd.f32 %v8005_v42, %v7984_v21  ;;  %v8616_v40 = vld [vmem:[#allocation59_spill] sm:$0xff]  ;;  %v8617_v62 = vld [vmem:[#allocation12_spill] sm:$0xff] }
 0x86e   :  { %v3966_v21 = vmul.f32 %v7965_v11, %v8616_v40  ;;  %v4001_v44 = vmul.f32 %v7965_v11, %v8617_v62  ;;  %v3742_v11 = vadd.f32 %v8005_v42, %v7992_v0  ;;  %v4005_v0 = vmul.f32 %v8032_v59, %v8562_v5  ;;  %v8628_v5 = vld [vmem:[#allocation73_spill] sm:$0xff] }
 0x86f   :  { %v4062_v14 = vmul.f32 %v3992_v10, %v8610_v39  ;;  %v3925_v19 = vpop.f32.mrf.mxu1  ;;  %v3752_v31 = vmul.f32 %v3740_v17, %v8621_v13  ;;  %v4027_v17 = vmul.f32 %v8023_v2, %v8609_v33  ;;  %v4033_v40 = vmul.f32 %v8032_v59, %v7667_v20 }
 0x870   :  { %4122 = vmatpush.bf16.msrb.mxu2 %v4092_v1  ;;  %v3973_v24 = vmul.f32 %v3925_v19, %v8615_v29  ;;  %v8619_v1 = vld [vmem:[#allocation15_spill] sm:$0xff] }
 0x871   :  { %v4069_v56 = vsub.f32 %v4055_v7, %v4062_v14  ;;  %v3751_v54 = vmul.f32 %v3737_v36, %v8619_v1  ;;  %v4006_v7 = vmul.f32 %v3992_v10, %v8620_v43  ;;  %v4029_v1 = vmul.f32 %v3925_v19, %v8617_v62  ;;  %v8627_v43 = vld [vmem:[#allocation75_spill] sm:$0xff] }
 0x872   :  { %v3950_v52 = vpop.f32.mrf.mxu3 }
 0x873   :  { %v8066_v47 = vmul.f32 %v4069_v56, %v8063_v55  ;;  %v3986_v58 = vmul.f32 %v3950_v52, %v8613_v4  ;;  %v4056_v23 = vmul.f32 %v3950_v52, %v8519_v3  ;;  %v4025_v56 = vmul.f32 %v7996_v45, %v8509_v51  ;;  %v8622_v52 = vld [vmem:[#allocation20_spill] sm:$0xff]  ;;  %v8623_v4 = vld [vmem:[#allocation93_spill] sm:$0xff]  ;;  %v8626_v45 = vld [vmem:[#allocation74_spill] sm:$0xff] }
 0x874   :  { %4123 = vmatpush.bf16.msrb.mxu2 %v8614_v28  ;;  %v3980_v28 = vadd.f32 %v3973_v24, %v3966_v21  ;;  %v4028_v21 = vmul.f32 %v8047_v22, %v8519_v3 }
 0x875   :  { %v3993_v46 = vadd.f32 %v3986_v58, %v3979_v26  ;;  %v4032_v58 = vmul.f32 %v8011_v6, %v8623_v4 }
 0x877   :  { %v4063_v35 = vmul.f32 %v3993_v46, %v7480_v38  ;;  %5092 = vmatmul.msk.bf16.vlgmr.msrb.gmra.mxu2 %vm1668_vm7, %v8094_v9  ;;  %v8106_v38 = vmul.f32 %v7969_v37, %v8521_v50  ;;  %v4007_v39 = vmul.f32 %v3993_v46, %v7496_v30  ;;  %v3927_v60 = vpop.f32.mrf.mxu1  ;;  %v4004_v37 = vmul.f32 %v8011_v6, %v8622_v52  ;;  %v8624_v30 = vld [vmem:[#allocation69_spill] sm:$0xff] }
 0x878   :  { %v4013_v6 = vsub.f32 %v3999_v41, %v4006_v7  ;;  %v3974_v2 = vmul.f32 %v3927_v60, %v8627_v43  ;;  %v4030_v4 = vmul.f32 %v3927_v60, %v8521_v50  ;;  %v8633_v43 = vld [vmem:[#allocation86_spill] sm:$0xff] }
 0x879   :  { %v4070_v14 = vsub.f32 %v4056_v23, %v4063_v35  ;;  %v8625_v23 = vld [vmem:[#allocation95_spill] sm:$0xff]  ;;  %v4035_v35 = vmul.f32 %v3993_v46, %v8626_v45  ;;  %v4014_v24 = vsub.f32 %v4000_v12, %v4007_v39  ;;  %v4011_v39 = vsub.f32 %v8076_v48, %v4004_v37 }
 0x87a   :  { %v3953_v26 = vpop.f32.mrf.mxu3  ;;  %v4034_v51 = vmul.f32 %v3992_v10, %v8625_v23  ;;  %v8629_v10 = vld [vmem:[#allocation14_spill] sm:$0xff]  ;;  %v8630_v46 = vld [vmem:[#allocation91_spill] sm:$0xff]  ;;  %v8140_v20 = vmul.f32 %v4013_v6, %v8063_v55  ;;  %v4039_v6 = vsub.f32 %v4025_v56, %v4032_v58 }
 0x87b   :  { %v8120_v36 = vmul.f32 %v4070_v14, %v3751_v54  ;;  %v3987_v29 = vmul.f32 %v3953_v26, %v8624_v30  ;;  %v4057_v33 = vmul.f32 %v3953_v26, %v8617_v62  ;;  %v8142_v59 = vmul.f32 %v4014_v24, %v3751_v54 }
 0x87c   :  { %v4041_v41 = vsub.f32 %v4027_v17, %v4034_v51  ;;  %v4042_v12 = vsub.f32 %v4028_v21, %v4035_v35  ;;  %v4026_v26 = vmul.f32 %v8007_v34, %v8524_v27  ;;  %v3981_v17 = vadd.f32 %v3974_v2, %v3967_v63  ;;  %v8631_v51 = vld [vmem:[#allocation58_spill] sm:$0xff]  ;;  %v8632_v35 = vld [vmem:[#allocation71_spill] sm:$0xff] }
 0x87d   :  { %v3994_v18 = vadd.f32 %v3987_v29, %v3980_v28  ;;  %v4095_v3 = vpack.c.bf16 %v8120_v36, %v8066_v47  ;;  %v4093_v30 = vpack.c.bf16 %v8142_v59, %v8140_v20  ;;  %v4012_v27 = vsub.f32 %v8080_v8, %v4005_v0  ;;  %v5351_v47 = vld [vmem:[#allocation2 + $0x368] sm:$0xff]  ;;  %v5350_v20 = vld [vmem:[#allocation2 + $0x360] sm:$0xff] }
 0x87e   :  { %v8153_v29 = vmul.f32 %v4041_v41, %v8063_v55  ;;  %v4018_v60 = vmul.f32 %v4011_v39, %v8021_v15  ;;  %v4040_v24 = vsub.f32 %v4026_v26, %v4033_v40  ;;  %v4046_v0 = vmul.f32 %v4039_v6, %v8021_v15  ;;  %v8637_v40 = vld [vmem:[#allocation64_spill] sm:$0xff]  ;;  %v5334_v59 = vld [vmem:[#allocation2 + $0x2e0] sm:$0xff] }
 0x87f   :  { %v4008_v14 = vmul.f32 %v3994_v18, %v8628_v5  ;;  %v4036_v13 = vmul.f32 %v3994_v18, %v8629_v10  ;;  %v4064_v52 = vmul.f32 %v3994_v18, %v8630_v46  ;;  %v3930_v19 = vpop.f32.mrf.mxu1  ;;  %v4049_v18 = vmul.f32 %v4042_v12, %v3751_v54  ;;  %v8636_v5 = vld [vmem:[#allocation56_spill] sm:$0xff] }
 0x880   :  { %v3975_v48 = vmul.f32 %v3930_v19, %v8632_v35  ;;  %v4019_v21 = vmul.f32 %v4012_v27, %v8045_v61  ;;  %v3968_v56 = vmul.f32 %v7973_v57, %v8636_v5  ;;  %v3745_v39 = vadd.f32 %v8005_v42, %v7994_v53  ;;  %v5335_v36 = vld [vmem:[#allocation2 + $0x2e8] sm:$0xff]  ;;  %v8645_v5 = vld [vmem:[#allocation50_spill] sm:$0xff] }
 0x881   :  { %v4071_v22 = vsub.f32 %v4057_v33, %v4064_v52  ;;  %v4015_v7 = vsub.f32 %v4001_v44, %v4008_v14  ;;  %v4043_v62 = vsub.f32 %v4029_v1, %v4036_v13  ;;  %v4094_v63 = vpack.c.bf16 %v4049_v18, %v8153_v29  ;;  %v8635_v33 = vld [vmem:[#allocation62_spill] sm:$0xff]  ;;  %v8642_v18 = vld [vmem:[#allocation61_spill] sm:$0xff] }
 0x882   :  { %v3955_v28 = vpop.f32.mrf.mxu3  ;;  %v4091_v1 = vpack.c.bf16 %v8051_v49, %v8027_v25  ;;  %v4089_v58 = vpack.c.bf16 %v4019_v21, %v4018_v60  ;;  %v3753_v14 = vmul.f32 %v3742_v11, %v8637_v40  ;;  %v3982_v41 = vadd.f32 %v3975_v48, %v3968_v56  ;;  %v5331_v40 = vld [vmem:[#allocation2 + $0x2c8] sm:$0xff] }
 0x883   :  { %v8155_v23 = vmul.f32 %v4071_v22, %v3752_v31  ;;  %v3988_v44 = vmul.f32 %v3955_v28, %v8631_v51  ;;  %v4022_v45 = vmul.f32 %v4015_v7, %v3752_v31  ;;  %v4050_v37 = vmul.f32 %v4043_v62, %v3752_v31  ;;  %v8634_v31 = vld [vmem:[#allocation92_spill] sm:$0xff]  ;;  %v8638_v22 = vld [vmem:[#allocation54_spill] sm:$0xff] }
 0x884   :  { %v4058_v55 = vmul.f32 %v3955_v28, %v8521_v50  ;;  %v4047_v50 = vmul.f32 %v4040_v24, %v8045_v61  ;;  %v8639_v28 = vld [vmem:[#allocation9_spill] sm:$0xff] }
 0x885   :  { %v3995_v34 = vadd.f32 %v3988_v44, %v3981_v17  ;;  %v8640_v17 = vld [vmem:[#allocation57_spill] sm:$0xff]  ;;  %v8641_v44 = vld [vmem:[#allocation84_spill] sm:$0xff] }
 0x886   :  { %v4090_v52 = vpack.c.bf16 %v4047_v50, %v4046_v0  ;;  %v5332_v0 = vld [vmem:[#allocation2 + $0x2d0] sm:$0xff] }
 0x887   :  { %v4009_v2 = vmul.f32 %v3995_v34, %v8633_v43  ;;  %v4037_v54 = vmul.f32 %v3995_v34, %v8634_v31  ;;  %v4065_v8 = vmul.f32 %v3995_v34, %v8635_v33  ;;  %v3932_v49 = vpop.f32.mrf.mxu1  ;;  %v8643_v34 = vld [vmem:[#allocation67_spill] sm:$0xff]  ;;  %v5353_v31 = vld [vmem:[#allocation2 + $0x378] sm:$0xff]  ;;  %v5352_v33 = vld [vmem:[#allocation2 + $0x370] sm:$0xff] }
 0x888   :  { %v3754_v53 = vmul.f32 %v3745_v39, %v8643_v34  ;;  %v5357_v39 = vld [vmem:[#allocation2 + $0x3d8] sm:$0xff] }
 0x889   :  { %v4072_v10 = vsub.f32 %v4058_v55, %v4065_v8  ;;  %v4016_v13 = vsub.f32 %v8106_v38, %v4009_v2  ;;  %v4044_v25 = vsub.f32 %v4030_v4, %v4037_v54  ;;  %v4003_v38 = vmul.f32 %v7973_v57, %v8639_v28  ;;  %v5337_v54 = vld [vmem:[#allocation2 + $0x2f8] sm:$0xff]  ;;  %v5336_v8 = vld [vmem:[#allocation2 + $0x2f0] sm:$0xff] }
 0x88a   :  { %v3958_v46 = vpop.f32.mrf.mxu3  ;;  %v4031_v4 = vmul.f32 %v3930_v19, %v8639_v28  ;;  %4241 = vmatpush.bf16.msrb.mxu3 %v5337_v54  ;;  %v5340_v54 = vld [vmem:[#allocation2 + $0x310] sm:$0xff] }
 0x88b   :  { %v4079_v12 = vmul.f32 %v4072_v10, %v3753_v14  ;;  %v3989_v7 = vmul.f32 %v3958_v46, %v8638_v22  ;;  %v4023_v15 = vmul.f32 %v4016_v13, %v3753_v14  ;;  %v4051_v62 = vmul.f32 %v4044_v25, %v3753_v14  ;;  %v8646_v14 = vld [vmem:[#allocation8_spill] sm:$0xff]  ;;  %v5346_v25 = vld [vmem:[#allocation2 + $0x340] sm:$0xff] }
 0x88c   :  { %v4059_v48 = vmul.f32 %v3958_v46, %v8639_v28  ;;  %v8647_v10 = vld [vmem:[#allocation60_spill] sm:$0xff]  ;;  %v5358_v22 = vld [vmem:[#allocation2 + $0x3e0] sm:$0xff] }
 0x88d   :  { %v3996_v26 = vadd.f32 %v3989_v7, %v3982_v41  ;;  %v4097_v61 = vpack.c.bf16 %v4023_v15, %v4022_v45  ;;  %v4099_v11 = vpack.c.bf16 %v4079_v12, %v8155_v23  ;;  %v4098_v29 = vpack.c.bf16 %v4051_v62, %v4050_v37  ;;  %v5360_v41 = vld [vmem:[#allocation2 + $0x3f0] sm:$0xff]  ;;  %v5359_v12 = vld [vmem:[#allocation2 + $0x3e8] sm:$0xff] }
 0x88e   :  { %4242 = vmatpush.bf16.msrb.mxu3 %v5336_v8  ;;  %v4348_v13 = vmul.f32 %v8647_v10, %v8646_v14 }
 0x88f   :  { %v4010_v51 = vmul.f32 %v3996_v26, %v8640_v17  ;;  %v4038_v35 = vmul.f32 %v3996_v26, %v8641_v44  ;;  %v4066_v27 = vmul.f32 %v3996_v26, %v8642_v18  ;;  %v5356_v26 = vld [vmem:[#allocation2 + $0x3d0] sm:$0xff] }
 0x891   :  { %v4073_v42 = vsub.f32 %v4059_v48, %v4066_v27  ;;  %v4017_v45 = vsub.f32 %v4003_v38, %v4010_v51  ;;  %v4045_v60 = vsub.f32 %v4031_v4, %v4038_v35 }
 0x892   :  { %v3960_v23 = vpop.f32.mrf.mxu3  ;;  %4243 = vmatpush.bf16.msrb.mxu3 %v5335_v36 }
 0x893   :  { %v4080_v6 = vmul.f32 %v4073_v42, %v3754_v53  ;;  %v4024_v24 = vmul.f32 %v4017_v45, %v3754_v53  ;;  %v4052_v57 = vmul.f32 %v4045_v60, %v3754_v53  ;;  %v5431_v45 = vld [vmem:[%s8235_s8 + $0xa] ss:$0 sm:$0xff]  ;;  %v5345_v60 = vld [vmem:[#allocation2 + $0x338] sm:$0xff] }
 0x895   :  { %v4101_v55 = vpack.c.bf16 %v4024_v24, %v4024_v24  ;;  %v4102_v19 = vpack.c.bf16 %v4052_v57, %v4052_v57  ;;  %v4103_v37 = vpack.c.bf16 %v4080_v6, %v4080_v6 }
 0x896   :  { %4244 = vmatpush.bf16.msrb.mxu3 %v5334_v59 }
 0x897   :  { %v4108_v21 = vsel %vm1512_vm15, %v4101_v55, 0  ;;  %v4111_v43 = vsel %vm1512_vm15, %v4102_v19, 0  ;;  %v4114_v2 = vsel %vm1512_vm15, %v4103_v37, 0  ;;  %v5343_v55 = vld [vmem:[#allocation2 + $0x328] sm:$0xff] }
 0x898   :  { %4133 = vmatpush.bf16.msra.mxu0 %v4108_v21  ;;  %4146 = vmatpush.bf16.msra.mxu2 %v4111_v43  ;;  %v5342_v21 = vld [vmem:[#allocation2 + $0x320] sm:$0xff]  ;;  %v5341_v43 = vld [vmem:[#allocation2 + $0x318] sm:$0xff] }
 0x899   :  { %4159 = vmatpush.bf16.msra.mxu1 %v4114_v2 }
 0x89c   :  { %4134 = vmatpush.bf16.msra.mxu0 %v4097_v61  ;;  %4147 = vmatpush.bf16.msra.mxu2 %v4098_v29  ;;  %v5355_v61 = vld [vmem:[#allocation2 + $0x3c8] sm:$0xff] }
 0x89d   :  { %4160 = vmatpush.bf16.msra.mxu1 %v4099_v11  ;;  %v5354_v11 = vld [vmem:[#allocation2 + $0x3c0] sm:$0xff] }
 0x8a0   :  { %4135 = vmatpush.bf16.msra.mxu0 %v4093_v30  ;;  %4148 = vmatpush.bf16.msra.mxu2 %v4094_v63  ;;  %v5333_v30 = vld [vmem:[#allocation2 + $0x2d8] sm:$0xff]  ;;  %v5348_v63 = vld [vmem:[#allocation2 + $0x350] sm:$0xff] }
 0x8a1   :  { %4161 = vmatpush.bf16.msra.mxu1 %v4095_v3  ;;  %v5349_v3 = vld [vmem:[#allocation2 + $0x358] sm:$0xff]  ;;  %4245 = vmatpush.bf16.msrb.mxu3 %v5333_v30 }
 0x8a4   :  { %4136 = vmatpush.bf16.msra.mxu0 %v4089_v58  ;;  %4149 = vmatpush.bf16.msra.mxu2 %v4090_v52  ;;  %v5347_v58 = vld [vmem:[#allocation2 + $0x348] sm:$0xff]  ;;  %v5361_v52 = vld [vmem:[#allocation2 + $0x3f8] sm:$0xff] }
 0x8a5   :  { %4162 = vmatpush.bf16.msra.mxu1 %v4091_v1  ;;  %v4346_v1 = vmul.f32 %v7847_v16, %v7715_v32  ;;  %4246 = vmatpush.bf16.msrb.mxu3 %v5332_v0  ;;  %v5330_v32 = vld [vmem:[#allocation2 + $0x2c0] sm:$0xff]  ;;  %v5430_v0 = vld [vmem:[%s8235_s8 + $0xc] ss:$0 sm:$0xff] }
 0x8a7   :  { %5093 = vmatmul.msk.bf16.vlgmr.msra.gmra.mxu0 %vm1668_vm7, %v8094_v9  ;;  %5094 = vmatmul.msk.bf16.vlgmr.msra.gmra.mxu2 %vm1668_vm7, %v8094_v9 }
 0x8a8   :  { %4418 = vmatpush.bf16.msrb.mxu2 %v5353_v31  ;;  %5095 = vmatmul.msk.bf16.vlgmr.msra.gmra.mxu1 %vm1668_vm7, %v8094_v9  ;;  %v8644_v9 = vld [vmem:[#allocation18_spill] sm:$0xff] }
 0x8a9   :  { %v4345_v56 = vmul.f32 %v8645_v5, %v8644_v9  ;;  %4247 = vmatpush.bf16.msrb.mxu3 %v5331_v40  ;;  %4509 = vmatpush.bf16.msrb.mxu1 %v5361_v52  ;;  %v5432_v9 = vld [vmem:[%s8235_s8 + $0xf] ss:$0 sm:$0xff] }
 0x8aa   :  { %4332 = vmatpush.bf16.msrb.mxu0 %v5345_v60 }
 0x8ab   :  { %v4347_v50 = vadd.f32 %v4346_v1, %v4345_v56 }
 0x8ac   :  { %4419 = vmatpush.bf16.msrb.mxu2 %v5352_v33  ;;  %v5339_v33 = vld [vmem:[#allocation2 + $0x308] sm:$0xff] }
 0x8ad   :  { %v4349_v49 = vadd.f32 %v4348_v13, %v4347_v50  ;;  %4248 = vmatpush.bf16.msrb.mxu3 %v5330_v32  ;;  %4510 = vmatpush.bf16.msrb.mxu1 %v5360_v41 }
 0x8af   :  { %v4368_v46 = vpack.c.bf16 %v4349_v49, %v4349_v49 }
 0x8b0   :  { %4420 = vmatpush.bf16.msrb.mxu2 %v5351_v47 }
 0x8b1   :  { %4511 = vmatpush.bf16.msrb.mxu1 %v5359_v12 }
 0x8b4   :  { %4421 = vmatpush.bf16.msrb.mxu2 %v5350_v20  ;;  %v5338_v20 = vld [vmem:[#allocation2 + $0x300] sm:$0xff] }
 0x8b5   :  { %4512 = vmatpush.bf16.msrb.mxu1 %v5358_v22 }
 0x8b8   :  { %4422 = vmatpush.bf16.msrb.mxu2 %v5349_v3 }
 0x8b9   :  { %4513 = vmatpush.bf16.msrb.mxu1 %v5357_v39  ;;  %v5433_v39 = vld [vmem:[%s8235_s8 + $0xb] ss:$0 sm:$0xff] }
 0x8bc   :  { %4423 = vmatpush.bf16.msrb.mxu2 %v5348_v63 }
 0x8bd   :  { %4514 = vmatpush.bf16.msrb.mxu1 %v5356_v26 }
 0x8c0   :  { %4424 = vmatpush.bf16.msrb.mxu2 %v5347_v58 }
 0x8c1   :  { %4515 = vmatpush.bf16.msrb.mxu1 %v5355_v61 }
 0x8c4   :  { %4425 = vmatpush.bf16.msrb.mxu2 %v5346_v25 }
 0x8c5   :  { %4516 = vmatpush.bf16.msrb.mxu1 %v5354_v11 }
 0x8c7   :  { %4426 = vmatmul.bf16.vlgmr.msrb.gmra.mxu2 %v4368_v46 }
 0x8fa   :  { %v4125_v7 = vpop.f32.mrf.mxu2 }
 0x8fb   :  { %v4191_v15 = vpack.c.bf16 %v4125_v7, %v4125_v7 }
 0x8fd   :  { %4249 = vmatmul.bf16.vlgmr.msrb.gmra.mxu3 %v4191_v15 }
 0x902   :  { %v4127_v62 = vpop.f32.mrf.mxu2 }
 0x924   :  { %v4138_v28 = vpop.f32.mrf.mxu0 }
 0x925   :  { %v4164_v38 = vpop.f32.mrf.mxu1  ;;  %v4168_v29 = vmul.f32 %v4138_v28, %v8645_v5 }
 0x926   :  { %v4170_v44 = vmul.f32 %v4164_v38, %v8647_v10 }
 0x92a   :  { %v4151_v4 = vpop.f32.mrf.mxu2 }
 0x92b   :  { %v4169_v17 = vmul.f32 %v4151_v4, %v7847_v16  ;;  %v5344_v16 = vld [vmem:[#allocation2 + $0x330] sm:$0xff] }
 0x92c   :  { %v4140_v51 = vpop.f32.mrf.mxu0  ;;  %4333 = vmatpush.bf16.msrb.mxu0 %v5344_v16 }
 0x92d   :  { %v4171_v35 = vadd.f32 %v4169_v17, %v4168_v29  ;;  %v4166_v48 = vpop.f32.mrf.mxu1  ;;  %v8648_v17 = vld [vmem:[#allocation49_spill] sm:$0xff] }
 0x92f   :  { %v4172_v18 = vadd.f32 %v4171_v35, %v4170_v44 }
 0x930   :  { %4334 = vmatpush.bf16.msrb.mxu0 %v5343_v55 }
 0x931   :  { %v4459_v27 = vpack.c.bf16 %v4172_v18, %v4172_v18 }
 0x932   :  { %v4153_v34 = vpop.f32.mrf.mxu2 }
 0x933   :  { %4517 = vmatmul.bf16.vlgmr.msrb.gmra.mxu1 %v4459_v27 }
 0x934   :  { %4335 = vmatpush.bf16.msrb.mxu0 %v5342_v21 }
 0x938   :  { %4336 = vmatpush.bf16.msrb.mxu0 %v5341_v43 }
 0x93c   :  { %4337 = vmatpush.bf16.msrb.mxu0 %v5340_v54 }
 0x940   :  { %4338 = vmatpush.bf16.msrb.mxu0 %v5339_v33 }
 0x944   :  { %4339 = vmatpush.bf16.msrb.mxu0 %v5338_v20 }
 0x94a   :  { %v4427_v53 = vpop.f32.mrf.mxu2 }
 0x94b   :  { %v4428_v5 = vadd.f32 %v5430_v0, %v4427_v53 }
 0x94d   :  { %v4432_v58 = vand.u32 2147483647, %v4428_v5  ;;  %v4431_v22 = vmax.f32 %v4428_v5, 0.0 }
 0x94f   :  { %v4433_v40 = vsub.f32 0.0, %v4432_v58 }
 0x951   :  { %v4434_v10 = vmul.f32 1.442695, %v4433_v40 }
 0x952   :  { %v4429_v42 = vpop.f32.mrf.mxu2 }
 0x980   :  { %v4250_v23 = vpop.f32.mrf.mxu3 }
 0x981   :  { %v4251_v6 = vadd.f32 %v5431_v45, %v4250_v23 }
 0x983   :  { %v4255_v24 = vand.u32 2147483647, %v4251_v6  ;;  %v4254_v47 = vmax.f32 %v4251_v6, 0.0 }
 0x985   :  { %v4256_v57 = vsub.f32 0.0, %v4255_v24 }
 0x987   :  { %v4257_v19 = vmul.f32 1.442695, %v4256_v57 }
 0x988   :  { %v4252_v37 = vpop.f32.mrf.mxu3 }
 0x989   :  { %5602 = vpow2.f32 %v4257_v19 }
 0x98f   :  { %v5603_v2 = vpop.eup %5602 }
 0x990   :  { %v4259_v31 = vadd.f32 1.0, %v5603_v2 }
 0x992   :  { %5604 = vlog2.f32 %v4259_v31 }
 0x993   :  { %5606 = vpow2.f32 %v4434_v10 }
 0x998   :  { %v5605_v8 = vpop.eup %5604 }
 0x999   :  { %v4261_v36 = vmul.f32 0.6931472, %v5605_v8  ;;  %v5607_v25 = vpop.eup %5606 }
 0x99a   :  { %v4436_v46 = vadd.f32 1.0, %v5607_v25 }
 0x99b   :  { %v4262_v59 = vadd.f32 %v4261_v36, %v4254_v47 }
 0x99d   :  { %v5128_v3 = vadd.f32 -0.6931472, %v4262_v59 }
 0x99f   :  { %v4282_v30 = vpack.c.bf16 %v5128_v3, %v5128_v3 }
 0x9a1   :  { %4340 = vmatmul.bf16.vlgmr.msrb.gmra.mxu0 %v4282_v30 }
 0x9b0   :  { %v4518_v63 = vpop.f32.mrf.mxu1 }
 0x9b1   :  { %v4519_v56 = vadd.f32 %v5432_v9, %v4518_v63 }
 0x9b3   :  { %v4523_v50 = vand.u32 2147483647, %v4519_v56  ;;  %v4522_v62 = vmax.f32 %v4519_v56, 0.0 }
 0x9b5   :  { %v4524_v14 = vsub.f32 0.0, %v4523_v50 }
 0x9b7   :  { %v4525_v13 = vmul.f32 1.442695, %v4524_v14 }
 0x9b8   :  { %v4520_v1 = vpop.f32.mrf.mxu1 }
 0x9b9   :  { %5608 = vpow2.f32 %v4525_v13 }
 0x9ba   :  { %5610 = vlog2.f32 %v4436_v46 }
 0x9bf   :  { %v5609_v49 = vpop.eup %5608 }
 0x9c0   :  { %v4527_v32 = vadd.f32 1.0, %v5609_v49  ;;  %v5611_v52 = vpop.eup %5610 }
 0x9c1   :  { %v4438_v12 = vmul.f32 0.6931472, %v5611_v52 }
 0x9c2   :  { %5612 = vlog2.f32 %v4527_v32 }
 0x9c3   :  { %v4439_v15 = vadd.f32 %v4438_v12, %v4431_v22 }
 0x9c5   :  { %v5193_v28 = vadd.f32 -0.6931472, %v4439_v15 }
 0x9c8   :  { %v5613_v41 = vpop.eup %5612 }
 0x9c9   :  { %v4529_v7 = vmul.f32 0.6931472, %v5613_v41 }
 0x9cb   :  { %v4530_v26 = vadd.f32 %v4529_v7, %v4522_v62 }
 0x9cd   :  { %v5226_v38 = vadd.f32 -0.6931472, %v4530_v26 }
 0xa1e   :  { %v4341_v61 = vpop.f32.mrf.mxu0 }
 0xa1f   :  { %v4342_v11 = vadd.f32 %v5433_v39, %v4341_v61 }
 0xa21   :  { %v4532_v4 = vadd.f32 %v5193_v28, %v4342_v11 }
 0xa23   :  { %v4533_v29 = vadd.f32 %v5226_v38, %v4532_v4 }
 0xa25   :  { %v4534_v51 = vadd.f32 %v4533_v29, %v8648_v17 }
 0xa26   :  { %v4343_v44 = vpop.f32.mrf.mxu0 }
 0xa27   :  { %4535 = vst [vmem:[#allocation5] sm:$0xff] %v4534_v51 }
 0xa28   :  { %4546 = dma.vmem_to_hbm [thread:$0]  %s4542_s3, 128, %s4544_s11, [#allocation4]  }
 0xa29   :  { %5683 = dma.done.wait [#allocation4], 128  }
 0xa2a   :  { %5684 = vsyncadd [#allocation4], 4294967168 }
 0xa2b   :  { %4551 = vsyncpa [#allocation3], 1 }
 0xa2c   :  { %4552 = vsyncpa [#allocation4], 1 }

</bundles_post_ra>
